<compile_context>
chip_gen: v7x
topology: tpu7x:2x2x1
jax: 0.10.0
libtpu: 0.0.40
codegen_flags: <defaults>
</compile_context>

<pallas_src>
import numpy as np
import jax
import jax.numpy as jnp
from jax.experimental import pallas as pl
from jax.experimental.pallas import tpu as pltpu


# Pooling stage parameters, exactly as in the PyTorch module (dilation == 1).
_STAGES = (
    dict(kernel_size=3,         stride=3,         padding=0,         ceil_mode=False),
    dict(kernel_size=4,         stride=2,         padding=2,         ceil_mode=False),
    dict(kernel_size=(1, 2, 3), stride=1,         padding=(0, 0, 1), ceil_mode=False),
    dict(kernel_size=(3, 4, 5), stride=(1, 2, 2), padding=(1, 2, 2), ceil_mode=True),
    dict(kernel_size=(2, 3, 3), stride=1,         padding=1,         ceil_mode=False),
    dict(kernel_size=2,         stride=1,         padding=0,         ceil_mode=True),
)


# ------------------------------- geometry ------------------------------------
def _triple(v):
    if isinstance(v, (tuple, list)):
        assert len(v) == 3
        return tuple(int(t) for t in v)
    return (int(v),) * 3


def _out_size(L, k, s, p, ceil_mode):
    """PyTorch pooling output-size formula (dilation == 1)."""
    if ceil_mode:
        o = (L + 2 * p - k + s - 1) // s + 1
        if (o - 1) * s >= L + p:   # last window must start inside input+left pad
            o -= 1
    else:
        o = (L + 2 * p - k) // s + 1
    return o


def _build_cfgs(in_spatial, stages):
    """Static per-stage geometry: kernels, strides, pads, padded buffer sizes."""
    cfgs = []
    cur = tuple(in_spatial)
    for sp in stages:
        ks = _triple(sp["kernel_size"])
        st = _triple(sp["stride"])
        pd = _triple(sp["padding"])
        cm = bool(sp["ceil_mode"])
        outs = tuple(_out_size(L, k, s, p, cm) for L, k, s, p in zip(cur, ks, st, pd))
        assert all(o > 0 for o in outs), "empty pooling output"
        rpad = tuple(max(0, (o - 1) * s + k - L - p)
                     for L, k, s, p, o in zip(cur, ks, st, pd, outs))
        padded = tuple(p + L + r for p, L, r in zip(pd, cur, rpad))
        cfgs.append(dict(ks=ks, st=st, lpad=pd, rpad=rpad, ins=cur,
                         padded=padded, outs=outs))
        cur = outs
    return cfgs


# ----------------------------- in-kernel pieces -------------------------------
def _fill_pad_border(buf_ref, cfg):
    """Write -inf ONLY to the pad cells of a flattened (Dp*Hp, Wp) buffer.

    The interior (the stage's real input region) is fully overwritten by the
    producing stage on every grid step, so it is never touched here.
    """
    Dp, Hp, Wp = cfg["padded"]
    ld, lh, lw = cfg["lpad"]
    Di, Hi, Wi = cfg["ins"]
    dt = buf_ref.dtype

    def fill(r0, r1, c0, c1):
        if r1 > r0 and c1 > c0:
            buf_ref[r0:r1, c0:c1] = jnp.full((r1 - r0, c1 - c0), -jnp.inf, dt)

    fill(0, ld * Hp, 0, Wp)                           # leading D pad slabs
    fill((ld + Di) * Hp, Dp * Hp, 0, Wp)              # trailing D pad slabs
    for d in range(ld, ld + Di):                      # H pad rows per interior slab
        fill(d * Hp, d * Hp + lh, 0, Wp)
        fill(d * Hp + lh + Hi, (d + 1) * Hp, 0, Wp)
    fill(ld * Hp, (ld + Di) * Hp, 0, lw)              # W pad columns
    fill(ld * Hp, (ld + Di) * Hp, lw + Wi, Wp)


def _run_stage(src_ref, dst_ref, dst_Hp, dst_off, cfg, colbuf, tbuf):
    """One max_pool3d stage on a flattened (Dp*Hp, Wp) source ref."""
    kd, kh, kw = cfg["ks"]
    sd, sh, sw = cfg["st"]
    Do, Ho, Wo = cfg["outs"]
    _, Hp, Wp = cfg["padded"]
    odl, ohl, owl = dst_off
    L1w = sw * (Wo - 1) + 1
    R = Do * Ho

    for j in range(Do):                               # static -> fully unrolled
        # Fused D-max + H-window-max + H stride decimation: kd*kh strided
        # sublane reads directly off the source ref (no tmp round trip).
        acc = None
        for dz in range(kd):
            row0 = (j * sd + dz) * Hp
            for r in range(kh):
                if sh > 1:
                    v = src_ref[pl.ds(row0 + r, Ho, stride=sh), :]
                else:
                    v = src_ref[pl.ds(row0 + r, Ho), :]
                acc = v if acc is None else jnp.maximum(acc, v)
        # W-window maxima: kw lane-shifted slices.
        w = acc[:, 0:L1w]
        for c in range(1, kw):
            w = jnp.maximum(w, acc[:, c:c + L1w])
        if sw == 1:                                   # no W decimation needed
            r0 = (odl + j) * dst_Hp + ohl
            dst_ref[r0:r0 + Ho, owl:owl + Wo] = w
        else:                                         # stage rows for batched decimation
            colbuf[j * Ho:(j + 1) * Ho, 0:L1w] = w

    if sw > 1:
        # Batched W decimation for the whole stage: ONE transpose + ONE
        # strided sublane read + ONE transpose back (lanes never gathered).
        tbuf[0:L1w, 0:R] = colbuf[0:R, 0:L1w].T
        dec = tbuf[pl.ds(0, Wo, stride=sw), 0:R]      # (Wo, R)
        out = dec.T                                   # (R, Wo)
        for j in range(Do):
            r0 = (odl + j) * dst_Hp + ohl
            dst_ref[r0:r0 + Ho, owl:owl + Wo] = out[j * Ho:(j + 1) * Ho, :]


# ------------------------------ fused chain -----------------------------------
def _vmem_cap_bytes():
    try:
        cap = getattr(pltpu.get_tpu_info(), "vmem_capacity_bytes", None)
        if cap:
            return int(cap)
    except Exception:
        pass
    return 64 << 20   # conservative: v7x per-TensorCore VMEM


def max_pool3d_chain(x4, stages=_STAGES):
    """x4: (B, D, H, W) float32 -> (B, Do, Ho, Wo).  The six max_pool3d stages
    run in ONE fused Pallas kernel (grid over B; intermediates in VMEM)."""
    assert x4.dtype == jnp.float32
    B, D, H, W = x4.shape
    cfgs = _build_cfgs((D, H, W), stages)
    n_stages = len(cfgs)
    Do, Ho, Wo = cfgs[-1]["outs"]

    # One padded, flattened (Dp*Hp, Wp) staging buffer per stage input.
    # Stage 0 of this module (k=3, s=3, p=0) needs no padding, so it reads the
    # input block directly; the generic padded path is kept for other configs.
    stage0_copy = any(l > 0 or r > 0
                      for l, r in zip(cfgs[0]["lpad"], cfgs[0]["rpad"]))
    src_buf, buf_cfgs = [], []
    if stage0_copy:
        src_buf.append(len(buf_cfgs)); buf_cfgs.append(cfgs[0])
    else:
        src_buf.append(None)
    for i in range(1, n_stages):
        src_buf.append(len(buf_cfgs)); buf_cfgs.append(cfgs[i])

    # Shared scratch for the batched W decimation (stages with sw > 1).
    dec_stages = [c for c in cfgs if c["st"][2] > 1]
    maxR = max([c["outs"][0] * c["outs"][1] for c in dec_stages], default=8)
    maxL = max([c["st"][2] * (c["outs"][2] - 1) + 1 for c in dec_stages], default=8)

    def kernel(x_ref, o_ref, colbuf, tbuf, *bufs):
        # 1) -inf only on the pad borders (interiors are overwritten below).
        for bi, cfg in enumerate(buf_cfgs):
            _fill_pad_border(bufs[bi], cfg)
        # 2) Generic path: copy the input into a padded stage-0 buffer.
        if stage0_copy:
            c0 = cfgs[0]
            ld, lh, lw = c0["lpad"]
            Di, Hi, Wi = c0["ins"]
            Hp0 = c0["padded"][1]
            for d in range(Di):
                dst_r0 = (ld + d) * Hp0 + lh
                bufs[src_buf[0]][dst_r0:dst_r0 + Hi, lw:lw + Wi] = \
                    x_ref[d * Hi:(d + 1) * Hi, :]
        # 3) The six pooling stages, all in VMEM.
        for i in range(n_stages):
            src = x_ref if src_buf[i] is None else bufs[src_buf[i]]
            if i + 1 < n_stages:
                dst = bufs[src_buf[i + 1]]
                dst_Hp = cfgs[i + 1]["padded"][1]
                doff = cfgs[i + 1]["lpad"]
            else:
                dst = o_ref
                dst_Hp = Ho
                doff = (0, 0, 0)
            _run_stage(src, dst, dst_Hp, doff, cfgs[i], colbuf, tbuf)

    scratch = [pltpu.VMEM((maxR, maxL), jnp.float32),      # colbuf
               pltpu.VMEM((maxL, maxR), jnp.float32)]      # tbuf (de-aliased)
    scratch += [pltpu.VMEM((c["padded"][0] * c["padded"][1], c["padded"][2]),
                           jnp.float32) for c in buf_cfgs]

    # VMEM budget: double-buffered in/out blocks + scratch + margin, capped by
    # the physical per-core VMEM of the current TPU generation (v7x: 64 MiB).
    bytes_in = D * H * W * 4
    bytes_out = Do * Ho * Wo * 4
    bytes_scr = 4 * (2 * maxR * maxL +
                     sum(c["padded"][0] * c["padded"][1] * c["padded"][2]
                         for c in buf_cfgs))
    vmem_need = 2 * bytes_in + 2 * bytes_out + bytes_scr
    cap = _vmem_cap_bytes()
    vmem_limit = int(min(cap - (2 << 20), max(vmem_need + (8 << 20), 16 << 20)))

    out2 = pl.pallas_call(
        kernel,
        out_shape=jax.ShapeDtypeStruct((B, Do * Ho, Wo), x4.dtype),
        grid=(B,),
        in_specs=[pl.BlockSpec((None, D * H, W), lambda b: (b, 0, 0))],
        out_specs=pl.BlockSpec((None, Do * Ho, Wo), lambda b: (b, 0, 0)),
        scratch_shapes=scratch,
        compiler_params=pltpu.CompilerParams(
            dimension_semantics=("parallel",),
            vmem_limit_bytes=vmem_limit,
        ),
    )(x4.reshape(B, D * H, W))
    return out2.reshape(B, Do, Ho, Wo)


# ------------------------------ model forward ---------------------------------
def model_forward(x):
    """Same semantics as the PyTorch Model.forward for x of shape (N,C,D,H,W).

    The 5-D branch and the 4-D branch (y = x.reshape(N*C, D, H, W)) apply the
    identical chain to the same data, so the chain runs ONCE and is reused.
    """
    N, C, D, H, W = x.shape
    x4 = x.reshape(N * C, D, H, W)
    pooled = max_pool3d_chain(x4)                       # (N*C, Do, Ho, Wo)
    x_out = pooled.reshape((N, C) + pooled.shape[1:])   # 5-D NCDHW branch
    return x_out, pooled


# --------------------------- numpy reference (check) --------------------------
def _np_max_pool3d(x, kernel_size, stride, padding, ceil_mode):
    ks = _triple(kernel_size)
    st = _triple(stride)
    pd = _triple(padding)
    B = x.shape[0]
    ins = x.shape[1:]
    outs = tuple(_out_size(L, k, s, p, ceil_mode)
                 for L, k, s, p in zip(ins, ks, st, pd))
    pads = [(0, 0)] + [(p, max(0, (o - 1) * s + k - L - p))
                       for L, k, s, p, o in zip(ins, ks, st, pd, outs)]
    xp = np.pad(x, pads, mode="constant", constant_values=-np.inf)
    out = np.empty((B,) + outs, dtype=x.dtype)
    for b in range(B):
        for od in range(outs[0]):
            for oh in range(outs[1]):
                for ow in range(outs[2]):
                    win = xp[b,
                             od * st[0]: od * st[0] + ks[0],
                             oh * st[1]: oh * st[1] + ks[1],
                             ow * st[2]: ow * st[2] + ks[2]]
                    out[b, od, oh, ow] = win.max()
    return out


def _np_forward(x):
    N, C, D, H, W = x.shape
    t = x.reshape(N * C, D, H, W)
    for sp in _STAGES:
        t = _np_max_pool3d(t, sp["kernel_size"], sp["stride"],
                           sp["padding"], sp["ceil_mode"])
    return t.reshape((N, C) + t.shape[1:]), t


# ----------------------------------- main -------------------------------------
if __name__ == "__main__":
    # Small NCDHW shape consistent with the module (batch folded into channels
    # by the reshape, like y = x.reshape(12, 96, 128, 128)).  B = N*C = 4 so
    # the parallel grid splits evenly across v7x's two TensorCores.
    key = jax.random.PRNGKey(0)
    x = jax.random.uniform(key, (1, 4, 15, 24, 24), dtype=jnp.float32)

    fwd = jax.jit(model_forward)
    x_out, y_out = fwd(x)
    jax.block_until_ready(x_out)
    jax.block_until_ready(y_out)

    x_ref, y_ref = _np_forward(np.asarray(x))
    np.testing.assert_allclose(np.asarray(x_out), x_ref, rtol=0, atol=0)
    np.testing.assert_allclose(np.asarray(y_out), y_ref, rtol=0, atol=0)

    print("KERNEL_OK")
</pallas_src>

<mosaic_0001>
module attributes {stable_mosaic.version = 11 : i64} {
  func.func @kernel(%arg0: i32, %arg1: memref<1x360x24xf32, #tpu.memory_space<vmem>>, %arg2: memref<1x6x2xf32, #tpu.memory_space<vmem>>, %arg3: memref<40x22xf32, #tpu.memory_space<vmem>>, %arg4: memref<22x40xf32, #tpu.memory_space<vmem>>, %arg5: memref<96x12xf32, #tpu.memory_space<vmem>>, %arg6: memref<15x7xf32, #tpu.memory_space<vmem>>, %arg7: memref<40x9xf32, #tpu.memory_space<vmem>>, %arg8: memref<25x5xf32, #tpu.memory_space<vmem>>, %arg9: memref<12x3xf32, #tpu.memory_space<vmem>>) attributes {dimension_semantics = [#tpu.dimension_semantics<parallel>], iteration_bounds = array<i64: 4>, scalar_prefetch = 0 : i64, scratch_operands = 7 : i64, tpu.core_type = #tpu.core_type<tc>, window_params = [{transform_indices = @transform_0, window_bounds = array<i64: 1, 360, 24>}, {transform_indices = @transform_1, window_bounds = array<i64: 1, 6, 2>}]} {
    %cst = arith.constant 0xFF800000 : f32
    %0 = vector.broadcast %cst : f32 to vector<24x12xf32>
    %c0 = arith.constant 0 : index
    %c0_0 = arith.constant 0 : index
    %1 = vector.load %arg5[%c0, %c0_0] : memref<96x12xf32, #tpu.memory_space<vmem>>, vector<24x12xf32>
    tpu.vector_store %arg5[%c0, %c0_0], %0 {strides = array<i32>} : memref<96x12xf32, #tpu.memory_space<vmem>>, vector<24x12xf32>,
    %cst_1 = arith.constant 0xFF800000 : f32
    %2 = vector.broadcast %cst_1 : f32 to vector<12x12xf32>
    %c84 = arith.constant 84 : index
    %c0_2 = arith.constant 0 : index
    %3 = vector.load %arg5[%c84, %c0_2] : memref<96x12xf32, #tpu.memory_space<vmem>>, vector<12x12xf32>
    tpu.vector_store %arg5[%c84, %c0_2], %2 {strides = array<i32>} : memref<96x12xf32, #tpu.memory_space<vmem>>, vector<12x12xf32>,
    %cst_3 = arith.constant 0xFF800000 : f32
    %4 = vector.broadcast %cst_3 : f32 to vector<2x12xf32>
    %c24 = arith.constant 24 : index
    %c0_4 = arith.constant 0 : index
    %5 = vector.load %arg5[%c24, %c0_4] : memref<96x12xf32, #tpu.memory_space<vmem>>, vector<2x12xf32>
    tpu.vector_store %arg5[%c24, %c0_4], %4 {strides = array<i32>} : memref<96x12xf32, #tpu.memory_space<vmem>>, vector<2x12xf32>,
    %cst_5 = arith.constant 0xFF800000 : f32
    %6 = vector.broadcast %cst_5 : f32 to vector<2x12xf32>
    %c34 = arith.constant 34 : index
    %c0_6 = arith.constant 0 : index
    %7 = vector.load %arg5[%c34, %c0_6] : memref<96x12xf32, #tpu.memory_space<vmem>>, vector<2x12xf32>
    tpu.vector_store %arg5[%c34, %c0_6], %6 {strides = array<i32>} : memref<96x12xf32, #tpu.memory_space<vmem>>, vector<2x12xf32>,
    %cst_7 = arith.constant 0xFF800000 : f32
    %8 = vector.broadcast %cst_7 : f32 to vector<2x12xf32>
    %c36 = arith.constant 36 : index
    %c0_8 = arith.constant 0 : index
    %9 = vector.load %arg5[%c36, %c0_8] : memref<96x12xf32, #tpu.memory_space<vmem>>, vector<2x12xf32>
    tpu.vector_store %arg5[%c36, %c0_8], %8 {strides = array<i32>} : memref<96x12xf32, #tpu.memory_space<vmem>>, vector<2x12xf32>,
    %cst_9 = arith.constant 0xFF800000 : f32
    %10 = vector.broadcast %cst_9 : f32 to vector<2x12xf32>
    %c46 = arith.constant 46 : index
    %c0_10 = arith.constant 0 : index
    %11 = vector.load %arg5[%c46, %c0_10] : memref<96x12xf32, #tpu.memory_space<vmem>>, vector<2x12xf32>
    tpu.vector_store %arg5[%c46, %c0_10], %10 {strides = array<i32>} : memref<96x12xf32, #tpu.memory_space<vmem>>, vector<2x12xf32>,
    %cst_11 = arith.constant 0xFF800000 : f32
    %12 = vector.broadcast %cst_11 : f32 to vector<2x12xf32>
    %c48 = arith.constant 48 : index
    %c0_12 = arith.constant 0 : index
    %13 = vector.load %arg5[%c48, %c0_12] : memref<96x12xf32, #tpu.memory_space<vmem>>, vector<2x12xf32>
    tpu.vector_store %arg5[%c48, %c0_12], %12 {strides = array<i32>} : memref<96x12xf32, #tpu.memory_space<vmem>>, vector<2x12xf32>,
    %cst_13 = arith.constant 0xFF800000 : f32
    %14 = vector.broadcast %cst_13 : f32 to vector<2x12xf32>
    %c58 = arith.constant 58 : index
    %c0_14 = arith.constant 0 : index
    %15 = vector.load %arg5[%c58, %c0_14] : memref<96x12xf32, #tpu.memory_space<vmem>>, vector<2x12xf32>
    tpu.vector_store %arg5[%c58, %c0_14], %14 {strides = array<i32>} : memref<96x12xf32, #tpu.memory_space<vmem>>, vector<2x12xf32>,
    %cst_15 = arith.constant 0xFF800000 : f32
    %16 = vector.broadcast %cst_15 : f32 to vector<2x12xf32>
    %c60 = arith.constant 60 : index
    %c0_16 = arith.constant 0 : index
    %17 = vector.load %arg5[%c60, %c0_16] : memref<96x12xf32, #tpu.memory_space<vmem>>, vector<2x12xf32>
    tpu.vector_store %arg5[%c60, %c0_16], %16 {strides = array<i32>} : memref<96x12xf32, #tpu.memory_space<vmem>>, vector<2x12xf32>,
    %cst_17 = arith.constant 0xFF800000 : f32
    %18 = vector.broadcast %cst_17 : f32 to vector<2x12xf32>
    %c70 = arith.constant 70 : index
    %c0_18 = arith.constant 0 : index
    %19 = vector.load %arg5[%c70, %c0_18] : memref<96x12xf32, #tpu.memory_space<vmem>>, vector<2x12xf32>
    tpu.vector_store %arg5[%c70, %c0_18], %18 {strides = array<i32>} : memref<96x12xf32, #tpu.memory_space<vmem>>, vector<2x12xf32>,
    %cst_19 = arith.constant 0xFF800000 : f32
    %20 = vector.broadcast %cst_19 : f32 to vector<2x12xf32>
    %c72 = arith.constant 72 : index
    %c0_20 = arith.constant 0 : index
    %21 = vector.load %arg5[%c72, %c0_20] : memref<96x12xf32, #tpu.memory_space<vmem>>, vector<2x12xf32>
    tpu.vector_store %arg5[%c72, %c0_20], %20 {strides = array<i32>} : memref<96x12xf32, #tpu.memory_space<vmem>>, vector<2x12xf32>,
    %cst_21 = arith.constant 0xFF800000 : f32
    %22 = vector.broadcast %cst_21 : f32 to vector<2x12xf32>
    %c82 = arith.constant 82 : index
    %c0_22 = arith.constant 0 : index
    %23 = vector.load %arg5[%c82, %c0_22] : memref<96x12xf32, #tpu.memory_space<vmem>>, vector<2x12xf32>
    tpu.vector_store %arg5[%c82, %c0_22], %22 {strides = array<i32>} : memref<96x12xf32, #tpu.memory_space<vmem>>, vector<2x12xf32>,
    %cst_23 = arith.constant 0xFF800000 : f32
    %24 = vector.broadcast %cst_23 : f32 to vector<60x2xf32>
    %c24_24 = arith.constant 24 : index
    %c0_25 = arith.constant 0 : index
    %25 = vector.load %arg5[%c24_24, %c0_25] : memref<96x12xf32, #tpu.memory_space<vmem>>, vector<60x2xf32>
    tpu.vector_store %arg5[%c24_24, %c0_25], %24 {strides = array<i32>} : memref<96x12xf32, #tpu.memory_space<vmem>>, vector<60x2xf32>,
    %cst_26 = arith.constant 0xFF800000 : f32
    %26 = vector.broadcast %cst_26 : f32 to vector<60x2xf32>
    %c24_27 = arith.constant 24 : index
    %c10 = arith.constant 10 : index
    %27 = vector.load %arg5[%c24_27, %c10] : memref<96x12xf32, #tpu.memory_space<vmem>>, vector<60x2xf32>
    tpu.vector_store %arg5[%c24_27, %c10], %26 {strides = array<i32>} : memref<96x12xf32, #tpu.memory_space<vmem>>, vector<60x2xf32>,
    %cst_28 = arith.constant 0xFF800000 : f32
    %28 = vector.broadcast %cst_28 : f32 to vector<15x1xf32>
    %c0_29 = arith.constant 0 : index
    %c0_30 = arith.constant 0 : index
    %29 = vector.load %arg6[%c0_29, %c0_30] : memref<15x7xf32, #tpu.memory_space<vmem>>, vector<15x1xf32>
    tpu.vector_store %arg6[%c0_29, %c0_30], %28 {strides = array<i32>} : memref<15x7xf32, #tpu.memory_space<vmem>>, vector<15x1xf32>,
    %cst_31 = arith.constant 0xFF800000 : f32
    %30 = vector.broadcast %cst_31 : f32 to vector<15x1xf32>
    %c0_32 = arith.constant 0 : index
    %c6 = arith.constant 6 : index
    %31 = vector.load %arg6[%c0_32, %c6] : memref<15x7xf32, #tpu.memory_space<vmem>>, vector<15x1xf32>
    tpu.vector_store %arg6[%c0_32, %c6], %30 {strides = array<i32>} : memref<15x7xf32, #tpu.memory_space<vmem>>, vector<15x1xf32>,
    %cst_33 = arith.constant 0xFF800000 : f32
    %32 = vector.broadcast %cst_33 : f32 to vector<8x9xf32>
    %c0_34 = arith.constant 0 : index
    %c0_35 = arith.constant 0 : index
    %33 = vector.load %arg7[%c0_34, %c0_35] : memref<40x9xf32, #tpu.memory_space<vmem>>, vector<8x9xf32>
    tpu.vector_store %arg7[%c0_34, %c0_35], %32 {strides = array<i32>} : memref<40x9xf32, #tpu.memory_space<vmem>>, vector<8x9xf32>,
    %cst_36 = arith.constant 0xFF800000 : f32
    %34 = vector.broadcast %cst_36 : f32 to vector<8x9xf32>
    %c32 = arith.constant 32 : index
    %c0_37 = arith.constant 0 : index
    %35 = vector.load %arg7[%c32, %c0_37] : memref<40x9xf32, #tpu.memory_space<vmem>>, vector<8x9xf32>
    tpu.vector_store %arg7[%c32, %c0_37], %34 {strides = array<i32>} : memref<40x9xf32, #tpu.memory_space<vmem>>, vector<8x9xf32>,
    %cst_38 = arith.constant 0xFF800000 : f32
    %36 = vector.broadcast %cst_38 : f32 to vector<2x9xf32>
    %c8 = arith.constant 8 : index
    %c0_39 = arith.constant 0 : index
    %37 = vector.load %arg7[%c8, %c0_39] : memref<40x9xf32, #tpu.memory_space<vmem>>, vector<2x9xf32>
    tpu.vector_store %arg7[%c8, %c0_39], %36 {strides = array<i32>} : memref<40x9xf32, #tpu.memory_space<vmem>>, vector<2x9xf32>,
    %cst_40 = arith.constant 0xFF800000 : f32
    %38 = vector.broadcast %cst_40 : f32 to vector<2x9xf32>
    %c14 = arith.constant 14 : index
    %c0_41 = arith.constant 0 : index
    %39 = vector.load %arg7[%c14, %c0_41] : memref<40x9xf32, #tpu.memory_space<vmem>>, vector<2x9xf32>
    tpu.vector_store %arg7[%c14, %c0_41], %38 {strides = array<i32>} : memref<40x9xf32, #tpu.memory_space<vmem>>, vector<2x9xf32>,
    %cst_42 = arith.constant 0xFF800000 : f32
    %40 = vector.broadcast %cst_42 : f32 to vector<2x9xf32>
    %c16 = arith.constant 16 : index
    %c0_43 = arith.constant 0 : index
    %41 = vector.load %arg7[%c16, %c0_43] : memref<40x9xf32, #tpu.memory_space<vmem>>, vector<2x9xf32>
    tpu.vector_store %arg7[%c16, %c0_43], %40 {strides = array<i32>} : memref<40x9xf32, #tpu.memory_space<vmem>>, vector<2x9xf32>,
    %cst_44 = arith.constant 0xFF800000 : f32
    %42 = vector.broadcast %cst_44 : f32 to vector<2x9xf32>
    %c22 = arith.constant 22 : index
    %c0_45 = arith.constant 0 : index
    %43 = vector.load %arg7[%c22, %c0_45] : memref<40x9xf32, #tpu.memory_space<vmem>>, vector<2x9xf32>
    tpu.vector_store %arg7[%c22, %c0_45], %42 {strides = array<i32>} : memref<40x9xf32, #tpu.memory_space<vmem>>, vector<2x9xf32>,
    %cst_46 = arith.constant 0xFF800000 : f32
    %44 = vector.broadcast %cst_46 : f32 to vector<2x9xf32>
    %c24_47 = arith.constant 24 : index
    %c0_48 = arith.constant 0 : index
    %45 = vector.load %arg7[%c24_47, %c0_48] : memref<40x9xf32, #tpu.memory_space<vmem>>, vector<2x9xf32>
    tpu.vector_store %arg7[%c24_47, %c0_48], %44 {strides = array<i32>} : memref<40x9xf32, #tpu.memory_space<vmem>>, vector<2x9xf32>,
    %cst_49 = arith.constant 0xFF800000 : f32
    %46 = vector.broadcast %cst_49 : f32 to vector<2x9xf32>
    %c30 = arith.constant 30 : index
    %c0_50 = arith.constant 0 : index
    %47 = vector.load %arg7[%c30, %c0_50] : memref<40x9xf32, #tpu.memory_space<vmem>>, vector<2x9xf32>
    tpu.vector_store %arg7[%c30, %c0_50], %46 {strides = array<i32>} : memref<40x9xf32, #tpu.memory_space<vmem>>, vector<2x9xf32>,
    %cst_51 = arith.constant 0xFF800000 : f32
    %48 = vector.broadcast %cst_51 : f32 to vector<24x2xf32>
    %c8_52 = arith.constant 8 : index
    %c0_53 = arith.constant 0 : index
    %49 = vector.load %arg7[%c8_52, %c0_53] : memref<40x9xf32, #tpu.memory_space<vmem>>, vector<24x2xf32>
    tpu.vector_store %arg7[%c8_52, %c0_53], %48 {strides = array<i32>} : memref<40x9xf32, #tpu.memory_space<vmem>>, vector<24x2xf32>,
    %cst_54 = arith.constant 0xFF800000 : f32
    %50 = vector.broadcast %cst_54 : f32 to vector<24x2xf32>
    %c8_55 = arith.constant 8 : index
    %c7 = arith.constant 7 : index
    %51 = vector.load %arg7[%c8_55, %c7] : memref<40x9xf32, #tpu.memory_space<vmem>>, vector<24x2xf32>
    tpu.vector_store %arg7[%c8_55, %c7], %50 {strides = array<i32>} : memref<40x9xf32, #tpu.memory_space<vmem>>, vector<24x2xf32>,
    %cst_56 = arith.constant 0xFF800000 : f32
    %52 = vector.broadcast %cst_56 : f32 to vector<5x5xf32>
    %c0_57 = arith.constant 0 : index
    %c0_58 = arith.constant 0 : index
    %53 = vector.load %arg8[%c0_57, %c0_58] : memref<25x5xf32, #tpu.memory_space<vmem>>, vector<5x5xf32>
    tpu.vector_store %arg8[%c0_57, %c0_58], %52 {strides = array<i32>} : memref<25x5xf32, #tpu.memory_space<vmem>>, vector<5x5xf32>,
    %cst_59 = arith.constant 0xFF800000 : f32
    %54 = vector.broadcast %cst_59 : f32 to vector<5x5xf32>
    %c20 = arith.constant 20 : index
    %c0_60 = arith.constant 0 : index
    %55 = vector.load %arg8[%c20, %c0_60] : memref<25x5xf32, #tpu.memory_space<vmem>>, vector<5x5xf32>
    tpu.vector_store %arg8[%c20, %c0_60], %54 {strides = array<i32>} : memref<25x5xf32, #tpu.memory_space<vmem>>, vector<5x5xf32>,
    %cst_61 = arith.constant 0xFF800000 : f32
    %56 = vector.broadcast %cst_61 : f32 to vector<1x5xf32>
    %c5 = arith.constant 5 : index
    %c0_62 = arith.constant 0 : index
    %57 = vector.load %arg8[%c5, %c0_62] : memref<25x5xf32, #tpu.memory_space<vmem>>, vector<1x5xf32>
    tpu.vector_store %arg8[%c5, %c0_62], %56 {strides = array<i32>} : memref<25x5xf32, #tpu.memory_space<vmem>>, vector<1x5xf32>,
    %cst_63 = arith.constant 0xFF800000 : f32
    %58 = vector.broadcast %cst_63 : f32 to vector<1x5xf32>
    %c9 = arith.constant 9 : index
    %c0_64 = arith.constant 0 : index
    %59 = vector.load %arg8[%c9, %c0_64] : memref<25x5xf32, #tpu.memory_space<vmem>>, vector<1x5xf32>
    tpu.vector_store %arg8[%c9, %c0_64], %58 {strides = array<i32>} : memref<25x5xf32, #tpu.memory_space<vmem>>, vector<1x5xf32>,
    %cst_65 = arith.constant 0xFF800000 : f32
    %60 = vector.broadcast %cst_65 : f32 to vector<1x5xf32>
    %c10_66 = arith.constant 10 : index
    %c0_67 = arith.constant 0 : index
    %61 = vector.load %arg8[%c10_66, %c0_67] : memref<25x5xf32, #tpu.memory_space<vmem>>, vector<1x5xf32>
    tpu.vector_store %arg8[%c10_66, %c0_67], %60 {strides = array<i32>} : memref<25x5xf32, #tpu.memory_space<vmem>>, vector<1x5xf32>,
    %cst_68 = arith.constant 0xFF800000 : f32
    %62 = vector.broadcast %cst_68 : f32 to vector<1x5xf32>
    %c14_69 = arith.constant 14 : index
    %c0_70 = arith.constant 0 : index
    %63 = vector.load %arg8[%c14_69, %c0_70] : memref<25x5xf32, #tpu.memory_space<vmem>>, vector<1x5xf32>
    tpu.vector_store %arg8[%c14_69, %c0_70], %62 {strides = array<i32>} : memref<25x5xf32, #tpu.memory_space<vmem>>, vector<1x5xf32>,
    %cst_71 = arith.constant 0xFF800000 : f32
    %64 = vector.broadcast %cst_71 : f32 to vector<1x5xf32>
    %c15 = arith.constant 15 : index
    %c0_72 = arith.constant 0 : index
    %65 = vector.load %arg8[%c15, %c0_72] : memref<25x5xf32, #tpu.memory_space<vmem>>, vector<1x5xf32>
    tpu.vector_store %arg8[%c15, %c0_72], %64 {strides = array<i32>} : memref<25x5xf32, #tpu.memory_space<vmem>>, vector<1x5xf32>,
    %cst_73 = arith.constant 0xFF800000 : f32
    %66 = vector.broadcast %cst_73 : f32 to vector<1x5xf32>
    %c19 = arith.constant 19 : index
    %c0_74 = arith.constant 0 : index
    %67 = vector.load %arg8[%c19, %c0_74] : memref<25x5xf32, #tpu.memory_space<vmem>>, vector<1x5xf32>
    tpu.vector_store %arg8[%c19, %c0_74], %66 {strides = array<i32>} : memref<25x5xf32, #tpu.memory_space<vmem>>, vector<1x5xf32>,
    %cst_75 = arith.constant 0xFF800000 : f32
    %68 = vector.broadcast %cst_75 : f32 to vector<15x1xf32>
    %c5_76 = arith.constant 5 : index
    %c0_77 = arith.constant 0 : index
    %69 = vector.load %arg8[%c5_76, %c0_77] : memref<25x5xf32, #tpu.memory_space<vmem>>, vector<15x1xf32>
    tpu.vector_store %arg8[%c5_76, %c0_77], %68 {strides = array<i32>} : memref<25x5xf32, #tpu.memory_space<vmem>>, vector<15x1xf32>,
    %cst_78 = arith.constant 0xFF800000 : f32
    %70 = vector.broadcast %cst_78 : f32 to vector<15x1xf32>
    %c5_79 = arith.constant 5 : index
    %c4 = arith.constant 4 : index
    %71 = vector.load %arg8[%c5_79, %c4] : memref<25x5xf32, #tpu.memory_space<vmem>>, vector<15x1xf32>
    tpu.vector_store %arg8[%c5_79, %c4], %70 {strides = array<i32>} : memref<25x5xf32, #tpu.memory_space<vmem>>, vector<15x1xf32>,
    %c0_80 = arith.constant 0 : index
    %c0_81 = arith.constant 0 : index
    %c0_82 = arith.constant 0 : index
    %72 = tpu.strided_load %arg1[%c0_80, %c0_81, %c0_82] {strides = array<i32: 1, 3, 1>} : memref<1x360x24xf32, #tpu.memory_space<vmem>>, vector<1x8x24xf32>
    %73 = vector.shape_cast %72 : vector<1x8x24xf32> to vector<8x24xf32>
    %c0_83 = arith.constant 0 : index
    %c1 = arith.constant 1 : index
    %c0_84 = arith.constant 0 : index
    %74 = tpu.strided_load %arg1[%c0_83, %c1, %c0_84] {strides = array<i32: 1, 3, 1>} : memref<1x360x24xf32, #tpu.memory_space<vmem>>, vector<1x8x24xf32>
    %75 = vector.shape_cast %74 : vector<1x8x24xf32> to vector<8x24xf32>
    %76 = arith.maximumf %73, %75 : vector<8x24xf32>
    %c0_85 = arith.constant 0 : index
    %c2 = arith.constant 2 : index
    %c0_86 = arith.constant 0 : index
    %77 = tpu.strided_load %arg1[%c0_85, %c2, %c0_86] {strides = array<i32: 1, 3, 1>} : memref<1x360x24xf32, #tpu.memory_space<vmem>>, vector<1x8x24xf32>
    %78 = vector.shape_cast %77 : vector<1x8x24xf32> to vector<8x24xf32>
    %79 = arith.maximumf %76, %78 : vector<8x24xf32>
    %c0_87 = arith.constant 0 : index
    %c24_88 = arith.constant 24 : index
    %c0_89 = arith.constant 0 : index
    %80 = tpu.strided_load %arg1[%c0_87, %c24_88, %c0_89] {strides = array<i32: 1, 3, 1>} : memref<1x360x24xf32, #tpu.memory_space<vmem>>, vector<1x8x24xf32>
    %81 = vector.shape_cast %80 : vector<1x8x24xf32> to vector<8x24xf32>
    %82 = arith.maximumf %79, %81 : vector<8x24xf32>
    %c0_90 = arith.constant 0 : index
    %c25 = arith.constant 25 : index
    %c0_91 = arith.constant 0 : index
    %83 = tpu.strided_load %arg1[%c0_90, %c25, %c0_91] {strides = array<i32: 1, 3, 1>} : memref<1x360x24xf32, #tpu.memory_space<vmem>>, vector<1x8x24xf32>
    %84 = vector.shape_cast %83 : vector<1x8x24xf32> to vector<8x24xf32>
    %85 = arith.maximumf %82, %84 : vector<8x24xf32>
    %c0_92 = arith.constant 0 : index
    %c26 = arith.constant 26 : index
    %c0_93 = arith.constant 0 : index
    %86 = tpu.strided_load %arg1[%c0_92, %c26, %c0_93] {strides = array<i32: 1, 3, 1>} : memref<1x360x24xf32, #tpu.memory_space<vmem>>, vector<1x8x24xf32>
    %87 = vector.shape_cast %86 : vector<1x8x24xf32> to vector<8x24xf32>
    %88 = arith.maximumf %85, %87 : vector<8x24xf32>
    %c0_94 = arith.constant 0 : index
    %c48_95 = arith.constant 48 : index
    %c0_96 = arith.constant 0 : index
    %89 = tpu.strided_load %arg1[%c0_94, %c48_95, %c0_96] {strides = array<i32: 1, 3, 1>} : memref<1x360x24xf32, #tpu.memory_space<vmem>>, vector<1x8x24xf32>
    %90 = vector.shape_cast %89 : vector<1x8x24xf32> to vector<8x24xf32>
    %91 = arith.maximumf %88, %90 : vector<8x24xf32>
    %c0_97 = arith.constant 0 : index
    %c49 = arith.constant 49 : index
    %c0_98 = arith.constant 0 : index
    %92 = tpu.strided_load %arg1[%c0_97, %c49, %c0_98] {strides = array<i32: 1, 3, 1>} : memref<1x360x24xf32, #tpu.memory_space<vmem>>, vector<1x8x24xf32>
    %93 = vector.shape_cast %92 : vector<1x8x24xf32> to vector<8x24xf32>
    %94 = arith.maximumf %91, %93 : vector<8x24xf32>
    %c0_99 = arith.constant 0 : index
    %c50 = arith.constant 50 : index
    %c0_100 = arith.constant 0 : index
    %95 = tpu.strided_load %arg1[%c0_99, %c50, %c0_100] {strides = array<i32: 1, 3, 1>} : memref<1x360x24xf32, #tpu.memory_space<vmem>>, vector<1x8x24xf32>
    %96 = vector.shape_cast %95 : vector<1x8x24xf32> to vector<8x24xf32>
    %97 = arith.maximumf %94, %96 : vector<8x24xf32>
    %98 = vector.extract_strided_slice %97 {offsets = [0, 0], sizes = [8, 22], strides = [1, 1]} : vector<8x24xf32> to vector<8x22xf32>
    %99 = vector.extract_strided_slice %97 {offsets = [0, 1], sizes = [8, 22], strides = [1, 1]} : vector<8x24xf32> to vector<8x22xf32>
    %100 = arith.maximumf %98, %99 : vector<8x22xf32>
    %101 = vector.extract_strided_slice %97 {offsets = [0, 2], sizes = [8, 22], strides = [1, 1]} : vector<8x24xf32> to vector<8x22xf32>
    %102 = arith.maximumf %100, %101 : vector<8x22xf32>
    %c0_101 = arith.constant 0 : index
    %c0_102 = arith.constant 0 : index
    %103 = vector.load %arg3[%c0_101, %c0_102] : memref<40x22xf32, #tpu.memory_space<vmem>>, vector<8x22xf32>
    tpu.vector_store %arg3[%c0_101, %c0_102], %102 {strides = array<i32>} : memref<40x22xf32, #tpu.memory_space<vmem>>, vector<8x22xf32>,
    %c0_103 = arith.constant 0 : index
    %c72_104 = arith.constant 72 : index
    %c0_105 = arith.constant 0 : index
    %104 = tpu.strided_load %arg1[%c0_103, %c72_104, %c0_105] {strides = array<i32: 1, 3, 1>} : memref<1x360x24xf32, #tpu.memory_space<vmem>>, vector<1x8x24xf32>
    %105 = vector.shape_cast %104 : vector<1x8x24xf32> to vector<8x24xf32>
    %c0_106 = arith.constant 0 : index
    %c73 = arith.constant 73 : index
    %c0_107 = arith.constant 0 : index
    %106 = tpu.strided_load %arg1[%c0_106, %c73, %c0_107] {strides = array<i32: 1, 3, 1>} : memref<1x360x24xf32, #tpu.memory_space<vmem>>, vector<1x8x24xf32>
    %107 = vector.shape_cast %106 : vector<1x8x24xf32> to vector<8x24xf32>
    %108 = arith.maximumf %105, %107 : vector<8x24xf32>
    %c0_108 = arith.constant 0 : index
    %c74 = arith.constant 74 : index
    %c0_109 = arith.constant 0 : index
    %109 = tpu.strided_load %arg1[%c0_108, %c74, %c0_109] {strides = array<i32: 1, 3, 1>} : memref<1x360x24xf32, #tpu.memory_space<vmem>>, vector<1x8x24xf32>
    %110 = vector.shape_cast %109 : vector<1x8x24xf32> to vector<8x24xf32>
    %111 = arith.maximumf %108, %110 : vector<8x24xf32>
    %c0_110 = arith.constant 0 : index
    %c96 = arith.constant 96 : index
    %c0_111 = arith.constant 0 : index
    %112 = tpu.strided_load %arg1[%c0_110, %c96, %c0_111] {strides = array<i32: 1, 3, 1>} : memref<1x360x24xf32, #tpu.memory_space<vmem>>, vector<1x8x24xf32>
    %113 = vector.shape_cast %112 : vector<1x8x24xf32> to vector<8x24xf32>
    %114 = arith.maximumf %111, %113 : vector<8x24xf32>
    %c0_112 = arith.constant 0 : index
    %c97 = arith.constant 97 : index
    %c0_113 = arith.constant 0 : index
    %115 = tpu.strided_load %arg1[%c0_112, %c97, %c0_113] {strides = array<i32: 1, 3, 1>} : memref<1x360x24xf32, #tpu.memory_space<vmem>>, vector<1x8x24xf32>
    %116 = vector.shape_cast %115 : vector<1x8x24xf32> to vector<8x24xf32>
    %117 = arith.maximumf %114, %116 : vector<8x24xf32>
    %c0_114 = arith.constant 0 : index
    %c98 = arith.constant 98 : index
    %c0_115 = arith.constant 0 : index
    %118 = tpu.strided_load %arg1[%c0_114, %c98, %c0_115] {strides = array<i32: 1, 3, 1>} : memref<1x360x24xf32, #tpu.memory_space<vmem>>, vector<1x8x24xf32>
    %119 = vector.shape_cast %118 : vector<1x8x24xf32> to vector<8x24xf32>
    %120 = arith.maximumf %117, %119 : vector<8x24xf32>
    %c0_116 = arith.constant 0 : index
    %c120 = arith.constant 120 : index
    %c0_117 = arith.constant 0 : index
    %121 = tpu.strided_load %arg1[%c0_116, %c120, %c0_117] {strides = array<i32: 1, 3, 1>} : memref<1x360x24xf32, #tpu.memory_space<vmem>>, vector<1x8x24xf32>
    %122 = vector.shape_cast %121 : vector<1x8x24xf32> to vector<8x24xf32>
    %123 = arith.maximumf %120, %122 : vector<8x24xf32>
    %c0_118 = arith.constant 0 : index
    %c121 = arith.constant 121 : index
    %c0_119 = arith.constant 0 : index
    %124 = tpu.strided_load %arg1[%c0_118, %c121, %c0_119] {strides = array<i32: 1, 3, 1>} : memref<1x360x24xf32, #tpu.memory_space<vmem>>, vector<1x8x24xf32>
    %125 = vector.shape_cast %124 : vector<1x8x24xf32> to vector<8x24xf32>
    %126 = arith.maximumf %123, %125 : vector<8x24xf32>
    %c0_120 = arith.constant 0 : index
    %c122 = arith.constant 122 : index
    %c0_121 = arith.constant 0 : index
    %127 = tpu.strided_load %arg1[%c0_120, %c122, %c0_121] {strides = array<i32: 1, 3, 1>} : memref<1x360x24xf32, #tpu.memory_space<vmem>>, vector<1x8x24xf32>
    %128 = vector.shape_cast %127 : vector<1x8x24xf32> to vector<8x24xf32>
    %129 = arith.maximumf %126, %128 : vector<8x24xf32>
    %130 = vector.extract_strided_slice %129 {offsets = [0, 0], sizes = [8, 22], strides = [1, 1]} : vector<8x24xf32> to vector<8x22xf32>
    %131 = vector.extract_strided_slice %129 {offsets = [0, 1], sizes = [8, 22], strides = [1, 1]} : vector<8x24xf32> to vector<8x22xf32>
    %132 = arith.maximumf %130, %131 : vector<8x22xf32>
    %133 = vector.extract_strided_slice %129 {offsets = [0, 2], sizes = [8, 22], strides = [1, 1]} : vector<8x24xf32> to vector<8x22xf32>
    %134 = arith.maximumf %132, %133 : vector<8x22xf32>
    %c8_122 = arith.constant 8 : index
    %c0_123 = arith.constant 0 : index
    %135 = vector.load %arg3[%c8_122, %c0_123] : memref<40x22xf32, #tpu.memory_space<vmem>>, vector<8x22xf32>
    tpu.vector_store %arg3[%c8_122, %c0_123], %134 {strides = array<i32>} : memref<40x22xf32, #tpu.memory_space<vmem>>, vector<8x22xf32>,
    %c0_124 = arith.constant 0 : index
    %c144 = arith.constant 144 : index
    %c0_125 = arith.constant 0 : index
    %136 = tpu.strided_load %arg1[%c0_124, %c144, %c0_125] {strides = array<i32: 1, 3, 1>} : memref<1x360x24xf32, #tpu.memory_space<vmem>>, vector<1x8x24xf32>
    %137 = vector.shape_cast %136 : vector<1x8x24xf32> to vector<8x24xf32>
    %c0_126 = arith.constant 0 : index
    %c145 = arith.constant 145 : index
    %c0_127 = arith.constant 0 : index
    %138 = tpu.strided_load %arg1[%c0_126, %c145, %c0_127] {strides = array<i32: 1, 3, 1>} : memref<1x360x24xf32, #tpu.memory_space<vmem>>, vector<1x8x24xf32>
    %139 = vector.shape_cast %138 : vector<1x8x24xf32> to vector<8x24xf32>
    %140 = arith.maximumf %137, %139 : vector<8x24xf32>
    %c0_128 = arith.constant 0 : index
    %c146 = arith.constant 146 : index
    %c0_129 = arith.constant 0 : index
    %141 = tpu.strided_load %arg1[%c0_128, %c146, %c0_129] {strides = array<i32: 1, 3, 1>} : memref<1x360x24xf32, #tpu.memory_space<vmem>>, vector<1x8x24xf32>
    %142 = vector.shape_cast %141 : vector<1x8x24xf32> to vector<8x24xf32>
    %143 = arith.maximumf %140, %142 : vector<8x24xf32>
    %c0_130 = arith.constant 0 : index
    %c168 = arith.constant 168 : index
    %c0_131 = arith.constant 0 : index
    %144 = tpu.strided_load %arg1[%c0_130, %c168, %c0_131] {strides = array<i32: 1, 3, 1>} : memref<1x360x24xf32, #tpu.memory_space<vmem>>, vector<1x8x24xf32>
    %145 = vector.shape_cast %144 : vector<1x8x24xf32> to vector<8x24xf32>
    %146 = arith.maximumf %143, %145 : vector<8x24xf32>
    %c0_132 = arith.constant 0 : index
    %c169 = arith.constant 169 : index
    %c0_133 = arith.constant 0 : index
    %147 = tpu.strided_load %arg1[%c0_132, %c169, %c0_133] {strides = array<i32: 1, 3, 1>} : memref<1x360x24xf32, #tpu.memory_space<vmem>>, vector<1x8x24xf32>
    %148 = vector.shape_cast %147 : vector<1x8x24xf32> to vector<8x24xf32>
    %149 = arith.maximumf %146, %148 : vector<8x24xf32>
    %c0_134 = arith.constant 0 : index
    %c170 = arith.constant 170 : index
    %c0_135 = arith.constant 0 : index
    %150 = tpu.strided_load %arg1[%c0_134, %c170, %c0_135] {strides = array<i32: 1, 3, 1>} : memref<1x360x24xf32, #tpu.memory_space<vmem>>, vector<1x8x24xf32>
    %151 = vector.shape_cast %150 : vector<1x8x24xf32> to vector<8x24xf32>
    %152 = arith.maximumf %149, %151 : vector<8x24xf32>
    %c0_136 = arith.constant 0 : index
    %c192 = arith.constant 192 : index
    %c0_137 = arith.constant 0 : index
    %153 = tpu.strided_load %arg1[%c0_136, %c192, %c0_137] {strides = array<i32: 1, 3, 1>} : memref<1x360x24xf32, #tpu.memory_space<vmem>>, vector<1x8x24xf32>
    %154 = vector.shape_cast %153 : vector<1x8x24xf32> to vector<8x24xf32>
    %155 = arith.maximumf %152, %154 : vector<8x24xf32>
    %c0_138 = arith.constant 0 : index
    %c193 = arith.constant 193 : index
    %c0_139 = arith.constant 0 : index
    %156 = tpu.strided_load %arg1[%c0_138, %c193, %c0_139] {strides = array<i32: 1, 3, 1>} : memref<1x360x24xf32, #tpu.memory_space<vmem>>, vector<1x8x24xf32>
    %157 = vector.shape_cast %156 : vector<1x8x24xf32> to vector<8x24xf32>
    %158 = arith.maximumf %155, %157 : vector<8x24xf32>
    %c0_140 = arith.constant 0 : index
    %c194 = arith.constant 194 : index
    %c0_141 = arith.constant 0 : index
    %159 = tpu.strided_load %arg1[%c0_140, %c194, %c0_141] {strides = array<i32: 1, 3, 1>} : memref<1x360x24xf32, #tpu.memory_space<vmem>>, vector<1x8x24xf32>
    %160 = vector.shape_cast %159 : vector<1x8x24xf32> to vector<8x24xf32>
    %161 = arith.maximumf %158, %160 : vector<8x24xf32>
    %162 = vector.extract_strided_slice %161 {offsets = [0, 0], sizes = [8, 22], strides = [1, 1]} : vector<8x24xf32> to vector<8x22xf32>
    %163 = vector.extract_strided_slice %161 {offsets = [0, 1], sizes = [8, 22], strides = [1, 1]} : vector<8x24xf32> to vector<8x22xf32>
    %164 = arith.maximumf %162, %163 : vector<8x22xf32>
    %165 = vector.extract_strided_slice %161 {offsets = [0, 2], sizes = [8, 22], strides = [1, 1]} : vector<8x24xf32> to vector<8x22xf32>
    %166 = arith.maximumf %164, %165 : vector<8x22xf32>
    %c16_142 = arith.constant 16 : index
    %c0_143 = arith.constant 0 : index
    %167 = vector.load %arg3[%c16_142, %c0_143] : memref<40x22xf32, #tpu.memory_space<vmem>>, vector<8x22xf32>
    tpu.vector_store %arg3[%c16_142, %c0_143], %166 {strides = array<i32>} : memref<40x22xf32, #tpu.memory_space<vmem>>, vector<8x22xf32>,
    %c0_144 = arith.constant 0 : index
    %c216 = arith.constant 216 : index
    %c0_145 = arith.constant 0 : index
    %168 = tpu.strided_load %arg1[%c0_144, %c216, %c0_145] {strides = array<i32: 1, 3, 1>} : memref<1x360x24xf32, #tpu.memory_space<vmem>>, vector<1x8x24xf32>
    %169 = vector.shape_cast %168 : vector<1x8x24xf32> to vector<8x24xf32>
    %c0_146 = arith.constant 0 : index
    %c217 = arith.constant 217 : index
    %c0_147 = arith.constant 0 : index
    %170 = tpu.strided_load %arg1[%c0_146, %c217, %c0_147] {strides = array<i32: 1, 3, 1>} : memref<1x360x24xf32, #tpu.memory_space<vmem>>, vector<1x8x24xf32>
    %171 = vector.shape_cast %170 : vector<1x8x24xf32> to vector<8x24xf32>
    %172 = arith.maximumf %169, %171 : vector<8x24xf32>
    %c0_148 = arith.constant 0 : index
    %c218 = arith.constant 218 : index
    %c0_149 = arith.constant 0 : index
    %173 = tpu.strided_load %arg1[%c0_148, %c218, %c0_149] {strides = array<i32: 1, 3, 1>} : memref<1x360x24xf32, #tpu.memory_space<vmem>>, vector<1x8x24xf32>
    %174 = vector.shape_cast %173 : vector<1x8x24xf32> to vector<8x24xf32>
    %175 = arith.maximumf %172, %174 : vector<8x24xf32>
    %c0_150 = arith.constant 0 : index
    %c240 = arith.constant 240 : index
    %c0_151 = arith.constant 0 : index
    %176 = tpu.strided_load %arg1[%c0_150, %c240, %c0_151] {strides = array<i32: 1, 3, 1>} : memref<1x360x24xf32, #tpu.memory_space<vmem>>, vector<1x8x24xf32>
    %177 = vector.shape_cast %176 : vector<1x8x24xf32> to vector<8x24xf32>
    %178 = arith.maximumf %175, %177 : vector<8x24xf32>
    %c0_152 = arith.constant 0 : index
    %c241 = arith.constant 241 : index
    %c0_153 = arith.constant 0 : index
    %179 = tpu.strided_load %arg1[%c0_152, %c241, %c0_153] {strides = array<i32: 1, 3, 1>} : memref<1x360x24xf32, #tpu.memory_space<vmem>>, vector<1x8x24xf32>
    %180 = vector.shape_cast %179 : vector<1x8x24xf32> to vector<8x24xf32>
    %181 = arith.maximumf %178, %180 : vector<8x24xf32>
    %c0_154 = arith.constant 0 : index
    %c242 = arith.constant 242 : index
    %c0_155 = arith.constant 0 : index
    %182 = tpu.strided_load %arg1[%c0_154, %c242, %c0_155] {strides = array<i32: 1, 3, 1>} : memref<1x360x24xf32, #tpu.memory_space<vmem>>, vector<1x8x24xf32>
    %183 = vector.shape_cast %182 : vector<1x8x24xf32> to vector<8x24xf32>
    %184 = arith.maximumf %181, %183 : vector<8x24xf32>
    %c0_156 = arith.constant 0 : index
    %c264 = arith.constant 264 : index
    %c0_157 = arith.constant 0 : index
    %185 = tpu.strided_load %arg1[%c0_156, %c264, %c0_157] {strides = array<i32: 1, 3, 1>} : memref<1x360x24xf32, #tpu.memory_space<vmem>>, vector<1x8x24xf32>
    %186 = vector.shape_cast %185 : vector<1x8x24xf32> to vector<8x24xf32>
    %187 = arith.maximumf %184, %186 : vector<8x24xf32>
    %c0_158 = arith.constant 0 : index
    %c265 = arith.constant 265 : index
    %c0_159 = arith.constant 0 : index
    %188 = tpu.strided_load %arg1[%c0_158, %c265, %c0_159] {strides = array<i32: 1, 3, 1>} : memref<1x360x24xf32, #tpu.memory_space<vmem>>, vector<1x8x24xf32>
    %189 = vector.shape_cast %188 : vector<1x8x24xf32> to vector<8x24xf32>
    %190 = arith.maximumf %187, %189 : vector<8x24xf32>
    %c0_160 = arith.constant 0 : index
    %c266 = arith.constant 266 : index
    %c0_161 = arith.constant 0 : index
    %191 = tpu.strided_load %arg1[%c0_160, %c266, %c0_161] {strides = array<i32: 1, 3, 1>} : memref<1x360x24xf32, #tpu.memory_space<vmem>>, vector<1x8x24xf32>
    %192 = vector.shape_cast %191 : vector<1x8x24xf32> to vector<8x24xf32>
    %193 = arith.maximumf %190, %192 : vector<8x24xf32>
    %194 = vector.extract_strided_slice %193 {offsets = [0, 0], sizes = [8, 22], strides = [1, 1]} : vector<8x24xf32> to vector<8x22xf32>
    %195 = vector.extract_strided_slice %193 {offsets = [0, 1], sizes = [8, 22], strides = [1, 1]} : vector<8x24xf32> to vector<8x22xf32>
    %196 = arith.maximumf %194, %195 : vector<8x22xf32>
    %197 = vector.extract_strided_slice %193 {offsets = [0, 2], sizes = [8, 22], strides = [1, 1]} : vector<8x24xf32> to vector<8x22xf32>
    %198 = arith.maximumf %196, %197 : vector<8x22xf32>
    %c24_162 = arith.constant 24 : index
    %c0_163 = arith.constant 0 : index
    %199 = vector.load %arg3[%c24_162, %c0_163] : memref<40x22xf32, #tpu.memory_space<vmem>>, vector<8x22xf32>
    tpu.vector_store %arg3[%c24_162, %c0_163], %198 {strides = array<i32>} : memref<40x22xf32, #tpu.memory_space<vmem>>, vector<8x22xf32>,
    %c0_164 = arith.constant 0 : index
    %c288 = arith.constant 288 : index
    %c0_165 = arith.constant 0 : index
    %200 = tpu.strided_load %arg1[%c0_164, %c288, %c0_165] {strides = array<i32: 1, 3, 1>} : memref<1x360x24xf32, #tpu.memory_space<vmem>>, vector<1x8x24xf32>
    %201 = vector.shape_cast %200 : vector<1x8x24xf32> to vector<8x24xf32>
    %c0_166 = arith.constant 0 : index
    %c289 = arith.constant 289 : index
    %c0_167 = arith.constant 0 : index
    %202 = tpu.strided_load %arg1[%c0_166, %c289, %c0_167] {strides = array<i32: 1, 3, 1>} : memref<1x360x24xf32, #tpu.memory_space<vmem>>, vector<1x8x24xf32>
    %203 = vector.shape_cast %202 : vector<1x8x24xf32> to vector<8x24xf32>
    %204 = arith.maximumf %201, %203 : vector<8x24xf32>
    %c0_168 = arith.constant 0 : index
    %c290 = arith.constant 290 : index
    %c0_169 = arith.constant 0 : index
    %205 = tpu.strided_load %arg1[%c0_168, %c290, %c0_169] {strides = array<i32: 1, 3, 1>} : memref<1x360x24xf32, #tpu.memory_space<vmem>>, vector<1x8x24xf32>
    %206 = vector.shape_cast %205 : vector<1x8x24xf32> to vector<8x24xf32>
    %207 = arith.maximumf %204, %206 : vector<8x24xf32>
    %c0_170 = arith.constant 0 : index
    %c312 = arith.constant 312 : index
    %c0_171 = arith.constant 0 : index
    %208 = tpu.strided_load %arg1[%c0_170, %c312, %c0_171] {strides = array<i32: 1, 3, 1>} : memref<1x360x24xf32, #tpu.memory_space<vmem>>, vector<1x8x24xf32>
    %209 = vector.shape_cast %208 : vector<1x8x24xf32> to vector<8x24xf32>
    %210 = arith.maximumf %207, %209 : vector<8x24xf32>
    %c0_172 = arith.constant 0 : index
    %c313 = arith.constant 313 : index
    %c0_173 = arith.constant 0 : index
    %211 = tpu.strided_load %arg1[%c0_172, %c313, %c0_173] {strides = array<i32: 1, 3, 1>} : memref<1x360x24xf32, #tpu.memory_space<vmem>>, vector<1x8x24xf32>
    %212 = vector.shape_cast %211 : vector<1x8x24xf32> to vector<8x24xf32>
    %213 = arith.maximumf %210, %212 : vector<8x24xf32>
    %c0_174 = arith.constant 0 : index
    %c314 = arith.constant 314 : index
    %c0_175 = arith.constant 0 : index
    %214 = tpu.strided_load %arg1[%c0_174, %c314, %c0_175] {strides = array<i32: 1, 3, 1>} : memref<1x360x24xf32, #tpu.memory_space<vmem>>, vector<1x8x24xf32>
    %215 = vector.shape_cast %214 : vector<1x8x24xf32> to vector<8x24xf32>
    %216 = arith.maximumf %213, %215 : vector<8x24xf32>
    %c0_176 = arith.constant 0 : index
    %c336 = arith.constant 336 : index
    %c0_177 = arith.constant 0 : index
    %217 = tpu.strided_load %arg1[%c0_176, %c336, %c0_177] {strides = array<i32: 1, 3, 1>} : memref<1x360x24xf32, #tpu.memory_space<vmem>>, vector<1x8x24xf32>
    %218 = vector.shape_cast %217 : vector<1x8x24xf32> to vector<8x24xf32>
    %219 = arith.maximumf %216, %218 : vector<8x24xf32>
    %c0_178 = arith.constant 0 : index
    %c337 = arith.constant 337 : index
    %c0_179 = arith.constant 0 : index
    %220 = tpu.strided_load %arg1[%c0_178, %c337, %c0_179] {strides = array<i32: 1, 3, 1>} : memref<1x360x24xf32, #tpu.memory_space<vmem>>, vector<1x8x24xf32>
    %221 = vector.shape_cast %220 : vector<1x8x24xf32> to vector<8x24xf32>
    %222 = arith.maximumf %219, %221 : vector<8x24xf32>
    %c0_180 = arith.constant 0 : index
    %c338 = arith.constant 338 : index
    %c0_181 = arith.constant 0 : index
    %223 = tpu.strided_load %arg1[%c0_180, %c338, %c0_181] {strides = array<i32: 1, 3, 1>} : memref<1x360x24xf32, #tpu.memory_space<vmem>>, vector<1x8x24xf32>
    %224 = vector.shape_cast %223 : vector<1x8x24xf32> to vector<8x24xf32>
    %225 = arith.maximumf %222, %224 : vector<8x24xf32>
    %226 = vector.extract_strided_slice %225 {offsets = [0, 0], sizes = [8, 22], strides = [1, 1]} : vector<8x24xf32> to vector<8x22xf32>
    %227 = vector.extract_strided_slice %225 {offsets = [0, 1], sizes = [8, 22], strides = [1, 1]} : vector<8x24xf32> to vector<8x22xf32>
    %228 = arith.maximumf %226, %227 : vector<8x22xf32>
    %229 = vector.extract_strided_slice %225 {offsets = [0, 2], sizes = [8, 22], strides = [1, 1]} : vector<8x24xf32> to vector<8x22xf32>
    %230 = arith.maximumf %228, %229 : vector<8x22xf32>
    %c32_182 = arith.constant 32 : index
    %c0_183 = arith.constant 0 : index
    %231 = vector.load %arg3[%c32_182, %c0_183] : memref<40x22xf32, #tpu.memory_space<vmem>>, vector<8x22xf32>
    tpu.vector_store %arg3[%c32_182, %c0_183], %230 {strides = array<i32>} : memref<40x22xf32, #tpu.memory_space<vmem>>, vector<8x22xf32>,
    %c0_184 = arith.constant 0 : index
    %c0_185 = arith.constant 0 : index
    %232 = vector.load %arg3[%c0_184, %c0_185] : memref<40x22xf32, #tpu.memory_space<vmem>>, vector<40x22xf32>
    %233 = tpu.transpose %232, [1, 0] : vector<40x22xf32> -> vector<22x40xf32>
    %c0_186 = arith.constant 0 : index
    %c0_187 = arith.constant 0 : index
    %234 = vector.load %arg4[%c0_186, %c0_187] : memref<22x40xf32, #tpu.memory_space<vmem>>, vector<22x40xf32>
    tpu.vector_store %arg4[%c0_186, %c0_187], %233 {strides = array<i32>} : memref<22x40xf32, #tpu.memory_space<vmem>>, vector<22x40xf32>,
    %c0_188 = arith.constant 0 : index
    %c0_189 = arith.constant 0 : index
    %235 = tpu.strided_load %arg4[%c0_188, %c0_189] {strides = array<i32: 3, 1>} : memref<22x40xf32, #tpu.memory_space<vmem>>, vector<8x40xf32>
    %236 = tpu.transpose %235, [1, 0] : vector<8x40xf32> -> vector<40x8xf32>
    %237 = vector.extract_strided_slice %236 {offsets = [0, 0], sizes = [8, 8], strides = [1, 1]} : vector<40x8xf32> to vector<8x8xf32>
    %c26_190 = arith.constant 26 : index
    %c2_191 = arith.constant 2 : index
    %238 = vector.load %arg5[%c26_190, %c2_191] : memref<96x12xf32, #tpu.memory_space<vmem>>, vector<8x8xf32>
    tpu.vector_store %arg5[%c26_190, %c2_191], %237 {strides = array<i32>} : memref<96x12xf32, #tpu.memory_space<vmem>>, vector<8x8xf32>,
    %239 = vector.extract_strided_slice %236 {offsets = [8, 0], sizes = [8, 8], strides = [1, 1]} : vector<40x8xf32> to vector<8x8xf32>
    %c38 = arith.constant 38 : index
    %c2_192 = arith.constant 2 : index
    %240 = vector.load %arg5[%c38, %c2_192] : memref<96x12xf32, #tpu.memory_space<vmem>>, vector<8x8xf32>
    tpu.vector_store %arg5[%c38, %c2_192], %239 {strides = array<i32>} : memref<96x12xf32, #tpu.memory_space<vmem>>, vector<8x8xf32>,
    %241 = vector.extract_strided_slice %236 {offsets = [16, 0], sizes = [8, 8], strides = [1, 1]} : vector<40x8xf32> to vector<8x8xf32>
    %c50_193 = arith.constant 50 : index
    %c2_194 = arith.constant 2 : index
    %242 = vector.load %arg5[%c50_193, %c2_194] : memref<96x12xf32, #tpu.memory_space<vmem>>, vector<8x8xf32>
    tpu.vector_store %arg5[%c50_193, %c2_194], %241 {strides = array<i32>} : memref<96x12xf32, #tpu.memory_space<vmem>>, vector<8x8xf32>,
    %243 = vector.extract_strided_slice %236 {offsets = [24, 0], sizes = [8, 8], strides = [1, 1]} : vector<40x8xf32> to vector<8x8xf32>
    %c62 = arith.constant 62 : index
    %c2_195 = arith.constant 2 : index
    %244 = vector.load %arg5[%c62, %c2_195] : memref<96x12xf32, #tpu.memory_space<vmem>>, vector<8x8xf32>
    tpu.vector_store %arg5[%c62, %c2_195], %243 {strides = array<i32>} : memref<96x12xf32, #tpu.memory_space<vmem>>, vector<8x8xf32>,
    %245 = vector.extract_strided_slice %236 {offsets = [32, 0], sizes = [8, 8], strides = [1, 1]} : vector<40x8xf32> to vector<8x8xf32>
    %c74_196 = arith.constant 74 : index
    %c2_197 = arith.constant 2 : index
    %246 = vector.load %arg5[%c74_196, %c2_197] : memref<96x12xf32, #tpu.memory_space<vmem>>, vector<8x8xf32>
    tpu.vector_store %arg5[%c74_196, %c2_197], %245 {strides = array<i32>} : memref<96x12xf32, #tpu.memory_space<vmem>>, vector<8x8xf32>,
    %c0_198 = arith.constant 0 : index
    %c0_199 = arith.constant 0 : index
    %247 = tpu.strided_load %arg5[%c0_198, %c0_199] {strides = array<i32: 2, 1>} : memref<96x12xf32, #tpu.memory_space<vmem>>, vector<5x12xf32>
    %c1_200 = arith.constant 1 : index
    %c0_201 = arith.constant 0 : index
    %248 = tpu.strided_load %arg5[%c1_200, %c0_201] {strides = array<i32: 2, 1>} : memref<96x12xf32, #tpu.memory_space<vmem>>, vector<5x12xf32>
    %249 = arith.maximumf %247, %248 : vector<5x12xf32>
    %c2_202 = arith.constant 2 : index
    %c0_203 = arith.constant 0 : index
    %250 = tpu.strided_load %arg5[%c2_202, %c0_203] {strides = array<i32: 2, 1>} : memref<96x12xf32, #tpu.memory_space<vmem>>, vector<5x12xf32>
    %251 = arith.maximumf %249, %250 : vector<5x12xf32>
    %c3 = arith.constant 3 : index
    %c0_204 = arith.constant 0 : index
    %252 = tpu.strided_load %arg5[%c3, %c0_204] {strides = array<i32: 2, 1>} : memref<96x12xf32, #tpu.memory_space<vmem>>, vector<5x12xf32>
    %253 = arith.maximumf %251, %252 : vector<5x12xf32>
    %c12 = arith.constant 12 : index
    %c0_205 = arith.constant 0 : index
    %254 = tpu.strided_load %arg5[%c12, %c0_205] {strides = array<i32: 2, 1>} : memref<96x12xf32, #tpu.memory_space<vmem>>, vector<5x12xf32>
    %255 = arith.maximumf %253, %254 : vector<5x12xf32>
    %c13 = arith.constant 13 : index
    %c0_206 = arith.constant 0 : index
    %256 = tpu.strided_load %arg5[%c13, %c0_206] {strides = array<i32: 2, 1>} : memref<96x12xf32, #tpu.memory_space<vmem>>, vector<5x12xf32>
    %257 = arith.maximumf %255, %256 : vector<5x12xf32>
    %c14_207 = arith.constant 14 : index
    %c0_208 = arith.constant 0 : index
    %258 = tpu.strided_load %arg5[%c14_207, %c0_208] {strides = array<i32: 2, 1>} : memref<96x12xf32, #tpu.memory_space<vmem>>, vector<5x12xf32>
    %259 = arith.maximumf %257, %258 : vector<5x12xf32>
    %c15_209 = arith.constant 15 : index
    %c0_210 = arith.constant 0 : index
    %260 = tpu.strided_load %arg5[%c15_209, %c0_210] {strides = array<i32: 2, 1>} : memref<96x12xf32, #tpu.memory_space<vmem>>, vector<5x12xf32>
    %261 = arith.maximumf %259, %260 : vector<5x12xf32>
    %c24_211 = arith.constant 24 : index
    %c0_212 = arith.constant 0 : index
    %262 = tpu.strided_load %arg5[%c24_211, %c0_212] {strides = array<i32: 2, 1>} : memref<96x12xf32, #tpu.memory_space<vmem>>, vector<5x12xf32>
    %263 = arith.maximumf %261, %262 : vector<5x12xf32>
    %c25_213 = arith.constant 25 : index
    %c0_214 = arith.constant 0 : index
    %264 = tpu.strided_load %arg5[%c25_213, %c0_214] {strides = array<i32: 2, 1>} : memref<96x12xf32, #tpu.memory_space<vmem>>, vector<5x12xf32>
    %265 = arith.maximumf %263, %264 : vector<5x12xf32>
    %c26_215 = arith.constant 26 : index
    %c0_216 = arith.constant 0 : index
    %266 = tpu.strided_load %arg5[%c26_215, %c0_216] {strides = array<i32: 2, 1>} : memref<96x12xf32, #tpu.memory_space<vmem>>, vector<5x12xf32>
    %267 = arith.maximumf %265, %266 : vector<5x12xf32>
    %c27 = arith.constant 27 : index
    %c0_217 = arith.constant 0 : index
    %268 = tpu.strided_load %arg5[%c27, %c0_217] {strides = array<i32: 2, 1>} : memref<96x12xf32, #tpu.memory_space<vmem>>, vector<5x12xf32>
    %269 = arith.maximumf %267, %268 : vector<5x12xf32>
    %c36_218 = arith.constant 36 : index
    %c0_219 = arith.constant 0 : index
    %270 = tpu.strided_load %arg5[%c36_218, %c0_219] {strides = array<i32: 2, 1>} : memref<96x12xf32, #tpu.memory_space<vmem>>, vector<5x12xf32>
    %271 = arith.maximumf %269, %270 : vector<5x12xf32>
    %c37 = arith.constant 37 : index
    %c0_220 = arith.constant 0 : index
    %272 = tpu.strided_load %arg5[%c37, %c0_220] {strides = array<i32: 2, 1>} : memref<96x12xf32, #tpu.memory_space<vmem>>, vector<5x12xf32>
    %273 = arith.maximumf %271, %272 : vector<5x12xf32>
    %c38_221 = arith.constant 38 : index
    %c0_222 = arith.constant 0 : index
    %274 = tpu.strided_load %arg5[%c38_221, %c0_222] {strides = array<i32: 2, 1>} : memref<96x12xf32, #tpu.memory_space<vmem>>, vector<5x12xf32>
    %275 = arith.maximumf %273, %274 : vector<5x12xf32>
    %c39 = arith.constant 39 : index
    %c0_223 = arith.constant 0 : index
    %276 = tpu.strided_load %arg5[%c39, %c0_223] {strides = array<i32: 2, 1>} : memref<96x12xf32, #tpu.memory_space<vmem>>, vector<5x12xf32>
    %277 = arith.maximumf %275, %276 : vector<5x12xf32>
    %278 = vector.extract_strided_slice %277 {offsets = [0, 0], sizes = [5, 9], strides = [1, 1]} : vector<5x12xf32> to vector<5x9xf32>
    %279 = vector.extract_strided_slice %277 {offsets = [0, 1], sizes = [5, 9], strides = [1, 1]} : vector<5x12xf32> to vector<5x9xf32>
    %280 = arith.maximumf %278, %279 : vector<5x9xf32>
    %281 = vector.extract_strided_slice %277 {offsets = [0, 2], sizes = [5, 9], strides = [1, 1]} : vector<5x12xf32> to vector<5x9xf32>
    %282 = arith.maximumf %280, %281 : vector<5x9xf32>
    %283 = vector.extract_strided_slice %277 {offsets = [0, 3], sizes = [5, 9], strides = [1, 1]} : vector<5x12xf32> to vector<5x9xf32>
    %284 = arith.maximumf %282, %283 : vector<5x9xf32>
    %c0_224 = arith.constant 0 : index
    %c0_225 = arith.constant 0 : index
    %285 = vector.load %arg3[%c0_224, %c0_225] : memref<40x22xf32, #tpu.memory_space<vmem>>, vector<5x9xf32>
    tpu.vector_store %arg3[%c0_224, %c0_225], %284 {strides = array<i32>} : memref<40x22xf32, #tpu.memory_space<vmem>>, vector<5x9xf32>,
    %c24_226 = arith.constant 24 : index
    %c0_227 = arith.constant 0 : index
    %286 = tpu.strided_load %arg5[%c24_226, %c0_227] {strides = array<i32: 2, 1>} : memref<96x12xf32, #tpu.memory_space<vmem>>, vector<5x12xf32>
    %c25_228 = arith.constant 25 : index
    %c0_229 = arith.constant 0 : index
    %287 = tpu.strided_load %arg5[%c25_228, %c0_229] {strides = array<i32: 2, 1>} : memref<96x12xf32, #tpu.memory_space<vmem>>, vector<5x12xf32>
    %288 = arith.maximumf %286, %287 : vector<5x12xf32>
    %c26_230 = arith.constant 26 : index
    %c0_231 = arith.constant 0 : index
    %289 = tpu.strided_load %arg5[%c26_230, %c0_231] {strides = array<i32: 2, 1>} : memref<96x12xf32, #tpu.memory_space<vmem>>, vector<5x12xf32>
    %290 = arith.maximumf %288, %289 : vector<5x12xf32>
    %c27_232 = arith.constant 27 : index
    %c0_233 = arith.constant 0 : index
    %291 = tpu.strided_load %arg5[%c27_232, %c0_233] {strides = array<i32: 2, 1>} : memref<96x12xf32, #tpu.memory_space<vmem>>, vector<5x12xf32>
    %292 = arith.maximumf %290, %291 : vector<5x12xf32>
    %c36_234 = arith.constant 36 : index
    %c0_235 = arith.constant 0 : index
    %293 = tpu.strided_load %arg5[%c36_234, %c0_235] {strides = array<i32: 2, 1>} : memref<96x12xf32, #tpu.memory_space<vmem>>, vector<5x12xf32>
    %294 = arith.maximumf %292, %293 : vector<5x12xf32>
    %c37_236 = arith.constant 37 : index
    %c0_237 = arith.constant 0 : index
    %295 = tpu.strided_load %arg5[%c37_236, %c0_237] {strides = array<i32: 2, 1>} : memref<96x12xf32, #tpu.memory_space<vmem>>, vector<5x12xf32>
    %296 = arith.maximumf %294, %295 : vector<5x12xf32>
    %c38_238 = arith.constant 38 : index
    %c0_239 = arith.constant 0 : index
    %297 = tpu.strided_load %arg5[%c38_238, %c0_239] {strides = array<i32: 2, 1>} : memref<96x12xf32, #tpu.memory_space<vmem>>, vector<5x12xf32>
    %298 = arith.maximumf %296, %297 : vector<5x12xf32>
    %c39_240 = arith.constant 39 : index
    %c0_241 = arith.constant 0 : index
    %299 = tpu.strided_load %arg5[%c39_240, %c0_241] {strides = array<i32: 2, 1>} : memref<96x12xf32, #tpu.memory_space<vmem>>, vector<5x12xf32>
    %300 = arith.maximumf %298, %299 : vector<5x12xf32>
    %c48_242 = arith.constant 48 : index
    %c0_243 = arith.constant 0 : index
    %301 = tpu.strided_load %arg5[%c48_242, %c0_243] {strides = array<i32: 2, 1>} : memref<96x12xf32, #tpu.memory_space<vmem>>, vector<5x12xf32>
    %302 = arith.maximumf %300, %301 : vector<5x12xf32>
    %c49_244 = arith.constant 49 : index
    %c0_245 = arith.constant 0 : index
    %303 = tpu.strided_load %arg5[%c49_244, %c0_245] {strides = array<i32: 2, 1>} : memref<96x12xf32, #tpu.memory_space<vmem>>, vector<5x12xf32>
    %304 = arith.maximumf %302, %303 : vector<5x12xf32>
    %c50_246 = arith.constant 50 : index
    %c0_247 = arith.constant 0 : index
    %305 = tpu.strided_load %arg5[%c50_246, %c0_247] {strides = array<i32: 2, 1>} : memref<96x12xf32, #tpu.memory_space<vmem>>, vector<5x12xf32>
    %306 = arith.maximumf %304, %305 : vector<5x12xf32>
    %c51 = arith.constant 51 : index
    %c0_248 = arith.constant 0 : index
    %307 = tpu.strided_load %arg5[%c51, %c0_248] {strides = array<i32: 2, 1>} : memref<96x12xf32, #tpu.memory_space<vmem>>, vector<5x12xf32>
    %308 = arith.maximumf %306, %307 : vector<5x12xf32>
    %c60_249 = arith.constant 60 : index
    %c0_250 = arith.constant 0 : index
    %309 = tpu.strided_load %arg5[%c60_249, %c0_250] {strides = array<i32: 2, 1>} : memref<96x12xf32, #tpu.memory_space<vmem>>, vector<5x12xf32>
    %310 = arith.maximumf %308, %309 : vector<5x12xf32>
    %c61 = arith.constant 61 : index
    %c0_251 = arith.constant 0 : index
    %311 = tpu.strided_load %arg5[%c61, %c0_251] {strides = array<i32: 2, 1>} : memref<96x12xf32, #tpu.memory_space<vmem>>, vector<5x12xf32>
    %312 = arith.maximumf %310, %311 : vector<5x12xf32>
    %c62_252 = arith.constant 62 : index
    %c0_253 = arith.constant 0 : index
    %313 = tpu.strided_load %arg5[%c62_252, %c0_253] {strides = array<i32: 2, 1>} : memref<96x12xf32, #tpu.memory_space<vmem>>, vector<5x12xf32>
    %314 = arith.maximumf %312, %313 : vector<5x12xf32>
    %c63 = arith.constant 63 : index
    %c0_254 = arith.constant 0 : index
    %315 = tpu.strided_load %arg5[%c63, %c0_254] {strides = array<i32: 2, 1>} : memref<96x12xf32, #tpu.memory_space<vmem>>, vector<5x12xf32>
    %316 = arith.maximumf %314, %315 : vector<5x12xf32>
    %317 = vector.extract_strided_slice %316 {offsets = [0, 0], sizes = [5, 9], strides = [1, 1]} : vector<5x12xf32> to vector<5x9xf32>
    %318 = vector.extract_strided_slice %316 {offsets = [0, 1], sizes = [5, 9], strides = [1, 1]} : vector<5x12xf32> to vector<5x9xf32>
    %319 = arith.maximumf %317, %318 : vector<5x9xf32>
    %320 = vector.extract_strided_slice %316 {offsets = [0, 2], sizes = [5, 9], strides = [1, 1]} : vector<5x12xf32> to vector<5x9xf32>
    %321 = arith.maximumf %319, %320 : vector<5x9xf32>
    %322 = vector.extract_strided_slice %316 {offsets = [0, 3], sizes = [5, 9], strides = [1, 1]} : vector<5x12xf32> to vector<5x9xf32>
    %323 = arith.maximumf %321, %322 : vector<5x9xf32>
    %c5_255 = arith.constant 5 : index
    %c0_256 = arith.constant 0 : index
    %324 = vector.load %arg3[%c5_255, %c0_256] : memref<40x22xf32, #tpu.memory_space<vmem>>, vector<5x9xf32>
    tpu.vector_store %arg3[%c5_255, %c0_256], %323 {strides = array<i32>} : memref<40x22xf32, #tpu.memory_space<vmem>>, vector<5x9xf32>,
    %c48_257 = arith.constant 48 : index
    %c0_258 = arith.constant 0 : index
    %325 = tpu.strided_load %arg5[%c48_257, %c0_258] {strides = array<i32: 2, 1>} : memref<96x12xf32, #tpu.memory_space<vmem>>, vector<5x12xf32>
    %c49_259 = arith.constant 49 : index
    %c0_260 = arith.constant 0 : index
    %326 = tpu.strided_load %arg5[%c49_259, %c0_260] {strides = array<i32: 2, 1>} : memref<96x12xf32, #tpu.memory_space<vmem>>, vector<5x12xf32>
    %327 = arith.maximumf %325, %326 : vector<5x12xf32>
    %c50_261 = arith.constant 50 : index
    %c0_262 = arith.constant 0 : index
    %328 = tpu.strided_load %arg5[%c50_261, %c0_262] {strides = array<i32: 2, 1>} : memref<96x12xf32, #tpu.memory_space<vmem>>, vector<5x12xf32>
    %329 = arith.maximumf %327, %328 : vector<5x12xf32>
    %c51_263 = arith.constant 51 : index
    %c0_264 = arith.constant 0 : index
    %330 = tpu.strided_load %arg5[%c51_263, %c0_264] {strides = array<i32: 2, 1>} : memref<96x12xf32, #tpu.memory_space<vmem>>, vector<5x12xf32>
    %331 = arith.maximumf %329, %330 : vector<5x12xf32>
    %c60_265 = arith.constant 60 : index
    %c0_266 = arith.constant 0 : index
    %332 = tpu.strided_load %arg5[%c60_265, %c0_266] {strides = array<i32: 2, 1>} : memref<96x12xf32, #tpu.memory_space<vmem>>, vector<5x12xf32>
    %333 = arith.maximumf %331, %332 : vector<5x12xf32>
    %c61_267 = arith.constant 61 : index
    %c0_268 = arith.constant 0 : index
    %334 = tpu.strided_load %arg5[%c61_267, %c0_268] {strides = array<i32: 2, 1>} : memref<96x12xf32, #tpu.memory_space<vmem>>, vector<5x12xf32>
    %335 = arith.maximumf %333, %334 : vector<5x12xf32>
    %c62_269 = arith.constant 62 : index
    %c0_270 = arith.constant 0 : index
    %336 = tpu.strided_load %arg5[%c62_269, %c0_270] {strides = array<i32: 2, 1>} : memref<96x12xf32, #tpu.memory_space<vmem>>, vector<5x12xf32>
    %337 = arith.maximumf %335, %336 : vector<5x12xf32>
    %c63_271 = arith.constant 63 : index
    %c0_272 = arith.constant 0 : index
    %338 = tpu.strided_load %arg5[%c63_271, %c0_272] {strides = array<i32: 2, 1>} : memref<96x12xf32, #tpu.memory_space<vmem>>, vector<5x12xf32>
    %339 = arith.maximumf %337, %338 : vector<5x12xf32>
    %c72_273 = arith.constant 72 : index
    %c0_274 = arith.constant 0 : index
    %340 = tpu.strided_load %arg5[%c72_273, %c0_274] {strides = array<i32: 2, 1>} : memref<96x12xf32, #tpu.memory_space<vmem>>, vector<5x12xf32>
    %341 = arith.maximumf %339, %340 : vector<5x12xf32>
    %c73_275 = arith.constant 73 : index
    %c0_276 = arith.constant 0 : index
    %342 = tpu.strided_load %arg5[%c73_275, %c0_276] {strides = array<i32: 2, 1>} : memref<96x12xf32, #tpu.memory_space<vmem>>, vector<5x12xf32>
    %343 = arith.maximumf %341, %342 : vector<5x12xf32>
    %c74_277 = arith.constant 74 : index
    %c0_278 = arith.constant 0 : index
    %344 = tpu.strided_load %arg5[%c74_277, %c0_278] {strides = array<i32: 2, 1>} : memref<96x12xf32, #tpu.memory_space<vmem>>, vector<5x12xf32>
    %345 = arith.maximumf %343, %344 : vector<5x12xf32>
    %c75 = arith.constant 75 : index
    %c0_279 = arith.constant 0 : index
    %346 = tpu.strided_load %arg5[%c75, %c0_279] {strides = array<i32: 2, 1>} : memref<96x12xf32, #tpu.memory_space<vmem>>, vector<5x12xf32>
    %347 = arith.maximumf %345, %346 : vector<5x12xf32>
    %c84_280 = arith.constant 84 : index
    %c0_281 = arith.constant 0 : index
    %348 = tpu.strided_load %arg5[%c84_280, %c0_281] {strides = array<i32: 2, 1>} : memref<96x12xf32, #tpu.memory_space<vmem>>, vector<5x12xf32>
    %349 = arith.maximumf %347, %348 : vector<5x12xf32>
    %c85 = arith.constant 85 : index
    %c0_282 = arith.constant 0 : index
    %350 = tpu.strided_load %arg5[%c85, %c0_282] {strides = array<i32: 2, 1>} : memref<96x12xf32, #tpu.memory_space<vmem>>, vector<5x12xf32>
    %351 = arith.maximumf %349, %350 : vector<5x12xf32>
    %c86 = arith.constant 86 : index
    %c0_283 = arith.constant 0 : index
    %352 = tpu.strided_load %arg5[%c86, %c0_283] {strides = array<i32: 2, 1>} : memref<96x12xf32, #tpu.memory_space<vmem>>, vector<5x12xf32>
    %353 = arith.maximumf %351, %352 : vector<5x12xf32>
    %c87 = arith.constant 87 : index
    %c0_284 = arith.constant 0 : index
    %354 = tpu.strided_load %arg5[%c87, %c0_284] {strides = array<i32: 2, 1>} : memref<96x12xf32, #tpu.memory_space<vmem>>, vector<5x12xf32>
    %355 = arith.maximumf %353, %354 : vector<5x12xf32>
    %356 = vector.extract_strided_slice %355 {offsets = [0, 0], sizes = [5, 9], strides = [1, 1]} : vector<5x12xf32> to vector<5x9xf32>
    %357 = vector.extract_strided_slice %355 {offsets = [0, 1], sizes = [5, 9], strides = [1, 1]} : vector<5x12xf32> to vector<5x9xf32>
    %358 = arith.maximumf %356, %357 : vector<5x9xf32>
    %359 = vector.extract_strided_slice %355 {offsets = [0, 2], sizes = [5, 9], strides = [1, 1]} : vector<5x12xf32> to vector<5x9xf32>
    %360 = arith.maximumf %358, %359 : vector<5x9xf32>
    %361 = vector.extract_strided_slice %355 {offsets = [0, 3], sizes = [5, 9], strides = [1, 1]} : vector<5x12xf32> to vector<5x9xf32>
    %362 = arith.maximumf %360, %361 : vector<5x9xf32>
    %c10_285 = arith.constant 10 : index
    %c0_286 = arith.constant 0 : index
    %363 = vector.load %arg3[%c10_285, %c0_286] : memref<40x22xf32, #tpu.memory_space<vmem>>, vector<5x9xf32>
    tpu.vector_store %arg3[%c10_285, %c0_286], %362 {strides = array<i32>} : memref<40x22xf32, #tpu.memory_space<vmem>>, vector<5x9xf32>,
    %c0_287 = arith.constant 0 : index
    %c0_288 = arith.constant 0 : index
    %364 = vector.load %arg3[%c0_287, %c0_288] : memref<40x22xf32, #tpu.memory_space<vmem>>, vector<15x9xf32>
    %365 = tpu.transpose %364, [1, 0] : vector<15x9xf32> -> vector<9x15xf32>
    %c0_289 = arith.constant 0 : index
    %c0_290 = arith.constant 0 : index
    %366 = vector.load %arg4[%c0_289, %c0_290] : memref<22x40xf32, #tpu.memory_space<vmem>>, vector<9x15xf32>
    tpu.vector_store %arg4[%c0_289, %c0_290], %365 {strides = array<i32>} : memref<22x40xf32, #tpu.memory_space<vmem>>, vector<9x15xf32>,
    %c0_291 = arith.constant 0 : index
    %c0_292 = arith.constant 0 : index
    %367 = tpu.strided_load %arg4[%c0_291, %c0_292] {strides = array<i32: 2, 1>} : memref<22x40xf32, #tpu.memory_space<vmem>>, vector<5x15xf32>
    %368 = tpu.transpose %367, [1, 0] : vector<5x15xf32> -> vector<15x5xf32>
    %369 = vector.extract_strided_slice %368 {offsets = [0, 0], sizes = [5, 5], strides = [1, 1]} : vector<15x5xf32> to vector<5x5xf32>
    %c0_293 = arith.constant 0 : index
    %c1_294 = arith.constant 1 : index
    %370 = vector.load %arg6[%c0_293, %c1_294] : memref<15x7xf32, #tpu.memory_space<vmem>>, vector<5x5xf32>
    tpu.vector_store %arg6[%c0_293, %c1_294], %369 {strides = array<i32>} : memref<15x7xf32, #tpu.memory_space<vmem>>, vector<5x5xf32>,
    %371 = vector.extract_strided_slice %368 {offsets = [5, 0], sizes = [5, 5], strides = [1, 1]} : vector<15x5xf32> to vector<5x5xf32>
    %c5_295 = arith.constant 5 : index
    %c1_296 = arith.constant 1 : index
    %372 = vector.load %arg6[%c5_295, %c1_296] : memref<15x7xf32, #tpu.memory_space<vmem>>, vector<5x5xf32>
    tpu.vector_store %arg6[%c5_295, %c1_296], %371 {strides = array<i32>} : memref<15x7xf32, #tpu.memory_space<vmem>>, vector<5x5xf32>,
    %373 = vector.extract_strided_slice %368 {offsets = [10, 0], sizes = [5, 5], strides = [1, 1]} : vector<15x5xf32> to vector<5x5xf32>
    %c10_297 = arith.constant 10 : index
    %c1_298 = arith.constant 1 : index
    %374 = vector.load %arg6[%c10_297, %c1_298] : memref<15x7xf32, #tpu.memory_space<vmem>>, vector<5x5xf32>
    tpu.vector_store %arg6[%c10_297, %c1_298], %373 {strides = array<i32>} : memref<15x7xf32, #tpu.memory_space<vmem>>, vector<5x5xf32>,
    %c0_299 = arith.constant 0 : index
    %c0_300 = arith.constant 0 : index
    %375 = vector.load %arg6[%c0_299, %c0_300] : memref<15x7xf32, #tpu.memory_space<vmem>>, vector<4x7xf32>
    %c1_301 = arith.constant 1 : index
    %c0_302 = arith.constant 0 : index
    %376 = vector.load %arg6[%c1_301, %c0_302] : memref<15x7xf32, #tpu.memory_space<vmem>>, vector<4x7xf32>
    %377 = arith.maximumf %375, %376 : vector<4x7xf32>
    %378 = vector.extract_strided_slice %377 {offsets = [0, 0], sizes = [4, 5], strides = [1, 1]} : vector<4x7xf32> to vector<4x5xf32>
    %379 = vector.extract_strided_slice %377 {offsets = [0, 1], sizes = [4, 5], strides = [1, 1]} : vector<4x7xf32> to vector<4x5xf32>
    %380 = arith.maximumf %378, %379 : vector<4x5xf32>
    %381 = vector.extract_strided_slice %377 {offsets = [0, 2], sizes = [4, 5], strides = [1, 1]} : vector<4x7xf32> to vector<4x5xf32>
    %382 = arith.maximumf %380, %381 : vector<4x5xf32>
    %c10_303 = arith.constant 10 : index
    %c2_304 = arith.constant 2 : index
    %383 = vector.load %arg7[%c10_303, %c2_304] : memref<40x9xf32, #tpu.memory_space<vmem>>, vector<4x5xf32>
    tpu.vector_store %arg7[%c10_303, %c2_304], %382 {strides = array<i32>} : memref<40x9xf32, #tpu.memory_space<vmem>>, vector<4x5xf32>,
    %c5_305 = arith.constant 5 : index
    %c0_306 = arith.constant 0 : index
    %384 = vector.load %arg6[%c5_305, %c0_306] : memref<15x7xf32, #tpu.memory_space<vmem>>, vector<4x7xf32>
    %c6_307 = arith.constant 6 : index
    %c0_308 = arith.constant 0 : index
    %385 = vector.load %arg6[%c6_307, %c0_308] : memref<15x7xf32, #tpu.memory_space<vmem>>, vector<4x7xf32>
    %386 = arith.maximumf %384, %385 : vector<4x7xf32>
    %387 = vector.extract_strided_slice %386 {offsets = [0, 0], sizes = [4, 5], strides = [1, 1]} : vector<4x7xf32> to vector<4x5xf32>
    %388 = vector.extract_strided_slice %386 {offsets = [0, 1], sizes = [4, 5], strides = [1, 1]} : vector<4x7xf32> to vector<4x5xf32>
    %389 = arith.maximumf %387, %388 : vector<4x5xf32>
    %390 = vector.extract_strided_slice %386 {offsets = [0, 2], sizes = [4, 5], strides = [1, 1]} : vector<4x7xf32> to vector<4x5xf32>
    %391 = arith.maximumf %389, %390 : vector<4x5xf32>
    %c18 = arith.constant 18 : index
    %c2_309 = arith.constant 2 : index
    %392 = vector.load %arg7[%c18, %c2_309] : memref<40x9xf32, #tpu.memory_space<vmem>>, vector<4x5xf32>
    tpu.vector_store %arg7[%c18, %c2_309], %391 {strides = array<i32>} : memref<40x9xf32, #tpu.memory_space<vmem>>, vector<4x5xf32>,
    %c10_310 = arith.constant 10 : index
    %c0_311 = arith.constant 0 : index
    %393 = vector.load %arg6[%c10_310, %c0_311] : memref<15x7xf32, #tpu.memory_space<vmem>>, vector<4x7xf32>
    %c11 = arith.constant 11 : index
    %c0_312 = arith.constant 0 : index
    %394 = vector.load %arg6[%c11, %c0_312] : memref<15x7xf32, #tpu.memory_space<vmem>>, vector<4x7xf32>
    %395 = arith.maximumf %393, %394 : vector<4x7xf32>
    %396 = vector.extract_strided_slice %395 {offsets = [0, 0], sizes = [4, 5], strides = [1, 1]} : vector<4x7xf32> to vector<4x5xf32>
    %397 = vector.extract_strided_slice %395 {offsets = [0, 1], sizes = [4, 5], strides = [1, 1]} : vector<4x7xf32> to vector<4x5xf32>
    %398 = arith.maximumf %396, %397 : vector<4x5xf32>
    %399 = vector.extract_strided_slice %395 {offsets = [0, 2], sizes = [4, 5], strides = [1, 1]} : vector<4x7xf32> to vector<4x5xf32>
    %400 = arith.maximumf %398, %399 : vector<4x5xf32>
    %c26_313 = arith.constant 26 : index
    %c2_314 = arith.constant 2 : index
    %401 = vector.load %arg7[%c26_313, %c2_314] : memref<40x9xf32, #tpu.memory_space<vmem>>, vector<4x5xf32>
    tpu.vector_store %arg7[%c26_313, %c2_314], %400 {strides = array<i32>} : memref<40x9xf32, #tpu.memory_space<vmem>>, vector<4x5xf32>,
    %c0_315 = arith.constant 0 : index
    %c0_316 = arith.constant 0 : index
    %402 = tpu.strided_load %arg7[%c0_315, %c0_316] {strides = array<i32: 2, 1>} : memref<40x9xf32, #tpu.memory_space<vmem>>, vector<3x9xf32>
    %c1_317 = arith.constant 1 : index
    %c0_318 = arith.constant 0 : index
    %403 = tpu.strided_load %arg7[%c1_317, %c0_318] {strides = array<i32: 2, 1>} : memref<40x9xf32, #tpu.memory_space<vmem>>, vector<3x9xf32>
    %404 = arith.maximumf %402, %403 : vector<3x9xf32>
    %c2_319 = arith.constant 2 : index
    %c0_320 = arith.constant 0 : index
    %405 = tpu.strided_load %arg7[%c2_319, %c0_320] {strides = array<i32: 2, 1>} : memref<40x9xf32, #tpu.memory_space<vmem>>, vector<3x9xf32>
    %406 = arith.maximumf %404, %405 : vector<3x9xf32>
    %c3_321 = arith.constant 3 : index
    %c0_322 = arith.constant 0 : index
    %407 = tpu.strided_load %arg7[%c3_321, %c0_322] {strides = array<i32: 2, 1>} : memref<40x9xf32, #tpu.memory_space<vmem>>, vector<3x9xf32>
    %408 = arith.maximumf %406, %407 : vector<3x9xf32>
    %c8_323 = arith.constant 8 : index
    %c0_324 = arith.constant 0 : index
    %409 = tpu.strided_load %arg7[%c8_323, %c0_324] {strides = array<i32: 2, 1>} : memref<40x9xf32, #tpu.memory_space<vmem>>, vector<3x9xf32>
    %410 = arith.maximumf %408, %409 : vector<3x9xf32>
    %c9_325 = arith.constant 9 : index
    %c0_326 = arith.constant 0 : index
    %411 = tpu.strided_load %arg7[%c9_325, %c0_326] {strides = array<i32: 2, 1>} : memref<40x9xf32, #tpu.memory_space<vmem>>, vector<3x9xf32>
    %412 = arith.maximumf %410, %411 : vector<3x9xf32>
    %c10_327 = arith.constant 10 : index
    %c0_328 = arith.constant 0 : index
    %413 = tpu.strided_load %arg7[%c10_327, %c0_328] {strides = array<i32: 2, 1>} : memref<40x9xf32, #tpu.memory_space<vmem>>, vector<3x9xf32>
    %414 = arith.maximumf %412, %413 : vector<3x9xf32>
    %c11_329 = arith.constant 11 : index
    %c0_330 = arith.constant 0 : index
    %415 = tpu.strided_load %arg7[%c11_329, %c0_330] {strides = array<i32: 2, 1>} : memref<40x9xf32, #tpu.memory_space<vmem>>, vector<3x9xf32>
    %416 = arith.maximumf %414, %415 : vector<3x9xf32>
    %c16_331 = arith.constant 16 : index
    %c0_332 = arith.constant 0 : index
    %417 = tpu.strided_load %arg7[%c16_331, %c0_332] {strides = array<i32: 2, 1>} : memref<40x9xf32, #tpu.memory_space<vmem>>, vector<3x9xf32>
    %418 = arith.maximumf %416, %417 : vector<3x9xf32>
    %c17 = arith.constant 17 : index
    %c0_333 = arith.constant 0 : index
    %419 = tpu.strided_load %arg7[%c17, %c0_333] {strides = array<i32: 2, 1>} : memref<40x9xf32, #tpu.memory_space<vmem>>, vector<3x9xf32>
    %420 = arith.maximumf %418, %419 : vector<3x9xf32>
    %c18_334 = arith.constant 18 : index
    %c0_335 = arith.constant 0 : index
    %421 = tpu.strided_load %arg7[%c18_334, %c0_335] {strides = array<i32: 2, 1>} : memref<40x9xf32, #tpu.memory_space<vmem>>, vector<3x9xf32>
    %422 = arith.maximumf %420, %421 : vector<3x9xf32>
    %c19_336 = arith.constant 19 : index
    %c0_337 = arith.constant 0 : index
    %423 = tpu.strided_load %arg7[%c19_336, %c0_337] {strides = array<i32: 2, 1>} : memref<40x9xf32, #tpu.memory_space<vmem>>, vector<3x9xf32>
    %424 = arith.maximumf %422, %423 : vector<3x9xf32>
    %425 = vector.extract_strided_slice %424 {offsets = [0, 0], sizes = [3, 5], strides = [1, 1]} : vector<3x9xf32> to vector<3x5xf32>
    %426 = vector.extract_strided_slice %424 {offsets = [0, 1], sizes = [3, 5], strides = [1, 1]} : vector<3x9xf32> to vector<3x5xf32>
    %427 = arith.maximumf %425, %426 : vector<3x5xf32>
    %428 = vector.extract_strided_slice %424 {offsets = [0, 2], sizes = [3, 5], strides = [1, 1]} : vector<3x9xf32> to vector<3x5xf32>
    %429 = arith.maximumf %427, %428 : vector<3x5xf32>
    %430 = vector.extract_strided_slice %424 {offsets = [0, 3], sizes = [3, 5], strides = [1, 1]} : vector<3x9xf32> to vector<3x5xf32>
    %431 = arith.maximumf %429, %430 : vector<3x5xf32>
    %432 = vector.extract_strided_slice %424 {offsets = [0, 4], sizes = [3, 5], strides = [1, 1]} : vector<3x9xf32> to vector<3x5xf32>
    %433 = arith.maximumf %431, %432 : vector<3x5xf32>
    %c0_338 = arith.constant 0 : index
    %c0_339 = arith.constant 0 : index
    %434 = vector.load %arg3[%c0_338, %c0_339] : memref<40x22xf32, #tpu.memory_space<vmem>>, vector<3x5xf32>
    tpu.vector_store %arg3[%c0_338, %c0_339], %433 {strides = array<i32>} : memref<40x22xf32, #tpu.memory_space<vmem>>, vector<3x5xf32>,
    %c8_340 = arith.constant 8 : index
    %c0_341 = arith.constant 0 : index
    %435 = tpu.strided_load %arg7[%c8_340, %c0_341] {strides = array<i32: 2, 1>} : memref<40x9xf32, #tpu.memory_space<vmem>>, vector<3x9xf32>
    %c9_342 = arith.constant 9 : index
    %c0_343 = arith.constant 0 : index
    %436 = tpu.strided_load %arg7[%c9_342, %c0_343] {strides = array<i32: 2, 1>} : memref<40x9xf32, #tpu.memory_space<vmem>>, vector<3x9xf32>
    %437 = arith.maximumf %435, %436 : vector<3x9xf32>
    %c10_344 = arith.constant 10 : index
    %c0_345 = arith.constant 0 : index
    %438 = tpu.strided_load %arg7[%c10_344, %c0_345] {strides = array<i32: 2, 1>} : memref<40x9xf32, #tpu.memory_space<vmem>>, vector<3x9xf32>
    %439 = arith.maximumf %437, %438 : vector<3x9xf32>
    %c11_346 = arith.constant 11 : index
    %c0_347 = arith.constant 0 : index
    %440 = tpu.strided_load %arg7[%c11_346, %c0_347] {strides = array<i32: 2, 1>} : memref<40x9xf32, #tpu.memory_space<vmem>>, vector<3x9xf32>
    %441 = arith.maximumf %439, %440 : vector<3x9xf32>
    %c16_348 = arith.constant 16 : index
    %c0_349 = arith.constant 0 : index
    %442 = tpu.strided_load %arg7[%c16_348, %c0_349] {strides = array<i32: 2, 1>} : memref<40x9xf32, #tpu.memory_space<vmem>>, vector<3x9xf32>
    %443 = arith.maximumf %441, %442 : vector<3x9xf32>
    %c17_350 = arith.constant 17 : index
    %c0_351 = arith.constant 0 : index
    %444 = tpu.strided_load %arg7[%c17_350, %c0_351] {strides = array<i32: 2, 1>} : memref<40x9xf32, #tpu.memory_space<vmem>>, vector<3x9xf32>
    %445 = arith.maximumf %443, %444 : vector<3x9xf32>
    %c18_352 = arith.constant 18 : index
    %c0_353 = arith.constant 0 : index
    %446 = tpu.strided_load %arg7[%c18_352, %c0_353] {strides = array<i32: 2, 1>} : memref<40x9xf32, #tpu.memory_space<vmem>>, vector<3x9xf32>
    %447 = arith.maximumf %445, %446 : vector<3x9xf32>
    %c19_354 = arith.constant 19 : index
    %c0_355 = arith.constant 0 : index
    %448 = tpu.strided_load %arg7[%c19_354, %c0_355] {strides = array<i32: 2, 1>} : memref<40x9xf32, #tpu.memory_space<vmem>>, vector<3x9xf32>
    %449 = arith.maximumf %447, %448 : vector<3x9xf32>
    %c24_356 = arith.constant 24 : index
    %c0_357 = arith.constant 0 : index
    %450 = tpu.strided_load %arg7[%c24_356, %c0_357] {strides = array<i32: 2, 1>} : memref<40x9xf32, #tpu.memory_space<vmem>>, vector<3x9xf32>
    %451 = arith.maximumf %449, %450 : vector<3x9xf32>
    %c25_358 = arith.constant 25 : index
    %c0_359 = arith.constant 0 : index
    %452 = tpu.strided_load %arg7[%c25_358, %c0_359] {strides = array<i32: 2, 1>} : memref<40x9xf32, #tpu.memory_space<vmem>>, vector<3x9xf32>
    %453 = arith.maximumf %451, %452 : vector<3x9xf32>
    %c26_360 = arith.constant 26 : index
    %c0_361 = arith.constant 0 : index
    %454 = tpu.strided_load %arg7[%c26_360, %c0_361] {strides = array<i32: 2, 1>} : memref<40x9xf32, #tpu.memory_space<vmem>>, vector<3x9xf32>
    %455 = arith.maximumf %453, %454 : vector<3x9xf32>
    %c27_362 = arith.constant 27 : index
    %c0_363 = arith.constant 0 : index
    %456 = tpu.strided_load %arg7[%c27_362, %c0_363] {strides = array<i32: 2, 1>} : memref<40x9xf32, #tpu.memory_space<vmem>>, vector<3x9xf32>
    %457 = arith.maximumf %455, %456 : vector<3x9xf32>
    %458 = vector.extract_strided_slice %457 {offsets = [0, 0], sizes = [3, 5], strides = [1, 1]} : vector<3x9xf32> to vector<3x5xf32>
    %459 = vector.extract_strided_slice %457 {offsets = [0, 1], sizes = [3, 5], strides = [1, 1]} : vector<3x9xf32> to vector<3x5xf32>
    %460 = arith.maximumf %458, %459 : vector<3x5xf32>
    %461 = vector.extract_strided_slice %457 {offsets = [0, 2], sizes = [3, 5], strides = [1, 1]} : vector<3x9xf32> to vector<3x5xf32>
    %462 = arith.maximumf %460, %461 : vector<3x5xf32>
    %463 = vector.extract_strided_slice %457 {offsets = [0, 3], sizes = [3, 5], strides = [1, 1]} : vector<3x9xf32> to vector<3x5xf32>
    %464 = arith.maximumf %462, %463 : vector<3x5xf32>
    %465 = vector.extract_strided_slice %457 {offsets = [0, 4], sizes = [3, 5], strides = [1, 1]} : vector<3x9xf32> to vector<3x5xf32>
    %466 = arith.maximumf %464, %465 : vector<3x5xf32>
    %c3_364 = arith.constant 3 : index
    %c0_365 = arith.constant 0 : index
    %467 = vector.load %arg3[%c3_364, %c0_365] : memref<40x22xf32, #tpu.memory_space<vmem>>, vector<3x5xf32>
    tpu.vector_store %arg3[%c3_364, %c0_365], %466 {strides = array<i32>} : memref<40x22xf32, #tpu.memory_space<vmem>>, vector<3x5xf32>,
    %c16_366 = arith.constant 16 : index
    %c0_367 = arith.constant 0 : index
    %468 = tpu.strided_load %arg7[%c16_366, %c0_367] {strides = array<i32: 2, 1>} : memref<40x9xf32, #tpu.memory_space<vmem>>, vector<3x9xf32>
    %c17_368 = arith.constant 17 : index
    %c0_369 = arith.constant 0 : index
    %469 = tpu.strided_load %arg7[%c17_368, %c0_369] {strides = array<i32: 2, 1>} : memref<40x9xf32, #tpu.memory_space<vmem>>, vector<3x9xf32>
    %470 = arith.maximumf %468, %469 : vector<3x9xf32>
    %c18_370 = arith.constant 18 : index
    %c0_371 = arith.constant 0 : index
    %471 = tpu.strided_load %arg7[%c18_370, %c0_371] {strides = array<i32: 2, 1>} : memref<40x9xf32, #tpu.memory_space<vmem>>, vector<3x9xf32>
    %472 = arith.maximumf %470, %471 : vector<3x9xf32>
    %c19_372 = arith.constant 19 : index
    %c0_373 = arith.constant 0 : index
    %473 = tpu.strided_load %arg7[%c19_372, %c0_373] {strides = array<i32: 2, 1>} : memref<40x9xf32, #tpu.memory_space<vmem>>, vector<3x9xf32>
    %474 = arith.maximumf %472, %473 : vector<3x9xf32>
    %c24_374 = arith.constant 24 : index
    %c0_375 = arith.constant 0 : index
    %475 = tpu.strided_load %arg7[%c24_374, %c0_375] {strides = array<i32: 2, 1>} : memref<40x9xf32, #tpu.memory_space<vmem>>, vector<3x9xf32>
    %476 = arith.maximumf %474, %475 : vector<3x9xf32>
    %c25_376 = arith.constant 25 : index
    %c0_377 = arith.constant 0 : index
    %477 = tpu.strided_load %arg7[%c25_376, %c0_377] {strides = array<i32: 2, 1>} : memref<40x9xf32, #tpu.memory_space<vmem>>, vector<3x9xf32>
    %478 = arith.maximumf %476, %477 : vector<3x9xf32>
    %c26_378 = arith.constant 26 : index
    %c0_379 = arith.constant 0 : index
    %479 = tpu.strided_load %arg7[%c26_378, %c0_379] {strides = array<i32: 2, 1>} : memref<40x9xf32, #tpu.memory_space<vmem>>, vector<3x9xf32>
    %480 = arith.maximumf %478, %479 : vector<3x9xf32>
    %c27_380 = arith.constant 27 : index
    %c0_381 = arith.constant 0 : index
    %481 = tpu.strided_load %arg7[%c27_380, %c0_381] {strides = array<i32: 2, 1>} : memref<40x9xf32, #tpu.memory_space<vmem>>, vector<3x9xf32>
    %482 = arith.maximumf %480, %481 : vector<3x9xf32>
    %c32_382 = arith.constant 32 : index
    %c0_383 = arith.constant 0 : index
    %483 = tpu.strided_load %arg7[%c32_382, %c0_383] {strides = array<i32: 2, 1>} : memref<40x9xf32, #tpu.memory_space<vmem>>, vector<3x9xf32>
    %484 = arith.maximumf %482, %483 : vector<3x9xf32>
    %c33 = arith.constant 33 : index
    %c0_384 = arith.constant 0 : index
    %485 = tpu.strided_load %arg7[%c33, %c0_384] {strides = array<i32: 2, 1>} : memref<40x9xf32, #tpu.memory_space<vmem>>, vector<3x9xf32>
    %486 = arith.maximumf %484, %485 : vector<3x9xf32>
    %c34_385 = arith.constant 34 : index
    %c0_386 = arith.constant 0 : index
    %487 = tpu.strided_load %arg7[%c34_385, %c0_386] {strides = array<i32: 2, 1>} : memref<40x9xf32, #tpu.memory_space<vmem>>, vector<3x9xf32>
    %488 = arith.maximumf %486, %487 : vector<3x9xf32>
    %c35 = arith.constant 35 : index
    %c0_387 = arith.constant 0 : index
    %489 = tpu.strided_load %arg7[%c35, %c0_387] {strides = array<i32: 2, 1>} : memref<40x9xf32, #tpu.memory_space<vmem>>, vector<3x9xf32>
    %490 = arith.maximumf %488, %489 : vector<3x9xf32>
    %491 = vector.extract_strided_slice %490 {offsets = [0, 0], sizes = [3, 5], strides = [1, 1]} : vector<3x9xf32> to vector<3x5xf32>
    %492 = vector.extract_strided_slice %490 {offsets = [0, 1], sizes = [3, 5], strides = [1, 1]} : vector<3x9xf32> to vector<3x5xf32>
    %493 = arith.maximumf %491, %492 : vector<3x5xf32>
    %494 = vector.extract_strided_slice %490 {offsets = [0, 2], sizes = [3, 5], strides = [1, 1]} : vector<3x9xf32> to vector<3x5xf32>
    %495 = arith.maximumf %493, %494 : vector<3x5xf32>
    %496 = vector.extract_strided_slice %490 {offsets = [0, 3], sizes = [3, 5], strides = [1, 1]} : vector<3x9xf32> to vector<3x5xf32>
    %497 = arith.maximumf %495, %496 : vector<3x5xf32>
    %498 = vector.extract_strided_slice %490 {offsets = [0, 4], sizes = [3, 5], strides = [1, 1]} : vector<3x9xf32> to vector<3x5xf32>
    %499 = arith.maximumf %497, %498 : vector<3x5xf32>
    %c6_388 = arith.constant 6 : index
    %c0_389 = arith.constant 0 : index
    %500 = vector.load %arg3[%c6_388, %c0_389] : memref<40x22xf32, #tpu.memory_space<vmem>>, vector<3x5xf32>
    tpu.vector_store %arg3[%c6_388, %c0_389], %499 {strides = array<i32>} : memref<40x22xf32, #tpu.memory_space<vmem>>, vector<3x5xf32>,
    %c0_390 = arith.constant 0 : index
    %c0_391 = arith.constant 0 : index
    %501 = vector.load %arg3[%c0_390, %c0_391] : memref<40x22xf32, #tpu.memory_space<vmem>>, vector<9x5xf32>
    %502 = tpu.transpose %501, [1, 0] : vector<9x5xf32> -> vector<5x9xf32>
    %c0_392 = arith.constant 0 : index
    %c0_393 = arith.constant 0 : index
    %503 = vector.load %arg4[%c0_392, %c0_393] : memref<22x40xf32, #tpu.memory_space<vmem>>, vector<5x9xf32>
    tpu.vector_store %arg4[%c0_392, %c0_393], %502 {strides = array<i32>} : memref<22x40xf32, #tpu.memory_space<vmem>>, vector<5x9xf32>,
    %c0_394 = arith.constant 0 : index
    %c0_395 = arith.constant 0 : index
    %504 = tpu.strided_load %arg4[%c0_394, %c0_395] {strides = array<i32: 2, 1>} : memref<22x40xf32, #tpu.memory_space<vmem>>, vector<3x9xf32>
    %505 = tpu.transpose %504, [1, 0] : vector<3x9xf32> -> vector<9x3xf32>
    %506 = vector.extract_strided_slice %505 {offsets = [0, 0], sizes = [3, 3], strides = [1, 1]} : vector<9x3xf32> to vector<3x3xf32>
    %c6_396 = arith.constant 6 : index
    %c1_397 = arith.constant 1 : index
    %507 = vector.load %arg8[%c6_396, %c1_397] : memref<25x5xf32, #tpu.memory_space<vmem>>, vector<3x3xf32>
    tpu.vector_store %arg8[%c6_396, %c1_397], %506 {strides = array<i32>} : memref<25x5xf32, #tpu.memory_space<vmem>>, vector<3x3xf32>,
    %508 = vector.extract_strided_slice %505 {offsets = [3, 0], sizes = [3, 3], strides = [1, 1]} : vector<9x3xf32> to vector<3x3xf32>
    %c11_398 = arith.constant 11 : index
    %c1_399 = arith.constant 1 : index
    %509 = vector.load %arg8[%c11_398, %c1_399] : memref<25x5xf32, #tpu.memory_space<vmem>>, vector<3x3xf32>
    tpu.vector_store %arg8[%c11_398, %c1_399], %508 {strides = array<i32>} : memref<25x5xf32, #tpu.memory_space<vmem>>, vector<3x3xf32>,
    %510 = vector.extract_strided_slice %505 {offsets = [6, 0], sizes = [3, 3], strides = [1, 1]} : vector<9x3xf32> to vector<3x3xf32>
    %c16_400 = arith.constant 16 : index
    %c1_401 = arith.constant 1 : index
    %511 = vector.load %arg8[%c16_400, %c1_401] : memref<25x5xf32, #tpu.memory_space<vmem>>, vector<3x3xf32>
    tpu.vector_store %arg8[%c16_400, %c1_401], %510 {strides = array<i32>} : memref<25x5xf32, #tpu.memory_space<vmem>>, vector<3x3xf32>,
    %c0_402 = arith.constant 0 : index
    %c0_403 = arith.constant 0 : index
    %512 = vector.load %arg8[%c0_402, %c0_403] : memref<25x5xf32, #tpu.memory_space<vmem>>, vector<3x5xf32>
    %c1_404 = arith.constant 1 : index
    %c0_405 = arith.constant 0 : index
    %513 = vector.load %arg8[%c1_404, %c0_405] : memref<25x5xf32, #tpu.memory_space<vmem>>, vector<3x5xf32>
    %514 = arith.maximumf %512, %513 : vector<3x5xf32>
    %c2_406 = arith.constant 2 : index
    %c0_407 = arith.constant 0 : index
    %515 = vector.load %arg8[%c2_406, %c0_407] : memref<25x5xf32, #tpu.memory_space<vmem>>, vector<3x5xf32>
    %516 = arith.maximumf %514, %515 : vector<3x5xf32>
    %c5_408 = arith.constant 5 : index
    %c0_409 = arith.constant 0 : index
    %517 = vector.load %arg8[%c5_408, %c0_409] : memref<25x5xf32, #tpu.memory_space<vmem>>, vector<3x5xf32>
    %518 = arith.maximumf %516, %517 : vector<3x5xf32>
    %c6_410 = arith.constant 6 : index
    %c0_411 = arith.constant 0 : index
    %519 = vector.load %arg8[%c6_410, %c0_411] : memref<25x5xf32, #tpu.memory_space<vmem>>, vector<3x5xf32>
    %520 = arith.maximumf %518, %519 : vector<3x5xf32>
    %c7_412 = arith.constant 7 : index
    %c0_413 = arith.constant 0 : index
    %521 = vector.load %arg8[%c7_412, %c0_413] : memref<25x5xf32, #tpu.memory_space<vmem>>, vector<3x5xf32>
    %522 = arith.maximumf %520, %521 : vector<3x5xf32>
    %523 = vector.extract_strided_slice %522 {offsets = [0, 0], sizes = [3, 3], strides = [1, 1]} : vector<3x5xf32> to vector<3x3xf32>
    %524 = vector.extract_strided_slice %522 {offsets = [0, 1], sizes = [3, 3], strides = [1, 1]} : vector<3x5xf32> to vector<3x3xf32>
    %525 = arith.maximumf %523, %524 : vector<3x3xf32>
    %526 = vector.extract_strided_slice %522 {offsets = [0, 2], sizes = [3, 3], strides = [1, 1]} : vector<3x5xf32> to vector<3x3xf32>
    %527 = arith.maximumf %525, %526 : vector<3x3xf32>
    %c0_414 = arith.constant 0 : index
    %c0_415 = arith.constant 0 : index
    %528 = vector.load %arg9[%c0_414, %c0_415] : memref<12x3xf32, #tpu.memory_space<vmem>>, vector<3x3xf32>
    tpu.vector_store %arg9[%c0_414, %c0_415], %527 {strides = array<i32>} : memref<12x3xf32, #tpu.memory_space<vmem>>, vector<3x3xf32>,
    %c5_416 = arith.constant 5 : index
    %c0_417 = arith.constant 0 : index
    %529 = vector.load %arg8[%c5_416, %c0_417] : memref<25x5xf32, #tpu.memory_space<vmem>>, vector<3x5xf32>
    %c6_418 = arith.constant 6 : index
    %c0_419 = arith.constant 0 : index
    %530 = vector.load %arg8[%c6_418, %c0_419] : memref<25x5xf32, #tpu.memory_space<vmem>>, vector<3x5xf32>
    %531 = arith.maximumf %529, %530 : vector<3x5xf32>
    %c7_420 = arith.constant 7 : index
    %c0_421 = arith.constant 0 : index
    %532 = vector.load %arg8[%c7_420, %c0_421] : memref<25x5xf32, #tpu.memory_space<vmem>>, vector<3x5xf32>
    %533 = arith.maximumf %531, %532 : vector<3x5xf32>
    %c10_422 = arith.constant 10 : index
    %c0_423 = arith.constant 0 : index
    %534 = vector.load %arg8[%c10_422, %c0_423] : memref<25x5xf32, #tpu.memory_space<vmem>>, vector<3x5xf32>
    %535 = arith.maximumf %533, %534 : vector<3x5xf32>
    %c11_424 = arith.constant 11 : index
    %c0_425 = arith.constant 0 : index
    %536 = vector.load %arg8[%c11_424, %c0_425] : memref<25x5xf32, #tpu.memory_space<vmem>>, vector<3x5xf32>
    %537 = arith.maximumf %535, %536 : vector<3x5xf32>
    %c12_426 = arith.constant 12 : index
    %c0_427 = arith.constant 0 : index
    %538 = vector.load %arg8[%c12_426, %c0_427] : memref<25x5xf32, #tpu.memory_space<vmem>>, vector<3x5xf32>
    %539 = arith.maximumf %537, %538 : vector<3x5xf32>
    %540 = vector.extract_strided_slice %539 {offsets = [0, 0], sizes = [3, 3], strides = [1, 1]} : vector<3x5xf32> to vector<3x3xf32>
    %541 = vector.extract_strided_slice %539 {offsets = [0, 1], sizes = [3, 3], strides = [1, 1]} : vector<3x5xf32> to vector<3x3xf32>
    %542 = arith.maximumf %540, %541 : vector<3x3xf32>
    %543 = vector.extract_strided_slice %539 {offsets = [0, 2], sizes = [3, 3], strides = [1, 1]} : vector<3x5xf32> to vector<3x3xf32>
    %544 = arith.maximumf %542, %543 : vector<3x3xf32>
    %c3_428 = arith.constant 3 : index
    %c0_429 = arith.constant 0 : index
    %545 = vector.load %arg9[%c3_428, %c0_429] : memref<12x3xf32, #tpu.memory_space<vmem>>, vector<3x3xf32>
    tpu.vector_store %arg9[%c3_428, %c0_429], %544 {strides = array<i32>} : memref<12x3xf32, #tpu.memory_space<vmem>>, vector<3x3xf32>,
    %c10_430 = arith.constant 10 : index
    %c0_431 = arith.constant 0 : index
    %546 = vector.load %arg8[%c10_430, %c0_431] : memref<25x5xf32, #tpu.memory_space<vmem>>, vector<3x5xf32>
    %c11_432 = arith.constant 11 : index
    %c0_433 = arith.constant 0 : index
    %547 = vector.load %arg8[%c11_432, %c0_433] : memref<25x5xf32, #tpu.memory_space<vmem>>, vector<3x5xf32>
    %548 = arith.maximumf %546, %547 : vector<3x5xf32>
    %c12_434 = arith.constant 12 : index
    %c0_435 = arith.constant 0 : index
    %549 = vector.load %arg8[%c12_434, %c0_435] : memref<25x5xf32, #tpu.memory_space<vmem>>, vector<3x5xf32>
    %550 = arith.maximumf %548, %549 : vector<3x5xf32>
    %c15_436 = arith.constant 15 : index
    %c0_437 = arith.constant 0 : index
    %551 = vector.load %arg8[%c15_436, %c0_437] : memref<25x5xf32, #tpu.memory_space<vmem>>, vector<3x5xf32>
    %552 = arith.maximumf %550, %551 : vector<3x5xf32>
    %c16_438 = arith.constant 16 : index
    %c0_439 = arith.constant 0 : index
    %553 = vector.load %arg8[%c16_438, %c0_439] : memref<25x5xf32, #tpu.memory_space<vmem>>, vector<3x5xf32>
    %554 = arith.maximumf %552, %553 : vector<3x5xf32>
    %c17_440 = arith.constant 17 : index
    %c0_441 = arith.constant 0 : index
    %555 = vector.load %arg8[%c17_440, %c0_441] : memref<25x5xf32, #tpu.memory_space<vmem>>, vector<3x5xf32>
    %556 = arith.maximumf %554, %555 : vector<3x5xf32>
    %557 = vector.extract_strided_slice %556 {offsets = [0, 0], sizes = [3, 3], strides = [1, 1]} : vector<3x5xf32> to vector<3x3xf32>
    %558 = vector.extract_strided_slice %556 {offsets = [0, 1], sizes = [3, 3], strides = [1, 1]} : vector<3x5xf32> to vector<3x3xf32>
    %559 = arith.maximumf %557, %558 : vector<3x3xf32>
    %560 = vector.extract_strided_slice %556 {offsets = [0, 2], sizes = [3, 3], strides = [1, 1]} : vector<3x5xf32> to vector<3x3xf32>
    %561 = arith.maximumf %559, %560 : vector<3x3xf32>
    %c6_442 = arith.constant 6 : index
    %c0_443 = arith.constant 0 : index
    %562 = vector.load %arg9[%c6_442, %c0_443] : memref<12x3xf32, #tpu.memory_space<vmem>>, vector<3x3xf32>
    tpu.vector_store %arg9[%c6_442, %c0_443], %561 {strides = array<i32>} : memref<12x3xf32, #tpu.memory_space<vmem>>, vector<3x3xf32>,
    %c15_444 = arith.constant 15 : index
    %c0_445 = arith.constant 0 : index
    %563 = vector.load %arg8[%c15_444, %c0_445] : memref<25x5xf32, #tpu.memory_space<vmem>>, vector<3x5xf32>
    %c16_446 = arith.constant 16 : index
    %c0_447 = arith.constant 0 : index
    %564 = vector.load %arg8[%c16_446, %c0_447] : memref<25x5xf32, #tpu.memory_space<vmem>>, vector<3x5xf32>
    %565 = arith.maximumf %563, %564 : vector<3x5xf32>
    %c17_448 = arith.constant 17 : index
    %c0_449 = arith.constant 0 : index
    %566 = vector.load %arg8[%c17_448, %c0_449] : memref<25x5xf32, #tpu.memory_space<vmem>>, vector<3x5xf32>
    %567 = arith.maximumf %565, %566 : vector<3x5xf32>
    %c20_450 = arith.constant 20 : index
    %c0_451 = arith.constant 0 : index
    %568 = vector.load %arg8[%c20_450, %c0_451] : memref<25x5xf32, #tpu.memory_space<vmem>>, vector<3x5xf32>
    %569 = arith.maximumf %567, %568 : vector<3x5xf32>
    %c21 = arith.constant 21 : index
    %c0_452 = arith.constant 0 : index
    %570 = vector.load %arg8[%c21, %c0_452] : memref<25x5xf32, #tpu.memory_space<vmem>>, vector<3x5xf32>
    %571 = arith.maximumf %569, %570 : vector<3x5xf32>
    %c22_453 = arith.constant 22 : index
    %c0_454 = arith.constant 0 : index
    %572 = vector.load %arg8[%c22_453, %c0_454] : memref<25x5xf32, #tpu.memory_space<vmem>>, vector<3x5xf32>
    %573 = arith.maximumf %571, %572 : vector<3x5xf32>
    %574 = vector.extract_strided_slice %573 {offsets = [0, 0], sizes = [3, 3], strides = [1, 1]} : vector<3x5xf32> to vector<3x3xf32>
    %575 = vector.extract_strided_slice %573 {offsets = [0, 1], sizes = [3, 3], strides = [1, 1]} : vector<3x5xf32> to vector<3x3xf32>
    %576 = arith.maximumf %574, %575 : vector<3x3xf32>
    %577 = vector.extract_strided_slice %573 {offsets = [0, 2], sizes = [3, 3], strides = [1, 1]} : vector<3x5xf32> to vector<3x3xf32>
    %578 = arith.maximumf %576, %577 : vector<3x3xf32>
    %c9_455 = arith.constant 9 : index
    %c0_456 = arith.constant 0 : index
    %579 = vector.load %arg9[%c9_455, %c0_456] : memref<12x3xf32, #tpu.memory_space<vmem>>, vector<3x3xf32>
    tpu.vector_store %arg9[%c9_455, %c0_456], %578 {strides = array<i32>} : memref<12x3xf32, #tpu.memory_space<vmem>>, vector<3x3xf32>,
    %c0_457 = arith.constant 0 : index
    %c0_458 = arith.constant 0 : index
    %580 = vector.load %arg9[%c0_457, %c0_458] : memref<12x3xf32, #tpu.memory_space<vmem>>, vector<2x3xf32>
    %c1_459 = arith.constant 1 : index
    %c0_460 = arith.constant 0 : index
    %581 = vector.load %arg9[%c1_459, %c0_460] : memref<12x3xf32, #tpu.memory_space<vmem>>, vector<2x3xf32>
    %582 = arith.maximumf %580, %581 : vector<2x3xf32>
    %c3_461 = arith.constant 3 : index
    %c0_462 = arith.constant 0 : index
    %583 = vector.load %arg9[%c3_461, %c0_462] : memref<12x3xf32, #tpu.memory_space<vmem>>, vector<2x3xf32>
    %584 = arith.maximumf %582, %583 : vector<2x3xf32>
    %c4_463 = arith.constant 4 : index
    %c0_464 = arith.constant 0 : index
    %585 = vector.load %arg9[%c4_463, %c0_464] : memref<12x3xf32, #tpu.memory_space<vmem>>, vector<2x3xf32>
    %586 = arith.maximumf %584, %585 : vector<2x3xf32>
    %587 = vector.extract_strided_slice %586 {offsets = [0, 0], sizes = [2, 2], strides = [1, 1]} : vector<2x3xf32> to vector<2x2xf32>
    %588 = vector.extract_strided_slice %586 {offsets = [0, 1], sizes = [2, 2], strides = [1, 1]} : vector<2x3xf32> to vector<2x2xf32>
    %589 = arith.maximumf %587, %588 : vector<2x2xf32>
    %c0_465 = arith.constant 0 : index
    %c0_466 = arith.constant 0 : index
    %c0_467 = arith.constant 0 : index
    %590 = vector.load %arg2[%c0_465, %c0_466, %c0_467] : memref<1x6x2xf32, #tpu.memory_space<vmem>>, vector<1x2x2xf32>
    %591 = vector.shape_cast %590 : vector<1x2x2xf32> to vector<2x2xf32>
    %592 = vector.shape_cast %589 : vector<2x2xf32> to vector<1x2x2xf32>
    tpu.vector_store %arg2[%c0_465, %c0_466, %c0_467], %592 {strides = array<i32>} : memref<1x6x2xf32, #tpu.memory_space<vmem>>, vector<1x2x2xf32>,
    %c3_468 = arith.constant 3 : index
    %c0_469 = arith.constant 0 : index
    %593 = vector.load %arg9[%c3_468, %c0_469] : memref<12x3xf32, #tpu.memory_space<vmem>>, vector<2x3xf32>
    %c4_470 = arith.constant 4 : index
    %c0_471 = arith.constant 0 : index
    %594 = vector.load %arg9[%c4_470, %c0_471] : memref<12x3xf32, #tpu.memory_space<vmem>>, vector<2x3xf32>
    %595 = arith.maximumf %593, %594 : vector<2x3xf32>
    %c6_472 = arith.constant 6 : index
    %c0_473 = arith.constant 0 : index
    %596 = vector.load %arg9[%c6_472, %c0_473] : memref<12x3xf32, #tpu.memory_space<vmem>>, vector<2x3xf32>
    %597 = arith.maximumf %595, %596 : vector<2x3xf32>
    %c7_474 = arith.constant 7 : index
    %c0_475 = arith.constant 0 : index
    %598 = vector.load %arg9[%c7_474, %c0_475] : memref<12x3xf32, #tpu.memory_space<vmem>>, vector<2x3xf32>
    %599 = arith.maximumf %597, %598 : vector<2x3xf32>
    %600 = vector.extract_strided_slice %599 {offsets = [0, 0], sizes = [2, 2], strides = [1, 1]} : vector<2x3xf32> to vector<2x2xf32>
    %601 = vector.extract_strided_slice %599 {offsets = [0, 1], sizes = [2, 2], strides = [1, 1]} : vector<2x3xf32> to vector<2x2xf32>
    %602 = arith.maximumf %600, %601 : vector<2x2xf32>
    %c0_476 = arith.constant 0 : index
    %c2_477 = arith.constant 2 : index
    %c0_478 = arith.constant 0 : index
    %603 = vector.load %arg2[%c0_476, %c2_477, %c0_478] : memref<1x6x2xf32, #tpu.memory_space<vmem>>, vector<1x2x2xf32>
    %604 = vector.shape_cast %603 : vector<1x2x2xf32> to vector<2x2xf32>
    %605 = vector.shape_cast %602 : vector<2x2xf32> to vector<1x2x2xf32>
    tpu.vector_store %arg2[%c0_476, %c2_477, %c0_478], %605 {strides = array<i32>} : memref<1x6x2xf32, #tpu.memory_space<vmem>>, vector<1x2x2xf32>,
    %c6_479 = arith.constant 6 : index
    %c0_480 = arith.constant 0 : index
    %606 = vector.load %arg9[%c6_479, %c0_480] : memref<12x3xf32, #tpu.memory_space<vmem>>, vector<2x3xf32>
    %c7_481 = arith.constant 7 : index
    %c0_482 = arith.constant 0 : index
    %607 = vector.load %arg9[%c7_481, %c0_482] : memref<12x3xf32, #tpu.memory_space<vmem>>, vector<2x3xf32>
    %608 = arith.maximumf %606, %607 : vector<2x3xf32>
    %c9_483 = arith.constant 9 : index
    %c0_484 = arith.constant 0 : index
    %609 = vector.load %arg9[%c9_483, %c0_484] : memref<12x3xf32, #tpu.memory_space<vmem>>, vector<2x3xf32>
    %610 = arith.maximumf %608, %609 : vector<2x3xf32>
    %c10_485 = arith.constant 10 : index
    %c0_486 = arith.constant 0 : index
    %611 = vector.load %arg9[%c10_485, %c0_486] : memref<12x3xf32, #tpu.memory_space<vmem>>, vector<2x3xf32>
    %612 = arith.maximumf %610, %611 : vector<2x3xf32>
    %613 = vector.extract_strided_slice %612 {offsets = [0, 0], sizes = [2, 2], strides = [1, 1]} : vector<2x3xf32> to vector<2x2xf32>
    %614 = vector.extract_strided_slice %612 {offsets = [0, 1], sizes = [2, 2], strides = [1, 1]} : vector<2x3xf32> to vector<2x2xf32>
    %615 = arith.maximumf %613, %614 : vector<2x2xf32>
    %c0_487 = arith.constant 0 : index
    %c4_488 = arith.constant 4 : index
    %c0_489 = arith.constant 0 : index
    %616 = vector.load %arg2[%c0_487, %c4_488, %c0_489] : memref<1x6x2xf32, #tpu.memory_space<vmem>>, vector<1x2x2xf32>
    %617 = vector.shape_cast %616 : vector<1x2x2xf32> to vector<2x2xf32>
    %618 = vector.shape_cast %615 : vector<2x2xf32> to vector<1x2x2xf32>
    tpu.vector_store %arg2[%c0_487, %c4_488, %c0_489], %618 {strides = array<i32>} : memref<1x6x2xf32, #tpu.memory_space<vmem>>, vector<1x2x2xf32>,
    return
  }
  func.func @transform_0(%arg0: i32) -> (i32, i32, i32) {
    %c0_i32 = arith.constant 0 : i32
    %c0_i32_0 = arith.constant 0 : i32
    %c0_i32_1 = arith.constant 0 : i32
    return %arg0, %c0_i32, %c0_i32_0 : i32, i32, i32
  }
  func.func @transform_1(%arg0: i32) -> (i32, i32, i32) {
    %c0_i32 = arith.constant 0 : i32
    %c0_i32_0 = arith.constant 0 : i32
    %c0_i32_1 = arith.constant 0 : i32
    return %arg0, %c0_i32, %c0_i32_0 : i32, i32, i32
  }
}

</mosaic_0001>

<bundles_post_ra>
// kernel: model_forward.1
= control target key start
LH: loop header
LB: loop body
LE: loop exit
PB: predicated region body
PF: predicated region fallthrough
CT: control target
= control target key end

     0   :  { %6 = vsyncpa [#allocation10], 0  ;;  %s1722_s0 = inlined_call_operand.hbm [shape: f32[4,360,24], index: 0, kind: input, shape index: {}]   ;;  %s1723_s1 = inlined_call_operand.vmem [shape: f32[4,6,2], index: 1, kind: output, shape index: {}]  }
   0x1   :  { %8 = vsyncpa [#allocation10 + $0x1], 0  ;;  %s1408_s6 = smov 0   ;;  %s1410_s7 = smov 0  }
   0x2   :  { %s1412_s8 = smov 0   ;;  %s1414_s9 = smov 0  }
   0x3 LB: > { %s1427_s10 = sadd.s32 4294967295, %s1386_s9   ;;  %s1430_s11 = sadd.s32 1, %s1386_s9   ;;  %s1386_s9 = sphi %s1414_s9, %s1730_s9   ;;  %s1382_s8 = sphi %s1412_s8, %s1729_s8   ;;  %s1378_s7 = sphi %s1410_s7, %s1728_s7   ;;  %s1374_s6 = sphi %s1408_s6, %s1727_s6  }
   0x4   : > { %s18_s12 = ssub.s32 %s1386_s9, %s1430_s11  ;;  %s21_s13 = sadd.s32 1, %s1382_s8 }
   0x5   : > { %p19_p0 = scmp.eq.s32.totalorder %s18_s12, 0  ;;  %p28_p1 = scmp.ne.s32.totalorder %s1382_s8, %s1378_s7 }
   0x6   : > { %p29_p2 = scmp.eq.s32.totalorder %s1386_s9, 0  ;;  %p34_p3 = scmp.ne.s32.totalorder %s1378_s7, %s1374_s6 }
   0x7   : > { %s1440_s14 = scalar_select %p19_p0, %s1382_s8, %s21_s13  }
   0x8   : > { %p30_p4 = por %p29_p2, %p28_p1  ;;  %p35_p5 = scmp.eq.s32.totalorder %s1427_s10, 0 }
   0x9   : > { %p1279_p6 = scmp.lt.s32.totalorder %s1386_s9, 4  ;;  %s84_s16 = sand.u32 1, %s1382_s8  }
   0xa   : > { %p1444_p7 = por %p35_p5, %p34_p3  ;;  %s1270_s17 = smul.u32 360, %s84_s16 }
   0xb   : > { %s1271_s18 = smul.u32 5760, %s1386_s9  ;;  %p1450_p8 = pnand %p1279_p6, %p30_p4 }
   0xc   : > { %s88_s23 = scalar_lea.vmem [#allocation9], %s1270_s17  ;;  %s1462_s25 = scalar_lea.sflag [#allocation10], %s84_s16 }
   0xd   : > { %s1457_s22 = scalar_lea.hbm %s1722_s0, %s1271_s18  ;;  %s95_s24 = sshll.u32 %s88_s23, 4  ;;  %s1459_s24 = int_to_ptr.vmem [resolvable:$true] %s95_s24 }
   0xe   : > { %s1322_s26 = scalar_lea.hbm %s1457_s22, 5760  ;;  %p1324_p11 = pneg %p1450_p8 }
   0xf   : > { %p1323_p10 = scmp.ne.s32.totalorder %s1457_s22, %s1322_s26  ;;  %s1327_s29 = scalar_lea.hbm %s1722_s0, 23040 }
  0x10   : > { %p1328_p0 = scmp.lt.u32.totalorder %s1457_s22, %s1722_s0  ;;  %p1329_p1 = scmp.lt.u32.totalorder %s1327_s29, %s1322_s26 }
  0x11   : > { %p1325_p12 = pnand %p1324_p11, %p1323_p10  ;;  %p1331_p3 = scmp.lt.u32.totalorder %s1322_s26, %s1457_s22 }
  0x12   : > { %p1330_p2 = por %p1329_p1, %p1328_p0 }
  0x13   : > { %p1326_p13 = pneg %p1325_p12 }
  0x14   : > { %p1332_p4 = por %p1331_p3, %p1330_p2 }
  0x16   : > { %p1333_p5 = pnand %p1332_p4, %p1326_p13 }
  0x18   : > { %1336 = shalt.err (!%p1333_p5)
}
  0x19   : > { %s1337_s3 = scalar_lea.vmem %s1459_s24, 5760  ;;  %s1388_s4 = smov [#allocation9]  }
  0x1a   : > { %p1338_p6 = scmp.ne.s32.totalorder %s1459_s24, %s1337_s3  ;;  %s1342_s5 = sshll.u32 %s1388_s4, 4  ;;  %s1343_s5 = int_to_ptr.vmem [resolvable:$false] %s1342_s5 }
  0x1b   : > { %s1344_s6 = scalar_lea.vmem %s1343_s5, 11520  ;;  %p1345_p9 = scmp.lt.s32.totalorder %s1459_s24, %s1343_s5 }
  0x1c   : > { %p1340_p10 = pnand %p1338_p6, %p1324_p11  ;;  %p1346_p0 = scmp.lt.s32.totalorder %s1344_s6, %s1337_s3 }
  0x1e   : > { %p1341_p12 = pneg %p1340_p10  ;;  %p1347_p1 = por %p1346_p0, %p1345_p9 }
  0x20   : > { %p1348_p2 = pnand %p1347_p1, %p1341_p12 }
  0x22   : > { %1351 = shalt.err (!%p1348_p2)
}
  0x23   : > { %s1389_s12 = smov 128   ;;  %s1390_s13 = smov 8  }
  0x24   : > { %1278 = dma.hbm_to_vmem [thread:$0]  (!%p1450_p8), %s1457_s22, 5760, %s1459_s24, %s1462_s25, %s1389_s12, %s1389_s12, %s1390_s13  }
  0x25   : > { %p103_p11 = scmp.lt.s32.totalorder %s1386_s9, 5  ;;  %p1726_p13 = scmp.ge.s32.totalorder %s1386_s9, 1 }
  0x27   : > { %p104_p3 = pnand %p1726_p13, %p103_p11 }
  0x28   : > { %s109_s16 = sand.u32 (!%p104_p3), 1, %s1378_s7  }
  0x29   : > { %107 = sbr.rel (%p104_p3) target bundleno = 2220 (0x8ac), region = 24  ;;  %s110_s18 = scalar_lea.sflag (!%p104_p3), [#allocation10], %s109_s16 }
  0x2a   : > { %s1272_s17 = smul.u32 (!%p104_p3), 360, %s109_s16 }
  0x2c   : > { %s1494_s20 = scalar_lea.vmem (!%p104_p3), [#allocation9], %s1272_s17 }
  0x30   : > { %1369 = dma.done.wait (%p1444_p7), %s110_s18, 5760  }
  0x31   : > { %1371 = vsyncadd (%p1444_p7), %s110_s18, 4294961536  ;;  %v214_v0 = vld [vmem:[%s1494_s20] ss:$3 sm:$0xff]  ;;  %v1224_v1 = vld [vmem:[%s1494_s20 + $0x1] ss:$3 sm:$0xff]  ;;  %s1391_s9 = smov 127  }
  0x32   : > { %v1225_v2 = vld [vmem:[%s1494_s20 + $0x2] ss:$3 sm:$0xff]  ;;  %v217_v3 = vmax.f32 %v214_v0, %v1224_v1  ;;  %v1226_v4 = vld [vmem:[%s1494_s20 + $0x18] ss:$3 sm:$0xff]  ;;  %v1228_v12 = vld [vmem:[%s1494_s20 + $0x1a] ss:$3 sm:$0xff] }
  0x33   : > { %v1232_v6 = vld [vmem:[%s1494_s20 + $0x48] ss:$3 sm:$0xff]  ;;  %v1233_v7 = vld [vmem:[%s1494_s20 + $0x49] ss:$3 sm:$0xff]  ;;  %v1234_v8 = vld [vmem:[%s1494_s20 + $0x4a] ss:$3 sm:$0xff] }
  0x34   : > { %v220_v5 = vmax.f32 %v217_v3, %v1225_v2  ;;  %v1227_v9 = vld [vmem:[%s1494_s20 + $0x19] ss:$3 sm:$0xff]  ;;  %v254_v10 = vmax.f32 %v1232_v6, %v1233_v7  ;;  %v1235_v13 = vld [vmem:[%s1494_s20 + $0x60] ss:$3 sm:$0xff]  ;;  %v1236_v19 = vld [vmem:[%s1494_s20 + $0x61] ss:$3 sm:$0xff] }
  0x35   : > { %v1241_v15 = vld [vmem:[%s1494_s20 + $0x90] ss:$3 sm:$0xff]  ;;  %v1242_v16 = vld [vmem:[%s1494_s20 + $0x91] ss:$3 sm:$0xff]  ;;  %v1243_v17 = vld [vmem:[%s1494_s20 + $0x92] ss:$3 sm:$0xff] }
  0x36   : > { %v223_v11 = vmax.f32 %v220_v5, %v1226_v4  ;;  %v257_v14 = vmax.f32 %v254_v10, %v1234_v8  ;;  %v290_v20 = vmax.f32 %v1241_v15, %v1242_v16  ;;  %v1229_v21 = vld [vmem:[%s1494_s20 + $0x30] ss:$3 sm:$0xff]  ;;  %v1244_v24 = vld [vmem:[%s1494_s20 + $0xa8] ss:$3 sm:$0xff]  ;;  %v1250_v27 = vld [vmem:[%s1494_s20 + $0xd8] ss:$3 sm:$0xff] }
  0x37   : > { %v1237_v23 = vld [vmem:[%s1494_s20 + $0x62] ss:$3 sm:$0xff]  ;;  %v1252_v29 = vld [vmem:[%s1494_s20 + $0xda] ss:$3 sm:$0xff]  ;;  %v1231_v31 = vld [vmem:[%s1494_s20 + $0x32] ss:$3 sm:$0xff] }
  0x38   : > { %v226_v18 = vmax.f32 %v223_v11, %v1227_v9  ;;  %v260_v22 = vmax.f32 %v257_v14, %v1235_v13  ;;  %v293_v26 = vmax.f32 %v290_v20, %v1243_v17  ;;  %v1251_v28 = vld [vmem:[%s1494_s20 + $0xd9] ss:$3 sm:$0xff]  ;;  %v1230_v30 = vld [vmem:[%s1494_s20 + $0x31] ss:$3 sm:$0xff]  ;;  %v1245_v33 = vld [vmem:[%s1494_s20 + $0xa9] ss:$3 sm:$0xff] }
  0x39   : > { %v326_v34 = vmax.f32 %v1250_v27, %v1251_v28  ;;  %v1238_v36 = vld [vmem:[%s1494_s20 + $0x78] ss:$3 sm:$0xff]  ;;  %v1253_v39 = vld [vmem:[%s1494_s20 + $0xf0] ss:$3 sm:$0xff]  ;;  %v1259_v42 = vld [vmem:[%s1494_s20 + $0x120] ss:$3 sm:$0xff] }
  0x3a   : > { %v229_v25 = vmax.f32 %v226_v18, %v1228_v12  ;;  %v263_v32 = vmax.f32 %v260_v22, %v1236_v19  ;;  %v296_v37 = vmax.f32 %v293_v26, %v1244_v24  ;;  %v1246_v38 = vld [vmem:[%s1494_s20 + $0xaa] ss:$3 sm:$0xff]  ;;  %v1261_v44 = vld [vmem:[%s1494_s20 + $0x122] ss:$3 sm:$0xff]  ;;  %v1247_v51 = vld [vmem:[%s1494_s20 + $0xc0] ss:$3 sm:$0xff] }
  0x3b   : > { %v329_v41 = vmax.f32 %v326_v34, %v1252_v29  ;;  %v1260_v43 = vld [vmem:[%s1494_s20 + $0x121] ss:$3 sm:$0xff]  ;;  %v1239_v46 = vld [vmem:[%s1494_s20 + $0x79] ss:$3 sm:$0xff]  ;;  %v1254_v48 = vld [vmem:[%s1494_s20 + $0xf1] ss:$3 sm:$0xff] }
  0x3c   : > { %v232_v35 = vmax.f32 %v229_v25, %v1229_v21  ;;  %v266_v40 = vmax.f32 %v263_v32, %v1237_v23  ;;  %v299_v47 = vmax.f32 %v296_v37, %v1245_v33  ;;  %v362_v49 = vmax.f32 %v1259_v42, %v1260_v43  ;;  %v1262_v53 = vld [vmem:[%s1494_s20 + $0x138] ss:$3 sm:$0xff]  ;;  %v1240_v55 = vld [vmem:[%s1494_s20 + $0x7a] ss:$3 sm:$0xff]  ;;  %v1263_v62 = vld [vmem:[%s1494_s20 + $0x139] ss:$3 sm:$0xff] }
  0x3d   : > { %v332_v52 = vmax.f32 %v329_v41, %v1253_v39  ;;  %v1255_v57 = vld [vmem:[%s1494_s20 + $0xf2] ss:$3 sm:$0xff]  ;;  %v1256_v0 = vld [vmem:[%s1494_s20 + $0x108] ss:$3 sm:$0xff]  ;;  %v1265_v10 = vld [vmem:[%s1494_s20 + $0x150] ss:$3 sm:$0xff] }
  0x3e   : > { %v235_v45 = vmax.f32 %v232_v35, %v1230_v30  ;;  %v269_v50 = vmax.f32 %v266_v40, %v1238_v36  ;;  %v302_v56 = vmax.f32 %v299_v47, %v1246_v38  ;;  %v365_v58 = vmax.f32 %v362_v49, %v1261_v44  ;;  %v1248_v60 = vld [vmem:[%s1494_s20 + $0xc1] ss:$3 sm:$0xff]  ;;  %v1249_v3 = vld [vmem:[%s1494_s20 + $0xc2] ss:$3 sm:$0xff]  ;;  %v1264_v5 = vld [vmem:[%s1494_s20 + $0x13a] ss:$3 sm:$0xff] }
  0x3f   : > { %v335_v61 = vmax.f32 %v332_v52, %v1254_v48  ;;  %v1257_v7 = vld [vmem:[%s1494_s20 + $0x109] ss:$3 sm:$0xff]  ;;  %s1392_s15 = smov 126   ;;  %v1258_v14 = vld [vmem:[%s1494_s20 + $0x10a] ss:$3 sm:$0xff]  ;;  %vm248_vm0 = vcmask 179200  }
  0x40   : > { %v238_v54 = vmax.f32 %v235_v45, %v1231_v31  ;;  %v272_v59 = vmax.f32 %v269_v50, %v1239_v46  ;;  %v305_v63 = vmax.f32 %v302_v56, %v1247_v51  ;;  %v368_v1 = vmax.f32 %v365_v58, %v1262_v53  ;;  %v1266_v15 = vld [vmem:[%s1494_s20 + $0x151] ss:$3 sm:$0xff]  ;;  %v1267_v19 = vld [vmem:[%s1494_s20 + $0x152] ss:$3 sm:$0xff]  ;;  %s1394_s19 = smov 2   ;;  %s1395_s21 = smov 125  }
  0x41   : > { %v338_v4 = vmax.f32 %v335_v61, %v1255_v57  ;;  %vm431_vm1 = vcmask 326656   ;;  %vm434_vm2 = vcmask 324608   ;;  %vm142_vm3 = vcmask 91136   ;;  %s1396_s22 = smov 1   ;;  %s1397_s23 = smov 124  }
  0x42   : > { %240 = vrot.lane.b32.xlu0 %v238_v54, %s1391_s9  ;;  %v275_v2 = vmax.f32 %v272_v59, %v1240_v55  ;;  %v308_v6 = vmax.f32 %v305_v63, %v1248_v60  ;;  %v371_v8 = vmax.f32 %v368_v1, %v1263_v62  ;;  %vm153_vm4 = vcmask 15360   ;;  %p131_p7 = scmp.lt.s32.totalorder %s1427_s10, 3 }
  0x43   : > { %v341_v9 = vmax.f32 %v338_v4, %v1256_v0  ;;  %vm163_vm5 = vcmask 97360   ;;  %v1393_v50 = vmov -inf   ;;  %vm135_vm6 = vcmask 97280  }
  0x44   : > { %277 = vrot.lane.b32.xlu1 %v275_v2, %s1391_s9  ;;  %v311_v11 = vmax.f32 %v308_v6, %v1249_v3  ;;  %v374_v12 = vmax.f32 %v371_v8, %v1264_v5  ;;  %143 = vst.msk [vmem:[#allocation4 + $0x18] sm:$0x3] %vm142_vm3, %v1393_v50  ;;  %144 = vst.msk [vmem:[#allocation4 + $0x22] sm:$0x3] %vm142_vm3, %v1393_v50  ;;  %vm161_vm7 = vcmask 11264   ;;  %vm171_vm8 = vcmask 93264  }
  0x45   : > { %v344_v13 = vmax.f32 %v341_v9, %v1257_v7  ;;  %145 = vst.msk [vmem:[#allocation4 + $0x24] sm:$0x3] %vm142_vm3, %v1393_v50  ;;  %146 = vst.msk [vmem:[#allocation4 + $0x2e] sm:$0x3] %vm142_vm3, %v1393_v50  ;;  %vm140_vm9 = vcmask 93184   ;;  %vm473_vm10 = vcmask 80912  }
  0x46   : > { %244 = vrot.lane.b32.xlu0 %v238_v54, %s1392_s15  ;;  %v377_v16 = vmax.f32 %v374_v12, %v1265_v10  ;;  %147 = vst.msk [vmem:[#allocation4 + $0x30] sm:$0x3] %vm142_vm3, %v1393_v50  ;;  %148 = vst.msk [vmem:[#allocation4 + $0x3a] sm:$0x3] %vm142_vm3, %v1393_v50  ;;  %vm554_vm11 = vcmask 69632   ;;  %vm696_vm12 = vcmask 121856  }
  0x47   : > { %v347_v17 = vmax.f32 %v344_v13, %v1258_v14  ;;  %149 = vst.msk [vmem:[#allocation4 + $0x3c] sm:$0x3] %vm142_vm3, %v1393_v50  ;;  %150 = vst.msk [vmem:[#allocation4 + $0x46] sm:$0x3] %vm142_vm3, %v1393_v50  ;;  %vm698_vm13 = vcmask 114688   ;;  %vm173_vm14 = vcmask 7168  }
  0x48   : > { %281 = vrot.lane.b32.xlu1 %v275_v2, %s1392_s15  ;;  %v380_v18 = vmax.f32 %v377_v16, %v1266_v15  ;;  %151 = vst.msk [vmem:[#allocation4 + $0x48] sm:$0x3] %vm142_vm3, %v1393_v50  ;;  %152 = vst.msk [vmem:[#allocation4 + $0x52] sm:$0x3] %vm142_vm3, %v1393_v50  ;;  %vm177_vm15 = vcmask 56368   ;;  %vm737_vm3 = vcmask 45064  }
  0x49   : > { %154 = vst.msk [vmem:[#allocation4 + $0x18] sm:$0xff] %vm153_vm4, %v1393_v50  ;;  %155 = vst.msk [vmem:[#allocation4 + $0x20] sm:$0xff] %vm153_vm4, %v1393_v50  ;;  %s1732_s10 = smov (!%p131_p7, %s1427_s10), 3 }
  0x4a   : > { %313 = vrot.lane.b32.xlu0 %v311_v11, %s1391_s9  ;;  %v383_v20 = vmax.f32 %v380_v18, %v1267_v19  ;;  %157 = vst.msk [vmem:[#allocation4 + $0x30] sm:$0xff] %vm153_vm4, %v1393_v50  ;;  %158 = vst.msk [vmem:[#allocation4 + $0x38] sm:$0xff] %vm153_vm4, %v1393_v50  ;;  %s1223_s24 = sshll.u32 %s1732_s10, 3 }
  0x4b   : > { %156 = vst.msk [vmem:[#allocation4 + $0x28] sm:$0xff] %vm153_vm4, %v1393_v50  ;;  %159 = vst.msk [vmem:[#allocation4 + $0x40] sm:$0xff] %vm153_vm4, %v1393_v50  ;;  %s134_s27 = scalar_lea.vmem %s1723_s1, %s1223_s24 }
  0x4c   : > { %317 = vrot.lane.b32.xlu1 %v311_v11, %s1392_s15  ;;  %160 = vst.msk [vmem:[#allocation4 + $0x48] sm:$0xff] %vm153_vm4, %v1393_v50 }
  0x4d   : > { %164 = vst.msk [vmem:[#allocation4 + $0x18] sm:$0xff] %vm163_vm5, %v1393_v50  ;;  %165 = vst.msk [vmem:[#allocation4 + $0x20] sm:$0xff] %vm163_vm5, %v1393_v50 }
  0x4e   : > { %349 = vrot.lane.b32.xlu0 %v347_v17, %s1391_s9  ;;  %167 = vst.msk [vmem:[#allocation4 + $0x30] sm:$0xff] %vm163_vm5, %v1393_v50  ;;  %168 = vst.msk [vmem:[#allocation4 + $0x38] sm:$0xff] %vm163_vm5, %v1393_v50 }
  0x4f   : > { %166 = vst.msk [vmem:[#allocation4 + $0x28] sm:$0xff] %vm163_vm5, %v1393_v50  ;;  %169 = vst.msk [vmem:[#allocation4 + $0x40] sm:$0xff] %vm163_vm5, %v1393_v50 }
  0x50   : > { %353 = vrot.lane.b32.xlu1 %v347_v17, %s1392_s15  ;;  %170 = vst.msk [vmem:[#allocation4 + $0x48] sm:$0xff] %vm163_vm5, %v1393_v50  ;;  %vm743_vm5 = vcmask 48141  }
  0x51   : > { %136 = vst.msk [vmem:[#allocation4] sm:$0xff] %vm135_vm6, %v1393_v50  ;;  %137 = vst.msk [vmem:[#allocation4 + $0x8] sm:$0xff] %vm135_vm6, %v1393_v50 }
  0x52   : > { %385 = vrot.lane.b32.xlu0 %v383_v20, %s1391_s9  ;;  %138 = vst.msk [vmem:[#allocation4 + $0x10] sm:$0xff] %vm135_vm6, %v1393_v50  ;;  %139 = vst.msk [vmem:[#allocation4 + $0x54] sm:$0xff] %vm135_vm6, %v1393_v50  ;;  %vm745_vm6 = vcmask 41992  }
  0x53   : > { %162 = vst.msk [vmem:[#allocation4 + $0x50] sm:$0xf] %vm161_vm7, %v1393_v50  ;;  %vm747_vm7 = vcmask 47114  }
  0x54   : > { %389 = vrot.lane.b32.xlu1 %v383_v20, %s1392_s15  ;;  %172 = vst.msk [vmem:[#allocation4 + $0x50] sm:$0xf] %vm171_vm8, %v1393_v50  ;;  %vm184_vm8 = vcmask 66560  }
  0x55   : > { %141 = vst.msk [vmem:[#allocation4 + $0x5c] sm:$0xf] %vm140_vm9, %v1393_v50  ;;  %vm194_vm9 = vcmask 72760  }
  0x56   : > { %174 = vst.msk [vmem:[#allocation5] sm:$0xff] %vm173_vm14, %v1393_v50 }
  0x57   : > { %178 = vst.msk [vmem:[#allocation5] sm:$0xff] %vm177_vm15, %v1393_v50  ;;  %vm198_vm15 = vcmask 36864  }
  0x58   : > { %v495_v56 = vld [vmem:[#allocation4] ss:$2 sm:$0x1f]  ;;  %v497_v57 = vld [vmem:[#allocation4 + $0x1] ss:$2 sm:$0x1f] }
  0x59   : > { %v498_v58 = vmax.f32 %v495_v56, %v497_v57  ;;  %v500_v59 = vld [vmem:[#allocation4 + $0x2] ss:$2 sm:$0x1f]  ;;  %v503_v61 = vld [vmem:[#allocation4 + $0x3] ss:$2 sm:$0x1f] }
  0x5a   : > { %v506_v63 = vld [vmem:[#allocation4 + $0xc] ss:$2 sm:$0x1f]  ;;  %v509_v1 = vld [vmem:[#allocation4 + $0xd] ss:$2 sm:$0x1f] }
  0x5b   : > { %v501_v60 = vmax.f32 %v498_v58, %v500_v59  ;;  %v512_v3 = vld [vmem:[#allocation4 + $0xe] ss:$2 sm:$0x1f]  ;;  %v515_v6 = vld [vmem:[#allocation4 + $0xf] ss:$2 sm:$0x1f] }
  0x5c   : > { %185 = vst.msk [vmem:[#allocation6 + $0x8] sm:$0x3] %vm184_vm8, %v1393_v50  ;;  %186 = vst.msk [vmem:[#allocation6 + $0xe] sm:$0x3] %vm184_vm8, %v1393_v50 }
  0x5d   : > { %v504_v62 = vmax.f32 %v501_v60, %v503_v61  ;;  %187 = vst.msk [vmem:[#allocation6 + $0x10] sm:$0x3] %vm184_vm8, %v1393_v50  ;;  %188 = vst.msk [vmem:[#allocation6 + $0x16] sm:$0x3] %vm184_vm8, %v1393_v50 }
  0x5e   : > { %189 = vst.msk [vmem:[#allocation6 + $0x18] sm:$0x3] %vm184_vm8, %v1393_v50  ;;  %190 = vst.msk [vmem:[#allocation6 + $0x1e] sm:$0x3] %vm184_vm8, %v1393_v50 }
  0x5f   : > { %v507_v0 = vmax.f32 %v504_v62, %v506_v63  ;;  %191 = vst.msk [vmem:[#allocation6 + $0x8] sm:$0xff] %vm153_vm4, %v1393_v50  ;;  %192 = vst.msk [vmem:[#allocation6 + $0x10] sm:$0xff] %vm153_vm4, %v1393_v50 }
  0x60   : > { %193 = vst.msk [vmem:[#allocation6 + $0x18] sm:$0xff] %vm153_vm4, %v1393_v50  ;;  %vm765_vm4 = vcmask 52240  }
  0x61   : > { %195 = vst.msk [vmem:[#allocation6 + $0x8] sm:$0xff] %vm194_vm9, %v1393_v50  ;;  %196 = vst.msk [vmem:[#allocation6 + $0x10] sm:$0xff] %vm194_vm9, %v1393_v50 }
  0x62   : > { %197 = vst.msk [vmem:[#allocation6 + $0x18] sm:$0xff] %vm194_vm9, %v1393_v50 }
  0x63   : > { %199 = vst.msk [vmem:[#allocation7] sm:$0x1f] %vm198_vm15, %v1393_v50  ;;  %200 = vst.msk [vmem:[#allocation7 + $0x14] sm:$0x1f] %vm198_vm15, %v1393_v50 }
  0xb4   : > { %v241_v21 = vpop.permute.xlu0 %240 }
  0xb5   : > { %v243_v22 = vmax.f32 %v238_v54, %v241_v21 }
  0xb6   : > { %v278_v23 = vpop.permute.xlu1 %277 }
  0xb7   : > { %v280_v24 = vmax.f32 %v275_v2, %v278_v23  ;;  %v510_v2 = vmax.f32 %v507_v0, %v509_v1 }
  0xb8   : > { %v245_v25 = vpop.permute.xlu0 %244 }
  0xb9   : > { %v247_v26 = vmax.f32 %v243_v22, %v245_v25  ;;  %v513_v5 = vmax.f32 %v510_v2, %v512_v3 }
  0xba   : > { %v282_v27 = vpop.permute.xlu1 %281 }
  0xbb   : > { %249 = vst.msk [vmem:[#allocation2] sm:$0xff] %vm248_vm0, %v247_v26  ;;  %v284_v28 = vmax.f32 %v280_v24, %v282_v27  ;;  %v516_v7 = vmax.f32 %v513_v5, %v515_v6 }
  0xbc   : > { %v314_v29 = vpop.permute.xlu0 %313 }
  0xbd   : > { %v316_v30 = vmax.f32 %v311_v11, %v314_v29  ;;  %285 = vst.msk [vmem:[#allocation2 + $0x8] sm:$0xff] %vm248_vm0, %v284_v28 }
  0xbe   : > { %v318_v31 = vpop.permute.xlu1 %317 }
  0xbf   : > { %v320_v32 = vmax.f32 %v316_v30, %v318_v31 }
  0xc0   : > { %v350_v33 = vpop.permute.xlu0 %349 }
  0xc1   : > { %v352_v34 = vmax.f32 %v347_v17, %v350_v33  ;;  %321 = vst.msk [vmem:[#allocation2 + $0x10] sm:$0xff] %vm248_vm0, %v320_v32 }
  0xc2   : > { %v394_v35 = vld [vmem:[#allocation2] sm:$0xff]  ;;  %v354_v36 = vpop.permute.xlu1 %353 }
  0xc3   : > { %399 = vxpose.xlu0.b32.start [1/5] (short) (narrow) %v394_v35, 24  ;;  %v356_v37 = vmax.f32 %v352_v34, %v354_v36 }
  0xc4   : > { %v386_v38 = vpop.permute.xlu0 %385  ;;  %v395_v40 = vld [vmem:[#allocation2 + $0x8] sm:$0xff] }
  0xc5   : > { %v388_v39 = vmax.f32 %v383_v20, %v386_v38  ;;  %357 = vst.msk [vmem:[#allocation2 + $0x18] sm:$0xff] %vm248_vm0, %v356_v37 }
  0xc6   : > { %v390_v41 = vpop.permute.xlu1 %389 }
  0xc7   : > { %400 = vxpose.xlu0.b32.cont [2/5] (short) (narrow) %v395_v40, 24  ;;  %v392_v42 = vmax.f32 %v388_v39, %v390_v41 }
  0xc8   : > { %v396_v43 = vld [vmem:[#allocation2 + $0x10] sm:$0xff] }
  0xc9   : > { %393 = vst.msk [vmem:[#allocation2 + $0x20] sm:$0xff] %vm248_vm0, %v392_v42  ;;  %vm201_vm0 = vcmask 32768  }
  0xca   : > { %202 = vst.msk [vmem:[#allocation7 + $0x5] sm:$0x1] %vm201_vm0, %v1393_v50  ;;  %203 = vst.msk [vmem:[#allocation7 + $0x9] sm:$0x1] %vm201_vm0, %v1393_v50 }
  0xcb   : > { %401 = vxpose.xlu0.b32.cont [3/5] (short) (narrow) %v396_v43, 24  ;;  %204 = vst.msk [vmem:[#allocation7 + $0xa] sm:$0x1] %vm201_vm0, %v1393_v50  ;;  %205 = vst.msk [vmem:[#allocation7 + $0xe] sm:$0x1] %vm201_vm0, %v1393_v50 }
  0xcc   : > { %v397_v44 = vld [vmem:[#allocation2 + $0x18] sm:$0xff]  ;;  %206 = vst.msk [vmem:[#allocation7 + $0xf] sm:$0x1] %vm201_vm0, %v1393_v50  ;;  %207 = vst.msk [vmem:[#allocation7 + $0x13] sm:$0x1] %vm201_vm0, %v1393_v50  ;;  %vm1018_vm0 = vcmask 29707  }
  0xcd   : > { %208 = vst.msk [vmem:[#allocation7 + $0x5] sm:$0xff] %vm173_vm14, %v1393_v50  ;;  %vm212_vm14 = vcmask 38944  }
  0xcf   : > { %402 = vxpose.xlu0.b32.cont [4/5] (short) (narrow) %v397_v44, 24 }
  0xd0   : > { %v398_v45 = vld [vmem:[#allocation2 + $0x20] sm:$0xff] }
  0xd3   : > { %403 = vxpose.xlu0.b32.end [5/5] (short) (narrow) %v398_v45, 24 }
 0x143   : > { %v415_v46 = vpop.trf.xlu0 }
 0x144   : > { %432 = vst.msk [vmem:[#allocation3] sm:$0xff] %vm431_vm1, %v415_v46 }
 0x147   : > { %v416_v47 = vpop.trf.xlu0 }
 0x148   : > { %433 = vst.msk [vmem:[#allocation3 + $0x8] sm:$0xff] %vm431_vm1, %v416_v47  ;;  %vm175_vm1 = vcmask 6144  }
 0x149   : > { %176 = vst.msk [vmem:[#allocation5 + $0x8] sm:$0x7f] %vm175_vm1, %v1393_v50  ;;  %209 = vst.msk [vmem:[#allocation7 + $0xd] sm:$0x7f] %vm175_vm1, %v1393_v50  ;;  %vm1024_vm1 = vcmask 31758  }
 0x14a   : > { %213 = vst.msk [vmem:[#allocation7 + $0xd] sm:$0x7f] %vm212_vm14, %v1393_v50 }
 0x14b   : > { %v417_v48 = vpop.trf.xlu0 }
 0x14c   : > { %435 = vst.msk [vmem:[#allocation3 + $0x10] sm:$0x3f] %vm434_vm2, %v417_v48  ;;  %vm179_vm2 = vcmask 55344  }
 0x14d   : > { %180 = vst.msk [vmem:[#allocation5 + $0x8] sm:$0x7f] %vm179_vm2, %v1393_v50  ;;  %vm1026_vm2 = vcmask 24584  }
 0x153   : > { %v436_v49 = vld [vmem:[#allocation3] ss:$3 sm:$0xff] }
 0x154   : > { %437 = vxpose.xlu1.b32.start.end [1/1] (short) (narrow) %v436_v49, 40 }
 0x1d4   : > { %v453_v51 = vpop.trf.xlu1 }
 0x1d5   : > { %470 = vrot.lane.b32.xlu1 %v453_v51, %s1394_s19 }
 0x1d8   : > { %v454_v52 = vpop.trf.xlu1 }
 0x1dc   : > { %v455_v53 = vpop.trf.xlu1 }
 0x1dd   : > { %481 = vrot.lane.b32.xlu0 %v455_v53, %s1394_s19 }
 0x1e0   : > { %v456_v54 = vpop.trf.xlu1 }
 0x1e1   : > { %476 = vrot.lane.b32.xlu0 %v454_v52, %s1394_s19  ;;  %486 = vrot.lane.b32.xlu1 %v456_v54, %s1394_s19 }
 0x1e4   : > { %v457_v55 = vpop.trf.xlu1 }
 0x1e5   : > { %491 = vrot.lane.b32.xlu0 %v457_v55, %s1394_s19 }
 0x247   : > { %v471_v4 = vpop.permute.xlu1 %470 }
 0x248   : > { %474 = vst.msk [vmem:[#allocation4 + $0x1a] sm:$0xff] %vm473_vm10, %v471_v4 }
 0x24f   : > { %v482_v8 = vpop.permute.xlu0 %481  ;;  %v518_v9 = vld [vmem:[#allocation4 + $0x18] ss:$2 sm:$0x1f]  ;;  %v521_v11 = vld [vmem:[#allocation4 + $0x19] ss:$2 sm:$0x1f] }
 0x250   : > { %484 = vst.msk [vmem:[#allocation4 + $0x32] sm:$0xff] %vm473_vm10, %v482_v8  ;;  %v519_v10 = vmax.f32 %v516_v7, %v518_v9  ;;  %v556_v12 = vld [vmem:[#allocation4 + $0x18] ss:$2 sm:$0x1f] }
 0x251   : > { %v557_v13 = vld [vmem:[#allocation4 + $0x19] ss:$2 sm:$0x1f]  ;;  %v524_v18 = vld [vmem:[#allocation4 + $0x1a] ss:$2 sm:$0x1f] }
 0x252   : > { %v522_v14 = vmax.f32 %v519_v10, %v521_v11  ;;  %v558_v17 = vmax.f32 %v556_v12, %v557_v13  ;;  %v559_v21 = vld [vmem:[#allocation4 + $0x1a] ss:$2 sm:$0x1f]  ;;  %v527_v22 = vld [vmem:[#allocation4 + $0x1b] ss:$2 sm:$0x1f] }
 0x253   : > { %v477_v15 = vpop.permute.xlu0 %476  ;;  %v487_v16 = vpop.permute.xlu1 %486  ;;  %v561_v27 = vld [vmem:[#allocation4 + $0x1b] ss:$2 sm:$0x1f]  ;;  %v637_v11 = vld [vmem:[#allocation4 + $0x54] ss:$2 sm:$0x1f] }
 0x254   : > { %479 = vst.msk [vmem:[#allocation4 + $0x26] sm:$0xff] %vm473_vm10, %v477_v15  ;;  %489 = vst.msk [vmem:[#allocation4 + $0x3e] sm:$0xff] %vm473_vm10, %v487_v16  ;;  %v525_v19 = vmax.f32 %v522_v14, %v524_v18  ;;  %v560_v23 = vmax.f32 %v558_v17, %v559_v21  ;;  %v640_v17 = vld [vmem:[#allocation4 + $0x55] ss:$2 sm:$0x1f] }
 0x255   : > { %v643_v21 = vld [vmem:[#allocation4 + $0x56] ss:$2 sm:$0x1f] }
 0x256   : > { %v528_v26 = vmax.f32 %v525_v19, %v527_v22  ;;  %v562_v32 = vmax.f32 %v560_v23, %v561_v27 }
 0x257   : > { %v492_v20 = vpop.permute.xlu0 %491  ;;  %v609_v24 = vld [vmem:[#allocation4 + $0x30] ss:$2 sm:$0x1f]  ;;  %v610_v25 = vld [vmem:[#allocation4 + $0x31] ss:$2 sm:$0x1f] }
 0x258   : > { %494 = vst.msk [vmem:[#allocation4 + $0x4a] sm:$0xff] %vm473_vm10, %v492_v20  ;;  %v611_v28 = vmax.f32 %v609_v24, %v610_v25  ;;  %v612_v30 = vld [vmem:[#allocation4 + $0x32] ss:$2 sm:$0x1f]  ;;  %vm181_vm10 = vcmask 72704  }
 0x259   : > { %v614_v34 = vld [vmem:[#allocation4 + $0x33] ss:$2 sm:$0x1f]  ;;  %v572_v56 = vld [vmem:[#allocation4 + $0x30] ss:$2 sm:$0x1f] }
 0x25a   : > { %v613_v33 = vmax.f32 %v611_v28, %v612_v30  ;;  %v575_v58 = vld [vmem:[#allocation4 + $0x31] ss:$2 sm:$0x1f]  ;;  %v578_v0 = vld [vmem:[#allocation4 + $0x32] ss:$2 sm:$0x1f] }
 0x25b   : > { %v530_v29 = vld [vmem:[#allocation4 + $0x24] ss:$2 sm:$0x1f]  ;;  %v533_v35 = vld [vmem:[#allocation4 + $0x25] ss:$2 sm:$0x1f] }
 0x25c   : > { %v531_v31 = vmax.f32 %v528_v26, %v530_v29  ;;  %v563_v36 = vld [vmem:[#allocation4 + $0x24] ss:$2 sm:$0x1f]  ;;  %v615_v39 = vmax.f32 %v613_v33, %v614_v34  ;;  %v565_v41 = vld [vmem:[#allocation4 + $0x25] ss:$2 sm:$0x1f] }
 0x25d   : > { %v564_v38 = vmax.f32 %v562_v32, %v563_v36  ;;  %v536_v40 = vld [vmem:[#allocation4 + $0x26] ss:$2 sm:$0x1f]  ;;  %v539_v43 = vld [vmem:[#allocation4 + $0x27] ss:$2 sm:$0x1f] }
 0x25e   : > { %v534_v37 = vmax.f32 %v531_v31, %v533_v35  ;;  %v567_v45 = vld [vmem:[#allocation4 + $0x26] ss:$2 sm:$0x1f]  ;;  %v616_v46 = vld [vmem:[#allocation4 + $0x3c] ss:$2 sm:$0x1f] }
 0x25f   : > { %v566_v44 = vmax.f32 %v564_v38, %v565_v41  ;;  %v618_v47 = vld [vmem:[#allocation4 + $0x3d] ss:$2 sm:$0x1f]  ;;  %v617_v51 = vmax.f32 %v615_v39, %v616_v46  ;;  %v569_v52 = vld [vmem:[#allocation4 + $0x27] ss:$2 sm:$0x1f] }
 0x260   : > { %v537_v42 = vmax.f32 %v534_v37, %v536_v40  ;;  %v620_v53 = vld [vmem:[#allocation4 + $0x3e] ss:$2 sm:$0x1f]  ;;  %v622_v60 = vld [vmem:[#allocation4 + $0x3f] ss:$2 sm:$0x1f] }
 0x261   : > { %v568_v49 = vmax.f32 %v566_v44, %v567_v45  ;;  %v619_v55 = vmax.f32 %v617_v51, %v618_v47  ;;  %v625_v61 = vld [vmem:[#allocation4 + $0x48] ss:$2 sm:$0x1f]  ;;  %v628_v1 = vld [vmem:[#allocation4 + $0x49] ss:$2 sm:$0x1f] }
 0x262   : > { %v540_v48 = vmax.f32 %v537_v42, %v539_v43  ;;  %v581_v4 = vld [vmem:[#allocation4 + $0x33] ss:$2 sm:$0x1f]  ;;  %v631_v5 = vld [vmem:[#allocation4 + $0x4a] ss:$2 sm:$0x1f] }
 0x263   : > { %v570_v54 = vmax.f32 %v568_v49, %v569_v52  ;;  %v621_v59 = vmax.f32 %v619_v55, %v620_v53  ;;  %v584_v8 = vld [vmem:[#allocation4 + $0x3c] ss:$2 sm:$0x1f]  ;;  %v587_v12 = vld [vmem:[#allocation4 + $0x3d] ss:$2 sm:$0x1f] }
 0x264   : > { %550 = vrot.lane.b32.xlu0 %v540_v48, %s1395_s21  ;;  %542 = vrot.lane.b32.xlu1 %v540_v48, %s1391_s9  ;;  %v634_v13 = vld [vmem:[#allocation4 + $0x4b] ss:$2 sm:$0x1f]  ;;  %v590_v16 = vld [vmem:[#allocation4 + $0x3e] ss:$2 sm:$0x1f] }
 0x265   : > { %v573_v57 = vmax.f32 %v570_v54, %v572_v56  ;;  %v623_v63 = vmax.f32 %v621_v59, %v622_v60  ;;  %v593_v20 = vld [vmem:[#allocation4 + $0x3f] ss:$2 sm:$0x1f]  ;;  %182 = vst.msk [vmem:[#allocation6] sm:$0xff] %vm181_vm10, %v1393_v50  ;;  %183 = vst.msk [vmem:[#allocation6 + $0x20] sm:$0xff] %vm181_vm10, %v1393_v50 }
 0x266   : > { %v646_v24 = vld [vmem:[#allocation4 + $0x57] ss:$2 sm:$0x1f] }
 0x267   : > { %v576_v62 = vmax.f32 %v573_v57, %v575_v58  ;;  %v626_v3 = vmax.f32 %v623_v63, %v625_v61 }
 0x268   : > { %546 = vrot.lane.b32.xlu1 %v540_v48, %s1392_s15 }
 0x269   : > { %v579_v2 = vmax.f32 %v576_v62, %v578_v0  ;;  %v629_v7 = vmax.f32 %v626_v3, %v628_v1 }
 0x26b   : > { %v582_v6 = vmax.f32 %v579_v2, %v581_v4  ;;  %v632_v10 = vmax.f32 %v629_v7, %v631_v5 }
 0x26d   : > { %v585_v9 = vmax.f32 %v582_v6, %v584_v8  ;;  %v635_v15 = vmax.f32 %v632_v10, %v634_v13  ;;  %v803_v13 = vld [vmem:[#allocation6 + $0x1] ss:$2 sm:$0x7] }
 0x26f   : > { %v588_v14 = vmax.f32 %v585_v9, %v587_v12  ;;  %v638_v19 = vmax.f32 %v635_v15, %v637_v11  ;;  %v801_v12 = vld [vmem:[#allocation6] ss:$2 sm:$0x7] }
 0x270   : > { %v806_v15 = vld [vmem:[#allocation6 + $0x2] ss:$2 sm:$0x7] }
 0x271   : > { %v591_v18 = vmax.f32 %v588_v14, %v590_v16  ;;  %v641_v23 = vmax.f32 %v638_v19, %v640_v17  ;;  %v804_v14 = vmax.f32 %v801_v12, %v803_v13 }
 0x273   : > { %v594_v22 = vmax.f32 %v591_v18, %v593_v20  ;;  %v644_v25 = vmax.f32 %v641_v23, %v643_v21  ;;  %v807_v17 = vmax.f32 %v804_v14, %v806_v15  ;;  %v809_v18 = vld [vmem:[#allocation6 + $0x3] ss:$2 sm:$0x7] }
 0x274   : > { %v918_v14 = vld [vmem:[#allocation6 + $0x21] ss:$2 sm:$0x7] }
 0x275   : > { %596 = vrot.lane.b32.xlu0 %v594_v22, %s1391_s9  ;;  %604 = vrot.lane.b32.xlu1 %v594_v22, %s1395_s21  ;;  %v647_v26 = vmax.f32 %v644_v25, %v646_v24  ;;  %v810_v20 = vmax.f32 %v807_v17, %v809_v18  ;;  %v924_v18 = vld [vmem:[#allocation6 + $0x23] ss:$2 sm:$0x7] }
 0x279   : > { %600 = vrot.lane.b32.xlu0 %v594_v22, %s1392_s15  ;;  %649 = vrot.lane.b32.xlu1 %v647_v26, %s1391_s9 }
 0x27d   : > { %653 = vrot.lane.b32.xlu0 %v647_v26, %s1392_s15  ;;  %657 = vrot.lane.b32.xlu1 %v647_v26, %s1395_s21 }
 0x2d6   : > { %v543_v27 = vpop.permute.xlu1 %542  ;;  %v551_v31 = vpop.permute.xlu0 %550 }
 0x2d7   : > { %v545_v28 = vmax.f32 %v540_v48, %v543_v27 }
 0x2da   : > { %v547_v29 = vpop.permute.xlu1 %546 }
 0x2db   : > { %v549_v30 = vmax.f32 %v545_v28, %v547_v29 }
 0x2dd   : > { %v553_v32 = vmax.f32 %v549_v30, %v551_v31 }
 0x2df   : > { %555 = vst.msk [vmem:[#allocation2] sm:$0x1f] %vm554_vm11, %v553_v32 }
 0x2e7   : > { %v597_v33 = vpop.permute.xlu0 %596  ;;  %v605_v34 = vpop.permute.xlu1 %604 }
 0x2e8   : > { %v599_v35 = vmax.f32 %v594_v22, %v597_v33 }
 0x2eb   : > { %v601_v36 = vpop.permute.xlu0 %600  ;;  %v650_v37 = vpop.permute.xlu1 %649 }
 0x2ec   : > { %v603_v38 = vmax.f32 %v599_v35, %v601_v36  ;;  %v652_v40 = vmax.f32 %v647_v26, %v650_v37 }
 0x2ee   : > { %v607_v39 = vmax.f32 %v603_v38, %v605_v34 }
 0x2ef   : > { %v654_v41 = vpop.permute.xlu0 %653  ;;  %v658_v43 = vpop.permute.xlu1 %657 }
 0x2f0   : > { %608 = vst.msk [vmem:[#allocation2 + $0x5] sm:$0x1f] %vm554_vm11, %v607_v39  ;;  %v656_v42 = vmax.f32 %v652_v40, %v654_v41 }
 0x2f2   : > { %v660_v44 = vmax.f32 %v656_v42, %v658_v43 }
 0x2f4   : > { %661 = vst.msk [vmem:[#allocation2 + $0xa] sm:$0x1f] %vm554_vm11, %v660_v44 }
 0x2f7   : > { %v662_v45 = vld [vmem:[#allocation2] sm:$0xff] }
 0x2f8   : > { %664 = vxpose.xlu0.b32.start [1/2] (short) (narrow) %v662_v45, 16 }
 0x2fb   : > { %v663_v46 = vld [vmem:[#allocation2 + $0x8] sm:$0x7f] }
 0x2fc   : > { %665 = vxpose.xlu0.b32.end [2/2] (short) (narrow) %v663_v46, 16 }
 0x378   : > { %v680_v47 = vpop.trf.xlu0 }
 0x379   : > { %697 = vst.msk [vmem:[#allocation3] sm:$0xff] %vm696_vm12, %v680_v47  ;;  %vm852_vm12 = vcmask 34816  }
 0x37c   : > { %v681_v48 = vpop.trf.xlu0 }
 0x37d   : > { %699 = vst.msk [vmem:[#allocation3 + $0x8] sm:$0x1] %vm698_vm13, %v681_v48  ;;  %vm210_vm13 = vcmask 39968  }
 0x37e   : > { %211 = vst.msk [vmem:[#allocation7 + $0x5] sm:$0xff] %vm210_vm13, %v1393_v50 }
 0x384   : > { %v700_v49 = vld [vmem:[#allocation3] ss:$2 sm:$0x1f] }
 0x385   : > { %701 = vxpose.xlu1.b32.start.end [1/1] (short) (narrow) %v700_v49, 16 }
 0x405   : > { %v717_v51 = vpop.trf.xlu1 }
 0x406   : > { %734 = vrot.lane.b32.xlu0 %v717_v51, %s1396_s22 }
 0x409   : > { %v718_v52 = vpop.trf.xlu1 }
 0x40a   : > { %740 = vrot.lane.b32.xlu1 %v718_v52, %s1396_s22 }
 0x478   : > { %v735_v53 = vpop.permute.xlu0 %734 }
 0x479   : > { %738 = vst.msk [vmem:[#allocation5] sm:$0x1f] %vm737_vm3, %v735_v53  ;;  %vm1048_vm3 = vcmask 18432  }
 0x47a   : > { %744 = vst.msk [vmem:[#allocation5] sm:$0xe0] %vm743_vm5, %v735_v53  ;;  %vm1125_vm5 = vcmask 9216  }
 0x47c   : > { %v741_v54 = vpop.permute.xlu1 %740 }
 0x47d   : > { %746 = vst.msk [vmem:[#allocation5 + $0x8] sm:$0x3] %vm745_vm6, %v741_v54 }
 0x47e   : > { %748 = vst.msk [vmem:[#allocation5 + $0x8] sm:$0x7c] %vm747_vm7, %v741_v54 }
 0x480   : > { %v749_v55 = vld [vmem:[#allocation5] sm:$0xf] }
 0x481   : > { %v750_v56 = vld [vmem:[#allocation5 + $0x1] sm:$0xf] }
 0x482   : > { %v751_v57 = vmax.f32 %v749_v55, %v750_v56 }
 0x484   : > { %753 = vrot.lane.b32.xlu0 %v751_v57, %s1391_s9  ;;  %v767_v58 = vld [vmem:[#allocation5 + $0x5] sm:$0xf] }
 0x485   : > { %v768_v59 = vld [vmem:[#allocation5 + $0x6] sm:$0xf]  ;;  %v784_v61 = vld [vmem:[#allocation5 + $0xa] sm:$0xf] }
 0x486   : > { %v769_v60 = vmax.f32 %v767_v58, %v768_v59  ;;  %v785_v62 = vld [vmem:[#allocation5 + $0xb] sm:$0xf] }
 0x487   : > { %v786_v63 = vmax.f32 %v784_v61, %v785_v62 }
 0x488   : > { %757 = vrot.lane.b32.xlu0 %v751_v57, %s1392_s15  ;;  %771 = vrot.lane.b32.xlu1 %v769_v60, %s1391_s9 }
 0x48c   : > { %788 = vrot.lane.b32.xlu0 %v786_v63, %s1391_s9  ;;  %775 = vrot.lane.b32.xlu1 %v769_v60, %s1392_s15 }
 0x490   : > { %792 = vrot.lane.b32.xlu1 %v786_v63, %s1392_s15 }
 0x4f6   : > { %v754_v0 = vpop.permute.xlu0 %753 }
 0x4f7   : > { %v756_v1 = vmax.f32 %v751_v57, %v754_v0 }
 0x4fa   : > { %v758_v2 = vpop.permute.xlu0 %757  ;;  %v772_v3 = vpop.permute.xlu1 %771 }
 0x4fb   : > { %v760_v4 = vmax.f32 %v756_v1, %v758_v2  ;;  %v774_v5 = vmax.f32 %v769_v60, %v772_v3 }
 0x4fd   : > { %762 = vrot.lane.b32.xlu0 %v760_v4, %s1394_s19 }
 0x4fe   : > { %v789_v6 = vpop.permute.xlu0 %788  ;;  %v776_v7 = vpop.permute.xlu1 %775 }
 0x4ff   : > { %v778_v8 = vmax.f32 %v774_v5, %v776_v7  ;;  %v791_v9 = vmax.f32 %v786_v63, %v789_v6 }
 0x501   : > { %780 = vrot.lane.b32.xlu1 %v778_v8, %s1394_s19 }
 0x502   : > { %v793_v10 = vpop.permute.xlu1 %792 }
 0x503   : > { %v795_v11 = vmax.f32 %v791_v9, %v793_v10  ;;  %v915_v9 = vld [vmem:[#allocation6 + $0x20] ss:$2 sm:$0x7] }
 0x505   : > { %797 = vrot.lane.b32.xlu0 %v795_v11, %s1394_s19 }
 0x56f   : > { %v763_v16 = vpop.permute.xlu0 %762 }
 0x570   : > { %766 = vst.msk [vmem:[#allocation6 + $0xa] sm:$0xf] %vm765_vm4, %v763_v16  ;;  %v921_v16 = vld [vmem:[#allocation6 + $0x22] ss:$2 sm:$0x7] }
 0x573   : > { %v781_v19 = vpop.permute.xlu1 %780 }
 0x574   : > { %783 = vst.msk [vmem:[#allocation6 + $0x12] sm:$0xf] %vm765_vm4, %v781_v19 }
 0x577   : > { %v798_v21 = vpop.permute.xlu0 %797  ;;  %v812_v22 = vld [vmem:[#allocation6 + $0x8] ss:$2 sm:$0x7]  ;;  %v815_v24 = vld [vmem:[#allocation6 + $0x9] ss:$2 sm:$0x7] }
 0x578   : > { %800 = vst.msk [vmem:[#allocation6 + $0x1a] sm:$0xf] %vm765_vm4, %v798_v21  ;;  %v813_v23 = vmax.f32 %v810_v20, %v812_v22  ;;  %v854_v25 = vld [vmem:[#allocation6 + $0x8] ss:$2 sm:$0x7] }
 0x579   : > { %v855_v26 = vld [vmem:[#allocation6 + $0x9] ss:$2 sm:$0x7]  ;;  %v818_v29 = vld [vmem:[#allocation6 + $0xa] ss:$2 sm:$0x7] }
 0x57a   : > { %v816_v27 = vmax.f32 %v813_v23, %v815_v24  ;;  %v856_v28 = vmax.f32 %v854_v25, %v855_v26  ;;  %v857_v30 = vld [vmem:[#allocation6 + $0xa] ss:$2 sm:$0x7]  ;;  %v821_v33 = vld [vmem:[#allocation6 + $0xb] ss:$2 sm:$0x7] }
 0x57b   : > { %v859_v34 = vld [vmem:[#allocation6 + $0xb] ss:$2 sm:$0x7]  ;;  %v824_v37 = vld [vmem:[#allocation6 + $0x10] ss:$2 sm:$0x7] }
 0x57c   : > { %v819_v31 = vmax.f32 %v816_v27, %v818_v29  ;;  %v858_v32 = vmax.f32 %v856_v28, %v857_v30  ;;  %v861_v38 = vld [vmem:[#allocation6 + $0x10] ss:$2 sm:$0x7]  ;;  %v827_v40 = vld [vmem:[#allocation6 + $0x11] ss:$2 sm:$0x7] }
 0x57d   : > { %v863_v42 = vld [vmem:[#allocation6 + $0x11] ss:$2 sm:$0x7]  ;;  %v899_v43 = vld [vmem:[#allocation6 + $0x10] ss:$2 sm:$0x7] }
 0x57e   : > { %v822_v35 = vmax.f32 %v819_v31, %v821_v33  ;;  %v860_v36 = vmax.f32 %v858_v32, %v859_v34  ;;  %v900_v44 = vld [vmem:[#allocation6 + $0x11] ss:$2 sm:$0x7]  ;;  %v830_v46 = vld [vmem:[#allocation6 + $0x12] ss:$2 sm:$0x7] }
 0x57f   : > { %v901_v48 = vmax.f32 %v899_v43, %v900_v44  ;;  %v865_v49 = vld [vmem:[#allocation6 + $0x12] ss:$2 sm:$0x7]  ;;  %v833_v53 = vld [vmem:[#allocation6 + $0x13] ss:$2 sm:$0x7] }
 0x580   : > { %v825_v39 = vmax.f32 %v822_v35, %v824_v37  ;;  %v862_v41 = vmax.f32 %v860_v36, %v861_v38  ;;  %v902_v51 = vld [vmem:[#allocation6 + $0x12] ss:$2 sm:$0x7]  ;;  %v867_v56 = vld [vmem:[#allocation6 + $0x13] ss:$2 sm:$0x7] }
 0x581   : > { %v903_v55 = vmax.f32 %v901_v48, %v902_v51  ;;  %v904_v57 = vld [vmem:[#allocation6 + $0x13] ss:$2 sm:$0x7]  ;;  %v870_v61 = vld [vmem:[#allocation6 + $0x18] ss:$2 sm:$0x7] }
 0x582   : > { %v828_v45 = vmax.f32 %v825_v39, %v827_v40  ;;  %v864_v47 = vmax.f32 %v862_v41, %v863_v42  ;;  %v906_v62 = vld [vmem:[#allocation6 + $0x18] ss:$2 sm:$0x7]  ;;  %v873_v1 = vld [vmem:[#allocation6 + $0x19] ss:$2 sm:$0x7] }
 0x583   : > { %v905_v60 = vmax.f32 %v903_v55, %v904_v57  ;;  %v908_v2 = vld [vmem:[#allocation6 + $0x19] ss:$2 sm:$0x7]  ;;  %v876_v5 = vld [vmem:[#allocation6 + $0x1a] ss:$2 sm:$0x7] }
 0x584   : > { %v831_v52 = vmax.f32 %v828_v45, %v830_v46  ;;  %v866_v54 = vmax.f32 %v864_v47, %v865_v49  ;;  %v910_v6 = vld [vmem:[#allocation6 + $0x1a] ss:$2 sm:$0x7]  ;;  %v879_v10 = vld [vmem:[#allocation6 + $0x1b] ss:$2 sm:$0x7] }
 0x585   : > { %v907_v0 = vmax.f32 %v905_v60, %v906_v62  ;;  %v912_v11 = vld [vmem:[#allocation6 + $0x1b] ss:$2 sm:$0x7] }
 0x586   : > { %v834_v58 = vmax.f32 %v831_v52, %v833_v53  ;;  %v868_v59 = vmax.f32 %v866_v54, %v867_v56  ;;  %v1028_v52 = vld [vmem:[#allocation7] sm:$0x7] }
 0x587   : > { %v909_v4 = vmax.f32 %v907_v0, %v908_v2  ;;  %v1029_v53 = vld [vmem:[#allocation7 + $0x1] sm:$0x7] }
 0x588   : > { %840 = vrot.lane.b32.xlu0 %v834_v58, %s1392_s15  ;;  %836 = vrot.lane.b32.xlu1 %v834_v58, %s1391_s9  ;;  %v871_v63 = vmax.f32 %v868_v59, %v870_v61  ;;  %v1030_v55 = vmax.f32 %v1028_v52, %v1029_v53  ;;  %v1031_v56 = vld [vmem:[#allocation7 + $0x2] sm:$0x7] }
 0x589   : > { %v911_v8 = vmax.f32 %v909_v4, %v910_v6 }
 0x58a   : > { %v874_v3 = vmax.f32 %v871_v63, %v873_v1  ;;  %v1032_v50 = vmax.f32 %v1030_v55, %v1031_v56 }
 0x58b   : > { %v913_v13 = vmax.f32 %v911_v8, %v912_v11 }
 0x58c   : > { %848 = vrot.lane.b32.xlu0 %v834_v58, %s1397_s23  ;;  %844 = vrot.lane.b32.xlu1 %v834_v58, %s1395_s21  ;;  %v877_v7 = vmax.f32 %v874_v3, %v876_v5 }
 0x58d   : > { %v916_v15 = vmax.f32 %v913_v13, %v915_v9 }
 0x58e   : > { %v880_v12 = vmax.f32 %v877_v7, %v879_v10 }
 0x58f   : > { %v919_v17 = vmax.f32 %v916_v15, %v918_v14  ;;  %v1097_v15 = vld [vmem:[#allocation7 + $0x14] sm:$0x7] }
 0x590   : > { %882 = vrot.lane.b32.xlu0 %v880_v12, %s1391_s9  ;;  %886 = vrot.lane.b32.xlu1 %v880_v12, %s1392_s15 }
 0x591   : > { %v922_v19 = vmax.f32 %v919_v17, %v921_v16 }
 0x593   : > { %v925_v20 = vmax.f32 %v922_v19, %v924_v18 }
 0x594   : > { %890 = vrot.lane.b32.xlu0 %v880_v12, %s1395_s21 }
 0x595   : > { %927 = vrot.lane.b32.xlu1 %v925_v20, %s1391_s9 }
 0x598   : > { %931 = vrot.lane.b32.xlu0 %v925_v20, %s1392_s15 }
 0x599   : > { %935 = vrot.lane.b32.xlu1 %v925_v20, %s1395_s21 }
 0x59c   : > { %939 = vrot.lane.b32.xlu0 %v925_v20, %s1397_s23 }
 0x59d   : > { %894 = vrot.lane.b32.xlu1 %v880_v12, %s1397_s23 }
 0x5fa   : > { %v841_v21 = vpop.permute.xlu0 %840  ;;  %v837_v22 = vpop.permute.xlu1 %836 }
 0x5fb   : > { %v839_v23 = vmax.f32 %v834_v58, %v837_v22 }
 0x5fd   : > { %v843_v24 = vmax.f32 %v839_v23, %v841_v21 }
 0x5fe   : > { %v849_v25 = vpop.permute.xlu0 %848  ;;  %v845_v26 = vpop.permute.xlu1 %844 }
 0x5ff   : > { %v847_v27 = vmax.f32 %v843_v24, %v845_v26 }
 0x601   : > { %v851_v28 = vmax.f32 %v847_v27, %v849_v25 }
 0x602   : > { %v883_v29 = vpop.permute.xlu0 %882  ;;  %v887_v30 = vpop.permute.xlu1 %886 }
 0x603   : > { %853 = vst.msk [vmem:[#allocation2] sm:$0x7] %vm852_vm12, %v851_v28  ;;  %v885_v32 = vmax.f32 %v880_v12, %v883_v29  ;;  %v1099_v28 = vld [vmem:[#allocation7 + $0x15] sm:$0x7] }
 0x605   : > { %v889_v36 = vmax.f32 %v885_v32, %v887_v30 }
 0x606   : > { %v891_v31 = vpop.permute.xlu0 %890 }
 0x607   : > { %v928_v33 = vpop.permute.xlu1 %927  ;;  %v893_v41 = vmax.f32 %v889_v36, %v891_v31  ;;  %v1101_v31 = vld [vmem:[#allocation7 + $0x16] sm:$0x7] }
 0x608   : > { %v930_v35 = vmax.f32 %v925_v20, %v928_v33 }
 0x60a   : > { %v932_v34 = vpop.permute.xlu0 %931 }
 0x60b   : > { %v934_v37 = vmax.f32 %v930_v35, %v932_v34  ;;  %v936_v38 = vpop.permute.xlu1 %935 }
 0x60d   : > { %v938_v40 = vmax.f32 %v934_v37, %v936_v38 }
 0x60e   : > { %v940_v39 = vpop.permute.xlu0 %939 }
 0x60f   : > { %v942_v42 = vmax.f32 %v938_v40, %v940_v39  ;;  %v895_v43 = vpop.permute.xlu1 %894 }
 0x610   : > { %v897_v44 = vmax.f32 %v893_v41, %v895_v43 }
 0x611   : > { %943 = vst.msk [vmem:[#allocation2 + $0x6] sm:$0x7] %vm852_vm12, %v942_v42 }
 0x612   : > { %898 = vst.msk [vmem:[#allocation2 + $0x3] sm:$0x7] %vm852_vm12, %v897_v44 }
 0x618   : > { %v945_v46 = vld [vmem:[#allocation2 + $0x8] sm:$0x1] }
 0x619   : > { %v944_v45 = vld [vmem:[#allocation2] sm:$0xff] }
 0x61a   : > { %946 = vxpose.xlu1.b32.start [1/2] (short) (narrow) %v944_v45, 8 }
 0x61e   : > { %947 = vxpose.xlu1.b32.end [2/2] (short) (narrow) %v945_v46, 8 }
 0x69a   : > { %v962_v47 = vpop.trf.xlu1 }
 0x69b   : > { %978 = vst.msk [vmem:[#allocation3] sm:$0x1f] %vm554_vm11, %v962_v47  ;;  %vm1016_vm11 = vcmask 26632  }
 0x6a2   : > { %v979_v48 = vld [vmem:[#allocation3] ss:$2 sm:$0x7] }
 0x6a3   : > { %980 = vxpose.xlu0.b32.start.end [1/1] (short) (narrow) %v979_v48, 16 }
 0x723   : > { %v996_v49 = vpop.trf.xlu0 }
 0x724   : > { %1013 = vrot.lane.b32.xlu0 %v996_v49, %s1396_s22 }
 0x727   : > { %v997_v51 = vpop.trf.xlu0 }
 0x728   : > { %1021 = vrot.lane.b32.xlu1 %v997_v51, %s1396_s22 }
 0x796   : > { %v1014_v54 = vpop.permute.xlu0 %1013 }
 0x797   : > { %1017 = vst.msk [vmem:[#allocation7 + $0x6] sm:$0x7] %vm1016_vm11, %v1014_v54 }
 0x798   : > { %1019 = vst.msk [vmem:[#allocation7 + $0x8] sm:$0x38] %vm1018_vm0, %v1014_v54 }
 0x799   : > { %1025 = vst.msk [vmem:[#allocation7 + $0xa] sm:$0xc0] %vm1024_vm1, %v1014_v54 }
 0x79a   : > { %v1022_v57 = vpop.permute.xlu1 %1021 }
 0x79b   : > { %1027 = vst.msk [vmem:[#allocation7 + $0x12] sm:$0x1] %vm1026_vm2, %v1022_v57 }
 0x79e   : > { %v1033_v58 = vld [vmem:[#allocation7 + $0x5] sm:$0x7] }
 0x79f   : > { %v1034_v59 = vmax.f32 %v1032_v50, %v1033_v58  ;;  %v1050_v60 = vld [vmem:[#allocation7 + $0x5] sm:$0x7]  ;;  %v1071_v2 = vld [vmem:[#allocation7 + $0xa] sm:$0x7] }
 0x7a0   : > { %v1051_v61 = vld [vmem:[#allocation7 + $0x6] sm:$0x7]  ;;  %v1072_v3 = vld [vmem:[#allocation7 + $0xb] sm:$0x7]  ;;  %v1092_v10 = vld [vmem:[#allocation7 + $0xf] sm:$0x7] }
 0x7a1   : > { %v1035_v62 = vld [vmem:[#allocation7 + $0x6] sm:$0x7]  ;;  %v1052_v63 = vmax.f32 %v1050_v60, %v1051_v61  ;;  %v1055_v6 = vld [vmem:[#allocation7 + $0xa] sm:$0x7]  ;;  %v1073_v7 = vmax.f32 %v1071_v2, %v1072_v3  ;;  %v1076_v17 = vld [vmem:[#allocation7 + $0xf] sm:$0x7] }
 0x7a2   : > { %v1036_v0 = vmax.f32 %v1034_v59, %v1035_v62  ;;  %v1053_v1 = vld [vmem:[#allocation7 + $0x7] sm:$0x7]  ;;  %v1074_v9 = vld [vmem:[#allocation7 + $0xc] sm:$0x7]  ;;  %v1093_v11 = vld [vmem:[#allocation7 + $0x10] sm:$0x7] }
 0x7a3   : > { %v1037_v4 = vld [vmem:[#allocation7 + $0x7] sm:$0x7]  ;;  %v1054_v5 = vmax.f32 %v1052_v63, %v1053_v1  ;;  %v1075_v13 = vmax.f32 %v1073_v7, %v1074_v9  ;;  %v1094_v14 = vmax.f32 %v1092_v10, %v1093_v11  ;;  %v1057_v16 = vld [vmem:[#allocation7 + $0xb] sm:$0x7]  ;;  %v1095_v18 = vld [vmem:[#allocation7 + $0x11] sm:$0x7] }
 0x7a4   : > { %v1038_v8 = vmax.f32 %v1036_v0, %v1037_v4  ;;  %v1059_v22 = vld [vmem:[#allocation7 + $0xc] sm:$0x7]  ;;  %v1078_v23 = vld [vmem:[#allocation7 + $0x10] sm:$0x7] }
 0x7a5   : > { %v1056_v12 = vmax.f32 %v1054_v5, %v1055_v6  ;;  %v1077_v20 = vmax.f32 %v1075_v13, %v1076_v17  ;;  %v1096_v21 = vmax.f32 %v1094_v14, %v1095_v18  ;;  %v1080_v27 = vld [vmem:[#allocation7 + $0x11] sm:$0x7] }
 0x7a6   : > { %1044 = vrot.lane.b32.xlu0 %v1038_v8, %s1392_s15  ;;  %1040 = vrot.lane.b32.xlu1 %v1038_v8, %s1391_s9 }
 0x7a7   : > { %v1058_v19 = vmax.f32 %v1056_v12, %v1057_v16  ;;  %v1079_v25 = vmax.f32 %v1077_v20, %v1078_v23  ;;  %v1098_v26 = vmax.f32 %v1096_v21, %v1097_v15 }
 0x7a9   : > { %v1060_v24 = vmax.f32 %v1058_v19, %v1059_v22  ;;  %v1081_v29 = vmax.f32 %v1079_v25, %v1080_v27  ;;  %v1100_v30 = vmax.f32 %v1098_v26, %v1099_v28 }
 0x7ab   : > { %1062 = vrot.lane.b32.xlu0 %v1060_v24, %s1391_s9  ;;  %1083 = vrot.lane.b32.xlu1 %v1081_v29, %s1391_s9  ;;  %v1102_v32 = vmax.f32 %v1100_v30, %v1101_v31 }
 0x7af   : > { %1087 = vrot.lane.b32.xlu0 %v1081_v29, %s1392_s15  ;;  %1066 = vrot.lane.b32.xlu1 %v1060_v24, %s1392_s15 }
 0x7b3   : > { %1108 = vrot.lane.b32.xlu0 %v1102_v32, %s1392_s15  ;;  %1104 = vrot.lane.b32.xlu1 %v1102_v32, %s1391_s9 }
 0x818   : > { %v1045_v33 = vpop.permute.xlu0 %1044  ;;  %v1041_v34 = vpop.permute.xlu1 %1040 }
 0x819   : > { %v1043_v35 = vmax.f32 %v1038_v8, %v1041_v34 }
 0x81b   : > { %v1047_v36 = vmax.f32 %v1043_v35, %v1045_v33 }
 0x81d   : > { %1049 = vst.msk [vmem:[#allocation8] sm:$0x7] %vm1048_vm3, %v1047_v36  ;;  %v1063_v37 = vpop.permute.xlu0 %1062  ;;  %v1084_v38 = vpop.permute.xlu1 %1083 }
 0x81e   : > { %v1086_v39 = vmax.f32 %v1081_v29, %v1084_v38  ;;  %v1065_v41 = vmax.f32 %v1060_v24, %v1063_v37 }
 0x821   : > { %v1088_v40 = vpop.permute.xlu0 %1087  ;;  %v1067_v43 = vpop.permute.xlu1 %1066 }
 0x822   : > { %v1090_v42 = vmax.f32 %v1086_v39, %v1088_v40  ;;  %v1069_v44 = vmax.f32 %v1065_v41, %v1067_v43 }
 0x824   : > { %1091 = vst.msk [vmem:[#allocation8 + $0x6] sm:$0x7] %vm1048_vm3, %v1090_v42  ;;  %1070 = vst.msk [vmem:[#allocation8 + $0x3] sm:$0x7] %vm1048_vm3, %v1069_v44  ;;  %v1113_v48 = vld [vmem:[#allocation8] sm:$0x3] }
 0x825   : > { %v1105_v45 = vpop.permute.xlu1 %1104  ;;  %v1109_v47 = vpop.permute.xlu0 %1108  ;;  %v1114_v49 = vld [vmem:[#allocation8 + $0x1] sm:$0x3] }
 0x826   : > { %v1107_v46 = vmax.f32 %v1102_v32, %v1105_v45  ;;  %v1115_v52 = vmax.f32 %v1113_v48, %v1114_v49 }
 0x828   : > { %v1111_v51 = vmax.f32 %v1107_v46, %v1109_v47 }
 0x82a   : > { %1112 = vst.msk [vmem:[#allocation8 + $0x9] sm:$0x7] %vm1048_vm3, %v1111_v51 }
 0x82b   : > { %v1116_v53 = vld [vmem:[#allocation8 + $0x3] sm:$0x3]  ;;  %v1140_v58 = vld [vmem:[#allocation8 + $0x6] sm:$0x3] }
 0x82c   : > { %v1127_v54 = vld [vmem:[#allocation8 + $0x3] sm:$0x3]  ;;  %v1117_v55 = vmax.f32 %v1115_v52, %v1116_v53  ;;  %v1141_v59 = vld [vmem:[#allocation8 + $0x7] sm:$0x3] }
 0x82d   : > { %v1128_v56 = vld [vmem:[#allocation8 + $0x4] sm:$0x3]  ;;  %v1130_v61 = vld [vmem:[#allocation8 + $0x6] sm:$0x3]  ;;  %v1142_v0 = vmax.f32 %v1140_v58, %v1141_v59 }
 0x82e   : > { %v1118_v57 = vld [vmem:[#allocation8 + $0x4] sm:$0x3]  ;;  %v1129_v50 = vmax.f32 %v1127_v54, %v1128_v56  ;;  %v1132_v63 = vld [vmem:[#allocation8 + $0x7] sm:$0x3] }
 0x82f   : > { %v1119_v60 = vmax.f32 %v1117_v55, %v1118_v57 }
 0x830   : > { %v1131_v62 = vmax.f32 %v1129_v50, %v1130_v61 }
 0x831   : > { %1121 = vrot.lane.b32.xlu1 %v1119_v60, %s1391_s9  ;;  %v1143_v2 = vld [vmem:[#allocation8 + $0x9] sm:$0x3] }
 0x832   : > { %v1133_v1 = vmax.f32 %v1131_v62, %v1132_v63  ;;  %v1144_v3 = vmax.f32 %v1142_v0, %v1143_v2  ;;  %v1145_v4 = vld [vmem:[#allocation8 + $0xa] sm:$0x3] }
 0x834   : > { %1135 = vrot.lane.b32.xlu0 %v1133_v1, %s1391_s9  ;;  %v1146_v5 = vmax.f32 %v1144_v3, %v1145_v4 }
 0x836   : > { %1148 = vrot.lane.b32.xlu1 %v1146_v5, %s1391_s9 }
 0x8a3   : > { %v1122_v6 = vpop.permute.xlu1 %1121 }
 0x8a4   : > { %v1124_v7 = vmax.f32 %v1119_v60, %v1122_v6 }
 0x8a6   : > { %1126 = vst.msk [vmem:[%s134_s27] sm:$0x3] %vm1125_vm5, %v1124_v7  ;;  %v1136_v8 = vpop.permute.xlu0 %1135 }
 0x8a7   : > { %v1138_v9 = vmax.f32 %v1133_v1, %v1136_v8 }
 0x8a8   : > { %v1149_v10 = vpop.permute.xlu1 %1148 }
 0x8a9   : > { %1139 = vst.msk [vmem:[%s134_s27 + $0x2] sm:$0x3] %vm1125_vm5, %v1138_v9  ;;  %v1151_v11 = vmax.f32 %v1146_v5, %v1149_v10 }
 0x8ab   : > { %1152 = vst.msk [vmem:[%s134_s27 + $0x4] sm:$0x3] %vm1125_vm5, %v1151_v11 }
 0x8ac PF: > { %p11_p8 = scmp.ge.s32.totalorder %s1430_s11, 6   ;;  %s1727_s6 = smov %s1378_s7 }
 0x8ad   : > { %s1728_s7 = smov %s1382_s8  ;;  %s1729_s8 = smov %s1440_s14 }
 0x8ae   : > { %s1730_s9 = smov %s1430_s11  ;;  %13 = sbr.rel (!%p11_p8) target bundleno = 3 (0x3), region = 158 }
 0x8b5   :  { %1172 = vsyncpa [#allocation10], 1 }
 0x8b6   :  { %1174 = vsyncpa [#allocation10 + $0x1], 1 }

</bundles_post_ra>
